<compile_context>
chip_gen: v6e
topology: v6e:2x2x1
jax: 0.10.0
libtpu: 0.0.40
codegen_flags: <defaults>
</compile_context>

<pallas_src>
import math
import functools

import jax
import jax.numpy as jnp
from jax.experimental import pallas as pl
from jax.experimental.pallas import tpu as pltpu


# ----------------------------- in-kernel helpers --------------------------- #

def _elu(x):
    # ELU(alpha=1): x if x > 0 else exp(x) - 1  (clamp avoids inf in dead branch)
    return jnp.where(x > 0, x, jnp.exp(jnp.minimum(x, 0.0)) - 1.0)


def _sigmoid(x):
    # divide on the EUP slot instead of the VPU
    return pl.reciprocal(1.0 + jnp.exp(-x), approx=True)


# ------------------------------- fused kernel ------------------------------ #

def fused_speaker_encoder_kernel(
        mel_ref,
        wp1_ref, bp1_ref, wp2_ref, bp2_ref,
        wc_ref, bc_ref,
        wk_ref, bk_ref, wq_ref, bq_ref, wv_ref, bv_ref,
        whk_ref, bhk_ref, whq_ref, bhq_ref, whv_ref, bhv_ref,
        wout_ref, bout_ref, wfc_ref, bfc_ref, wprj_ref, bprj_ref,
        o_ref,
        xpad_ref,
        *, T, C, k, dilations, num_heads, dk, n_batch, n_clone, pad_max):
    B = n_batch
    N = n_clone
    Bc = B * N                      # batch*clones rows
    Cin = mel_ref.shape[2]
    A = wk_ref.shape[1]             # d_attn
    E = wprj_ref.shape[1]           # d_embedding
    sqrt_half = jnp.float32(math.sqrt(0.5))

    # ---- prenet: 2x (Linear + ELU); batch*time folded into M (=Bc*T) ------- #
    x = mel_ref[...].reshape(Bc * T, Cin)
    x = _elu(jnp.dot(x, wp1_ref[...], preferred_element_type=jnp.float32)
             + bp1_ref[...])
    x = _elu(jnp.dot(x, wp2_ref[...], preferred_element_type=jnp.float32)
             + bp2_ref[...])                                      # (Bc*T, C)

    # ---- 5x dilated Conv1dGLU; activation stays vreg/VMEM resident --------- #
    # Halo padding lives in a VMEM scratch whose interior starts at the
    # 8-aligned offset `pad_max`; halo region is zeroed once and never written.
    xpad_ref[...] = jnp.zeros(xpad_ref.shape, jnp.float32)
    for l, dil in enumerate(dilations):
        pad = (k - 1) // 2 * dil
        offs = [j * dil - pad for j in range(k)]
        needs_halo = any(0 < abs(o) < T for o in offs)
        if needs_halo:
            xpad_ref[:, pl.ds(pad_max, T), :] = x.reshape(Bc, T, C)

        acc = jnp.zeros((Bc * T, 2 * C), jnp.float32) + bc_ref[l]
        for j, off in enumerate(offs):
            if off <= -T or off >= T:
                continue            # tap reads only zero padding -> skip
            if off == 0:
                xs = x              # center tap: reuse the resident value
            else:
                xs = xpad_ref[:, pl.ds(pad_max + off, T), :].reshape(Bc * T, C)
            acc = acc + jnp.dot(xs, wc_ref[l, j],
                                preferred_element_type=jnp.float32)
        glu = acc[:, :C] * _sigmoid(acc[:, C:])
        x = (glu + x) * sqrt_half                                 # (Bc*T, C)

    # ---- mean pool over time (fused epilogue) ------------------------------ #
    pooled = jnp.mean(x.reshape(Bc, T, C), axis=1)                # (Bc, C)

    # ---- sample attention --------------------------------------------------- #
    def fc_elu(w_ref, b_ref):
        return _elu(jnp.dot(pooled, w_ref[...],
                            preferred_element_type=jnp.float32) + b_ref[...])

    K = fc_elu(wk_ref, bk_ref)                                    # (Bc, A)
    Q = fc_elu(wq_ref, bq_ref)
    V = fc_elu(wv_ref, bv_ref)

    # Batched per-head projections (head weights pre-concatenated; 1/sqrt(dk)
    # already folded into the query weights/bias).
    keyall = (jnp.dot(K, whk_ref[...], preferred_element_type=jnp.float32)
              + bhk_ref[...]).reshape(B, N, num_heads * dk)
    qryall = (jnp.dot(Q, whq_ref[...], preferred_element_type=jnp.float32)
              + bhq_ref[...]).reshape(B, N, num_heads * dk)
    valall = (jnp.dot(V, whv_ref[...], preferred_element_type=jnp.float32)
              + bhv_ref[...]).reshape(B, N, num_heads * dk)

    out_acc = jnp.zeros((Bc, A), jnp.float32) + bout_ref[...]
    for h in range(num_heads):
        sl = slice(h * dk, (h + 1) * dk)
        key, query, value = keyall[:, :, sl], qryall[:, :, sl], valall[:, :, sl]
        y = jnp.einsum('bnd,bmd->bnm', query, key,
                       preferred_element_type=jnp.float32)        # (B, N, N)
        # torch legacy F.softmax(x) (no dim) on a 3-D tensor => softmax over dim 0
        m = jnp.max(y, axis=0, keepdims=True)
        e = jnp.exp(y - m)
        attn = e * pl.reciprocal(jnp.sum(e, axis=0, keepdims=True), approx=True)
        head = jnp.einsum('bnm,bmd->bnd', attn, value,
                          preferred_element_type=jnp.float32)     # (B, N, dk)
        # out_projection folded per-head (rows pre-permuted in the wrapper)
        out_acc = out_acc + jnp.dot(head.reshape(Bc, dk), wout_ref[h],
                                    preferred_element_type=jnp.float32)

    mh = out_acc.reshape(B, N, A)
    logits = jnp.sum(mh * wfc_ref[...], axis=-1) + bfc_ref[...]   # (B, N)
    lm = jnp.max(logits, axis=1, keepdims=True)
    le = jnp.exp(logits - lm)
    attn_w = le * pl.reciprocal(jnp.sum(le, axis=1, keepdims=True), approx=True)

    cs = (jnp.dot(pooled, wprj_ref[...], preferred_element_type=jnp.float32)
          + bprj_ref[...]).reshape(B, N, E)                       # cloning samples
    o_ref[...] = jnp.sum(attn_w[:, :, None] * cs, axis=1)         # (B, E)


# ----------------------------- parameter setup ----------------------------- #

def _linear(key, fan_in, fan_out):
    kw, kb = jax.random.split(key)
    bound = 1.0 / math.sqrt(fan_in)
    w = jax.random.uniform(kw, (fan_in, fan_out), jnp.float32, -bound, bound)
    b = jax.random.uniform(kb, (1, fan_out), jnp.float32, -bound, bound)
    return w, b


def _conv(key, c, k):
    kw, kb = jax.random.split(key)
    bound = 1.0 / math.sqrt(c * k)
    w = jax.random.uniform(kw, (k, c, 2 * c), jnp.float32, -bound, bound)
    b = jax.random.uniform(kb, (1, 2 * c), jnp.float32, -bound, bound)
    return w, b


class SpeakerEncoderPallas:
    def __init__(self, in_channels, encoder_channels, kernel_size, f_mapped,
                 d_embedding, num_heads, d_attn, dropout, batch_size,
                 cloning_sample_size, key):
        # TODO(synk): train-mode dropout not implemented; inference (p=0) semantics.
        del encoder_channels, dropout
        self.k = kernel_size
        self.f_mapped = f_mapped
        self.num_heads = num_heads
        self.d_attn = d_attn
        self.d_k = d_attn // num_heads
        self.d_embedding = d_embedding
        self.batch_size = batch_size
        self.cloning_sample_size = cloning_sample_size
        self.dilations = (1, 3, 9, 27, 1)
        pad_needed = (kernel_size - 1) // 2 * max(self.dilations)
        self.pad_max = ((pad_needed + 7) // 8) * 8    # 8-aligned interior offset

        keys = iter(jax.random.split(key, 32))
        # prenet (preattention = 2 layers)
        self.w_pre1, self.b_pre1 = _linear(next(keys), in_channels, f_mapped)
        self.w_pre2, self.b_pre2 = _linear(next(keys), f_mapped, f_mapped)
        # Conv1dGLU stack, weights stacked -> single VMEM-resident refs
        wc, bc = [], []
        for _ in self.dilations:
            w, b = _conv(next(keys), f_mapped, kernel_size)
            wc.append(w)
            bc.append(b)
        self.wconv = jnp.stack(wc)                    # (L, k, C, 2C)
        self.bconv = jnp.stack(bc)                    # (L, 1, 2C)
        # SampleAttention: K/Q/V FC_ELU projections
        self.wk, self.bk = _linear(next(keys), f_mapped, d_attn)
        self.wq, self.bq = _linear(next(keys), f_mapped, d_attn)
        self.wv, self.bv = _linear(next(keys), f_mapped, d_attn)

        def head_cat(k_, scale=1.0):
            ks = jax.random.split(k_, num_heads)
            ws, bs = zip(*[_linear(kk, d_attn, self.d_k) for kk in ks])
            wcat = jnp.concatenate([w * scale for w in ws], axis=1)  # (A, H*dk)
            bcat = jnp.concatenate([b * scale for b in bs], axis=1)  # (1, H*dk)
            return wcat, bcat

        self.whk_cat, self.bhk_cat = head_cat(next(keys))
        # fold the 1/sqrt(d_k) score scale into the query head projection
        self.whq_cat, self.bhq_cat = head_cat(next(keys),
                                              scale=1.0 / math.sqrt(self.d_k))
        self.whv_cat, self.bhv_cat = head_cat(next(keys))
        # out_projection: torch stacks heads on dim=3 then views -> interleaved
        # concat; equivalent to summing head_h @ woutT[h::H] per head.
        woutT, self.bout = _linear(next(keys), d_attn, d_attn)      # (A, A)
        self.wout_h = jnp.stack([woutT[h::num_heads]
                                 for h in range(num_heads)])        # (H, dk, A)
        # fc: Linear(d_attn, 1)
        wfc, self.bfc = _linear(next(keys), d_attn, 1)
        self.wfc = wfc.reshape(1, d_attn)
        # cloning_sample_prj: Linear(f_mapped, d_embedding)
        self.wprj, self.bprj = _linear(next(keys), f_mapped, d_embedding)

    def __call__(self, mel):
        # mel: (batch*cloning_sample_size, T, in_channels) -- channels last
        Bc, T, _ = mel.shape
        assert Bc == self.batch_size * self.cloning_sample_size
        tpad = T + 2 * self.pad_max

        kern = functools.partial(
            fused_speaker_encoder_kernel,
            T=T, C=self.f_mapped, k=self.k, dilations=self.dilations,
            num_heads=self.num_heads, dk=self.d_k,
            n_batch=self.batch_size, n_clone=self.cloning_sample_size,
            pad_max=self.pad_max)

        # Single fused kernel: no grid, everything VMEM resident.
        # (Megacore split is not applied: the legacy dim-0 softmax couples the
        #  batch dimension, and the whole problem fits one TC trivially.)
        emb = pl.pallas_call(
            kern,
            out_shape=jax.ShapeDtypeStruct(
                (self.batch_size, self.d_embedding), jnp.float32),
            scratch_shapes=[pltpu.VMEM((Bc, tpad, self.f_mapped), jnp.float32)],
        )(mel,
          self.w_pre1, self.b_pre1, self.w_pre2, self.b_pre2,
          self.wconv, self.bconv,
          self.wk, self.bk, self.wq, self.bq, self.wv, self.bv,
          self.whk_cat, self.bhk_cat, self.whq_cat, self.bhq_cat,
          self.whv_cat, self.bhv_cat,
          self.wout_h, self.bout, self.wfc, self.bfc, self.wprj, self.bprj)
        return emb


# ----------------------------------- main ----------------------------------- #

if __name__ == "__main__":
    in_channels = 16
    encoder_channels = 32
    kernel_size = 3
    f_mapped = 32
    d_embedding = 32
    num_heads = 4
    d_attn = 32
    dropout = 0.0
    batch_size = 2
    cloning_sample_size = 4
    T = 16

    root = jax.random.PRNGKey(0)
    pk, xk = jax.random.split(root)

    enc = SpeakerEncoderPallas(in_channels, encoder_channels, kernel_size,
                               f_mapped, d_embedding, num_heads, d_attn,
                               dropout, batch_size, cloning_sample_size, pk)

    mel = jax.random.normal(
        xk, (batch_size * cloning_sample_size, T, in_channels), jnp.float32)

    out = enc(mel)
    out = jax.block_until_ready(out)
    assert out.shape == (batch_size, d_embedding), out.shape
    assert bool(jnp.all(jnp.isfinite(out)))
    print("KERNEL_OK")
</pallas_src>

<mosaic_0001>
module attributes {stable_mosaic.version = 11 : i64} {
  func.func @fused_speaker_encoder_kernel(%arg0: memref<8x16x16xf32, #tpu.memory_space<vmem>>, %arg1: memref<16x32xf32, #tpu.memory_space<vmem>>, %arg2: memref<1x32xf32, #tpu.memory_space<vmem>>, %arg3: memref<32x32xf32, #tpu.memory_space<vmem>>, %arg4: memref<1x32xf32, #tpu.memory_space<vmem>>, %arg5: memref<5x3x32x64xf32, #tpu.memory_space<vmem>>, %arg6: memref<5x1x64xf32, #tpu.memory_space<vmem>>, %arg7: memref<32x32xf32, #tpu.memory_space<vmem>>, %arg8: memref<1x32xf32, #tpu.memory_space<vmem>>, %arg9: memref<32x32xf32, #tpu.memory_space<vmem>>, %arg10: memref<1x32xf32, #tpu.memory_space<vmem>>, %arg11: memref<32x32xf32, #tpu.memory_space<vmem>>, %arg12: memref<1x32xf32, #tpu.memory_space<vmem>>, %arg13: memref<32x32xf32, #tpu.memory_space<vmem>>, %arg14: memref<1x32xf32, #tpu.memory_space<vmem>>, %arg15: memref<32x32xf32, #tpu.memory_space<vmem>>, %arg16: memref<1x32xf32, #tpu.memory_space<vmem>>, %arg17: memref<32x32xf32, #tpu.memory_space<vmem>>, %arg18: memref<1x32xf32, #tpu.memory_space<vmem>>, %arg19: memref<4x8x32xf32, #tpu.memory_space<vmem>>, %arg20: memref<1x32xf32, #tpu.memory_space<vmem>>, %arg21: memref<1x32xf32, #tpu.memory_space<vmem>>, %arg22: memref<1x1xf32, #tpu.memory_space<vmem>>, %arg23: memref<32x32xf32, #tpu.memory_space<vmem>>, %arg24: memref<1x32xf32, #tpu.memory_space<vmem>>, %arg25: memref<2x32xf32, #tpu.memory_space<vmem>>, %arg26: memref<8x80x32xf32, #tpu.memory_space<vmem>>) attributes {dimension_semantics = [], scalar_prefetch = 0 : i64, scratch_operands = 1 : i64, tpu.core_type = #tpu.core_type<tc>} {
    %c0 = arith.constant 0 : index
    %c0_0 = arith.constant 0 : index
    %c0_1 = arith.constant 0 : index
    %0 = vector.load %arg0[%c0, %c0_0, %c0_1] : memref<8x16x16xf32, #tpu.memory_space<vmem>>, vector<8x16x16xf32>
    %1 = vector.shape_cast %0 : vector<8x16x16xf32> to vector<128x16xf32>
    %c0_2 = arith.constant 0 : index
    %c0_3 = arith.constant 0 : index
    %2 = vector.load %arg1[%c0_2, %c0_3] : memref<16x32xf32, #tpu.memory_space<vmem>>, vector<16x32xf32>
    %cst = arith.constant dense<0.000000e+00> : vector<128x32xf32>
    %3 = tpu.matmul %1, %2, %cst {dimension_numbers = #tpu.dot_dimension_numbers<[1], [0], [0], [1], [0, 0, 1, 1], [], []>} : vector<128x16xf32>, vector<16x32xf32>, vector<128x32xf32> -> vector<128x32xf32>
    %c0_4 = arith.constant 0 : index
    %c0_5 = arith.constant 0 : index
    %4 = vector.load %arg2[%c0_4, %c0_5] : memref<1x32xf32, #tpu.memory_space<vmem>>, vector<1x32xf32>
    %5 = vector.broadcast %4 : vector<1x32xf32> to vector<128x32xf32>
    %6 = arith.addf %3, %5 : vector<128x32xf32>
    %cst_6 = arith.constant 0.000000e+00 : f32
    %7 = vector.broadcast %cst_6 : f32 to vector<128x32xf32>
    %8 = arith.cmpf ogt, %6, %7 : vector<128x32xf32>
    %cst_7 = arith.constant 0.000000e+00 : f32
    %9 = vector.broadcast %cst_7 : f32 to vector<128x32xf32>
    %10 = arith.minimumf %6, %9 : vector<128x32xf32>
    %11 = math.exp %10 : vector<128x32xf32>
    %cst_8 = arith.constant 1.000000e+00 : f32
    %12 = vector.broadcast %cst_8 : f32 to vector<128x32xf32>
    %13 = arith.subf %11, %12 : vector<128x32xf32>
    %14 = arith.select %8, %6, %13 : vector<128x32xi1>, vector<128x32xf32>
    %c0_9 = arith.constant 0 : index
    %c0_10 = arith.constant 0 : index
    %15 = vector.load %arg3[%c0_9, %c0_10] : memref<32x32xf32, #tpu.memory_space<vmem>>, vector<32x32xf32>
    %cst_11 = arith.constant dense<0.000000e+00> : vector<128x32xf32>
    %16 = tpu.matmul %14, %15, %cst_11 {dimension_numbers = #tpu.dot_dimension_numbers<[1], [0], [0], [1], [0, 0, 1, 1], [], []>} : vector<128x32xf32>, vector<32x32xf32>, vector<128x32xf32> -> vector<128x32xf32>
    %c0_12 = arith.constant 0 : index
    %c0_13 = arith.constant 0 : index
    %17 = vector.load %arg4[%c0_12, %c0_13] : memref<1x32xf32, #tpu.memory_space<vmem>>, vector<1x32xf32>
    %18 = vector.broadcast %17 : vector<1x32xf32> to vector<128x32xf32>
    %19 = arith.addf %16, %18 : vector<128x32xf32>
    %cst_14 = arith.constant 0.000000e+00 : f32
    %20 = vector.broadcast %cst_14 : f32 to vector<128x32xf32>
    %21 = arith.cmpf ogt, %19, %20 : vector<128x32xf32>
    %cst_15 = arith.constant 0.000000e+00 : f32
    %22 = vector.broadcast %cst_15 : f32 to vector<128x32xf32>
    %23 = arith.minimumf %19, %22 : vector<128x32xf32>
    %24 = math.exp %23 : vector<128x32xf32>
    %cst_16 = arith.constant 1.000000e+00 : f32
    %25 = vector.broadcast %cst_16 : f32 to vector<128x32xf32>
    %26 = arith.subf %24, %25 : vector<128x32xf32>
    %27 = arith.select %21, %19, %26 : vector<128x32xi1>, vector<128x32xf32>
    %cst_17 = arith.constant 0.000000e+00 : f32
    %28 = vector.broadcast %cst_17 : f32 to vector<8x80x32xf32>
    %c0_18 = arith.constant 0 : index
    %c0_19 = arith.constant 0 : index
    %c0_20 = arith.constant 0 : index
    %29 = vector.load %arg26[%c0_18, %c0_19, %c0_20] : memref<8x80x32xf32, #tpu.memory_space<vmem>>, vector<8x80x32xf32>
    tpu.vector_store %arg26[%c0_18, %c0_19, %c0_20], %28 {strides = array<i32>} : memref<8x80x32xf32, #tpu.memory_space<vmem>>, vector<8x80x32xf32>,
    %30 = vector.shape_cast %27 : vector<128x32xf32> to vector<8x16x32xf32>
    %c0_21 = arith.constant 0 : index
    %c32 = arith.constant 32 : index
    %c0_22 = arith.constant 0 : index
    %31 = vector.load %arg26[%c0_21, %c32, %c0_22] : memref<8x80x32xf32, #tpu.memory_space<vmem>>, vector<8x16x32xf32>
    tpu.vector_store %arg26[%c0_21, %c32, %c0_22], %30 {strides = array<i32>} : memref<8x80x32xf32, #tpu.memory_space<vmem>>, vector<8x16x32xf32>,
    %cst_23 = arith.constant 0.000000e+00 : f32
    %32 = vector.broadcast %cst_23 : f32 to vector<128x64xf32>
    %c0_24 = arith.constant 0 : index
    %c0_25 = arith.constant 0 : index
    %c0_26 = arith.constant 0 : index
    %33 = vector.load %arg6[%c0_24, %c0_25, %c0_26] : memref<5x1x64xf32, #tpu.memory_space<vmem>>, vector<1x1x64xf32>
    %34 = vector.shape_cast %33 : vector<1x1x64xf32> to vector<1x64xf32>
    %35 = vector.broadcast %34 : vector<1x64xf32> to vector<128x64xf32>
    %36 = arith.addf %32, %35 : vector<128x64xf32>
    %c0_27 = arith.constant 0 : index
    %c31 = arith.constant 31 : index
    %c0_28 = arith.constant 0 : index
    %37 = vector.load %arg26[%c0_27, %c31, %c0_28] : memref<8x80x32xf32, #tpu.memory_space<vmem>>, vector<8x16x32xf32>
    %38 = vector.shape_cast %37 : vector<8x16x32xf32> to vector<128x32xf32>
    %c0_29 = arith.constant 0 : index
    %c0_30 = arith.constant 0 : index
    %c0_31 = arith.constant 0 : index
    %c0_32 = arith.constant 0 : index
    %39 = vector.load %arg5[%c0_29, %c0_30, %c0_31, %c0_32] : memref<5x3x32x64xf32, #tpu.memory_space<vmem>>, vector<1x1x32x64xf32>
    %40 = vector.shape_cast %39 : vector<1x1x32x64xf32> to vector<32x64xf32>
    %cst_33 = arith.constant dense<0.000000e+00> : vector<128x64xf32>
    %41 = tpu.matmul %38, %40, %cst_33 {dimension_numbers = #tpu.dot_dimension_numbers<[1], [0], [0], [1], [0, 0, 1, 1], [], []>} : vector<128x32xf32>, vector<32x64xf32>, vector<128x64xf32> -> vector<128x64xf32>
    %42 = arith.addf %36, %41 : vector<128x64xf32>
    %c0_34 = arith.constant 0 : index
    %c1 = arith.constant 1 : index
    %c0_35 = arith.constant 0 : index
    %c0_36 = arith.constant 0 : index
    %43 = vector.load %arg5[%c0_34, %c1, %c0_35, %c0_36] : memref<5x3x32x64xf32, #tpu.memory_space<vmem>>, vector<1x1x32x64xf32>
    %44 = vector.shape_cast %43 : vector<1x1x32x64xf32> to vector<32x64xf32>
    %cst_37 = arith.constant dense<0.000000e+00> : vector<128x64xf32>
    %45 = tpu.matmul %27, %44, %cst_37 {dimension_numbers = #tpu.dot_dimension_numbers<[1], [0], [0], [1], [0, 0, 1, 1], [], []>} : vector<128x32xf32>, vector<32x64xf32>, vector<128x64xf32> -> vector<128x64xf32>
    %46 = arith.addf %42, %45 : vector<128x64xf32>
    %c0_38 = arith.constant 0 : index
    %c33 = arith.constant 33 : index
    %c0_39 = arith.constant 0 : index
    %47 = vector.load %arg26[%c0_38, %c33, %c0_39] : memref<8x80x32xf32, #tpu.memory_space<vmem>>, vector<8x16x32xf32>
    %48 = vector.shape_cast %47 : vector<8x16x32xf32> to vector<128x32xf32>
    %c0_40 = arith.constant 0 : index
    %c2 = arith.constant 2 : index
    %c0_41 = arith.constant 0 : index
    %c0_42 = arith.constant 0 : index
    %49 = vector.load %arg5[%c0_40, %c2, %c0_41, %c0_42] : memref<5x3x32x64xf32, #tpu.memory_space<vmem>>, vector<1x1x32x64xf32>
    %50 = vector.shape_cast %49 : vector<1x1x32x64xf32> to vector<32x64xf32>
    %cst_43 = arith.constant dense<0.000000e+00> : vector<128x64xf32>
    %51 = tpu.matmul %48, %50, %cst_43 {dimension_numbers = #tpu.dot_dimension_numbers<[1], [0], [0], [1], [0, 0, 1, 1], [], []>} : vector<128x32xf32>, vector<32x64xf32>, vector<128x64xf32> -> vector<128x64xf32>
    %52 = arith.addf %46, %51 : vector<128x64xf32>
    %53 = vector.extract_strided_slice %52 {offsets = [0, 0], sizes = [128, 32], strides = [1, 1]} : vector<128x64xf32> to vector<128x32xf32>
    %54 = vector.extract_strided_slice %52 {offsets = [0, 32], sizes = [128, 32], strides = [1, 1]} : vector<128x64xf32> to vector<128x32xf32>
    %cst_44 = arith.constant 0.000000e+00 : f32
    %55 = vector.broadcast %cst_44 : f32 to vector<128x32xf32>
    %56 = arith.subf %55, %54 : vector<128x32xf32>
    %57 = math.exp %56 : vector<128x32xf32>
    %cst_45 = arith.constant 1.000000e+00 : f32
    %58 = vector.broadcast %cst_45 : f32 to vector<128x32xf32>
    %59 = arith.addf %58, %57 : vector<128x32xf32>
    %60 = tpu.reciprocal %59 {approx = true} : vector<128x32xf32> -> vector<128x32xf32>
    %61 = arith.mulf %53, %60 : vector<128x32xf32>
    %62 = arith.addf %61, %27 : vector<128x32xf32>
    %cst_46 = arith.constant 0.707106769 : f32
    %63 = vector.broadcast %cst_46 : f32 to vector<128x32xf32>
    %64 = arith.mulf %62, %63 : vector<128x32xf32>
    %65 = vector.shape_cast %64 : vector<128x32xf32> to vector<8x16x32xf32>
    %c0_47 = arith.constant 0 : index
    %c32_48 = arith.constant 32 : index
    %c0_49 = arith.constant 0 : index
    %66 = vector.load %arg26[%c0_47, %c32_48, %c0_49] : memref<8x80x32xf32, #tpu.memory_space<vmem>>, vector<8x16x32xf32>
    tpu.vector_store %arg26[%c0_47, %c32_48, %c0_49], %65 {strides = array<i32>} : memref<8x80x32xf32, #tpu.memory_space<vmem>>, vector<8x16x32xf32>,
    %cst_50 = arith.constant 0.000000e+00 : f32
    %67 = vector.broadcast %cst_50 : f32 to vector<128x64xf32>
    %c1_51 = arith.constant 1 : index
    %c0_52 = arith.constant 0 : index
    %c0_53 = arith.constant 0 : index
    %68 = vector.load %arg6[%c1_51, %c0_52, %c0_53] : memref<5x1x64xf32, #tpu.memory_space<vmem>>, vector<1x1x64xf32>
    %69 = vector.shape_cast %68 : vector<1x1x64xf32> to vector<1x64xf32>
    %70 = vector.broadcast %69 : vector<1x64xf32> to vector<128x64xf32>
    %71 = arith.addf %67, %70 : vector<128x64xf32>
    %c0_54 = arith.constant 0 : index
    %c29 = arith.constant 29 : index
    %c0_55 = arith.constant 0 : index
    %72 = vector.load %arg26[%c0_54, %c29, %c0_55] : memref<8x80x32xf32, #tpu.memory_space<vmem>>, vector<8x16x32xf32>
    %73 = vector.shape_cast %72 : vector<8x16x32xf32> to vector<128x32xf32>
    %c1_56 = arith.constant 1 : index
    %c0_57 = arith.constant 0 : index
    %c0_58 = arith.constant 0 : index
    %c0_59 = arith.constant 0 : index
    %74 = vector.load %arg5[%c1_56, %c0_57, %c0_58, %c0_59] : memref<5x3x32x64xf32, #tpu.memory_space<vmem>>, vector<1x1x32x64xf32>
    %75 = vector.shape_cast %74 : vector<1x1x32x64xf32> to vector<32x64xf32>
    %cst_60 = arith.constant dense<0.000000e+00> : vector<128x64xf32>
    %76 = tpu.matmul %73, %75, %cst_60 {dimension_numbers = #tpu.dot_dimension_numbers<[1], [0], [0], [1], [0, 0, 1, 1], [], []>} : vector<128x32xf32>, vector<32x64xf32>, vector<128x64xf32> -> vector<128x64xf32>
    %77 = arith.addf %71, %76 : vector<128x64xf32>
    %c1_61 = arith.constant 1 : index
    %c1_62 = arith.constant 1 : index
    %c0_63 = arith.constant 0 : index
    %c0_64 = arith.constant 0 : index
    %78 = vector.load %arg5[%c1_61, %c1_62, %c0_63, %c0_64] : memref<5x3x32x64xf32, #tpu.memory_space<vmem>>, vector<1x1x32x64xf32>
    %79 = vector.shape_cast %78 : vector<1x1x32x64xf32> to vector<32x64xf32>
    %cst_65 = arith.constant dense<0.000000e+00> : vector<128x64xf32>
    %80 = tpu.matmul %64, %79, %cst_65 {dimension_numbers = #tpu.dot_dimension_numbers<[1], [0], [0], [1], [0, 0, 1, 1], [], []>} : vector<128x32xf32>, vector<32x64xf32>, vector<128x64xf32> -> vector<128x64xf32>
    %81 = arith.addf %77, %80 : vector<128x64xf32>
    %c0_66 = arith.constant 0 : index
    %c35 = arith.constant 35 : index
    %c0_67 = arith.constant 0 : index
    %82 = vector.load %arg26[%c0_66, %c35, %c0_67] : memref<8x80x32xf32, #tpu.memory_space<vmem>>, vector<8x16x32xf32>
    %83 = vector.shape_cast %82 : vector<8x16x32xf32> to vector<128x32xf32>
    %c1_68 = arith.constant 1 : index
    %c2_69 = arith.constant 2 : index
    %c0_70 = arith.constant 0 : index
    %c0_71 = arith.constant 0 : index
    %84 = vector.load %arg5[%c1_68, %c2_69, %c0_70, %c0_71] : memref<5x3x32x64xf32, #tpu.memory_space<vmem>>, vector<1x1x32x64xf32>
    %85 = vector.shape_cast %84 : vector<1x1x32x64xf32> to vector<32x64xf32>
    %cst_72 = arith.constant dense<0.000000e+00> : vector<128x64xf32>
    %86 = tpu.matmul %83, %85, %cst_72 {dimension_numbers = #tpu.dot_dimension_numbers<[1], [0], [0], [1], [0, 0, 1, 1], [], []>} : vector<128x32xf32>, vector<32x64xf32>, vector<128x64xf32> -> vector<128x64xf32>
    %87 = arith.addf %81, %86 : vector<128x64xf32>
    %88 = vector.extract_strided_slice %87 {offsets = [0, 0], sizes = [128, 32], strides = [1, 1]} : vector<128x64xf32> to vector<128x32xf32>
    %89 = vector.extract_strided_slice %87 {offsets = [0, 32], sizes = [128, 32], strides = [1, 1]} : vector<128x64xf32> to vector<128x32xf32>
    %cst_73 = arith.constant 0.000000e+00 : f32
    %90 = vector.broadcast %cst_73 : f32 to vector<128x32xf32>
    %91 = arith.subf %90, %89 : vector<128x32xf32>
    %92 = math.exp %91 : vector<128x32xf32>
    %cst_74 = arith.constant 1.000000e+00 : f32
    %93 = vector.broadcast %cst_74 : f32 to vector<128x32xf32>
    %94 = arith.addf %93, %92 : vector<128x32xf32>
    %95 = tpu.reciprocal %94 {approx = true} : vector<128x32xf32> -> vector<128x32xf32>
    %96 = arith.mulf %88, %95 : vector<128x32xf32>
    %97 = arith.addf %96, %64 : vector<128x32xf32>
    %cst_75 = arith.constant 0.707106769 : f32
    %98 = vector.broadcast %cst_75 : f32 to vector<128x32xf32>
    %99 = arith.mulf %97, %98 : vector<128x32xf32>
    %100 = vector.shape_cast %99 : vector<128x32xf32> to vector<8x16x32xf32>
    %c0_76 = arith.constant 0 : index
    %c32_77 = arith.constant 32 : index
    %c0_78 = arith.constant 0 : index
    %101 = vector.load %arg26[%c0_76, %c32_77, %c0_78] : memref<8x80x32xf32, #tpu.memory_space<vmem>>, vector<8x16x32xf32>
    tpu.vector_store %arg26[%c0_76, %c32_77, %c0_78], %100 {strides = array<i32>} : memref<8x80x32xf32, #tpu.memory_space<vmem>>, vector<8x16x32xf32>,
    %cst_79 = arith.constant 0.000000e+00 : f32
    %102 = vector.broadcast %cst_79 : f32 to vector<128x64xf32>
    %c2_80 = arith.constant 2 : index
    %c0_81 = arith.constant 0 : index
    %c0_82 = arith.constant 0 : index
    %103 = vector.load %arg6[%c2_80, %c0_81, %c0_82] : memref<5x1x64xf32, #tpu.memory_space<vmem>>, vector<1x1x64xf32>
    %104 = vector.shape_cast %103 : vector<1x1x64xf32> to vector<1x64xf32>
    %105 = vector.broadcast %104 : vector<1x64xf32> to vector<128x64xf32>
    %106 = arith.addf %102, %105 : vector<128x64xf32>
    %c0_83 = arith.constant 0 : index
    %c23 = arith.constant 23 : index
    %c0_84 = arith.constant 0 : index
    %107 = vector.load %arg26[%c0_83, %c23, %c0_84] : memref<8x80x32xf32, #tpu.memory_space<vmem>>, vector<8x16x32xf32>
    %108 = vector.shape_cast %107 : vector<8x16x32xf32> to vector<128x32xf32>
    %c2_85 = arith.constant 2 : index
    %c0_86 = arith.constant 0 : index
    %c0_87 = arith.constant 0 : index
    %c0_88 = arith.constant 0 : index
    %109 = vector.load %arg5[%c2_85, %c0_86, %c0_87, %c0_88] : memref<5x3x32x64xf32, #tpu.memory_space<vmem>>, vector<1x1x32x64xf32>
    %110 = vector.shape_cast %109 : vector<1x1x32x64xf32> to vector<32x64xf32>
    %cst_89 = arith.constant dense<0.000000e+00> : vector<128x64xf32>
    %111 = tpu.matmul %108, %110, %cst_89 {dimension_numbers = #tpu.dot_dimension_numbers<[1], [0], [0], [1], [0, 0, 1, 1], [], []>} : vector<128x32xf32>, vector<32x64xf32>, vector<128x64xf32> -> vector<128x64xf32>
    %112 = arith.addf %106, %111 : vector<128x64xf32>
    %c2_90 = arith.constant 2 : index
    %c1_91 = arith.constant 1 : index
    %c0_92 = arith.constant 0 : index
    %c0_93 = arith.constant 0 : index
    %113 = vector.load %arg5[%c2_90, %c1_91, %c0_92, %c0_93] : memref<5x3x32x64xf32, #tpu.memory_space<vmem>>, vector<1x1x32x64xf32>
    %114 = vector.shape_cast %113 : vector<1x1x32x64xf32> to vector<32x64xf32>
    %cst_94 = arith.constant dense<0.000000e+00> : vector<128x64xf32>
    %115 = tpu.matmul %99, %114, %cst_94 {dimension_numbers = #tpu.dot_dimension_numbers<[1], [0], [0], [1], [0, 0, 1, 1], [], []>} : vector<128x32xf32>, vector<32x64xf32>, vector<128x64xf32> -> vector<128x64xf32>
    %116 = arith.addf %112, %115 : vector<128x64xf32>
    %c0_95 = arith.constant 0 : index
    %c41 = arith.constant 41 : index
    %c0_96 = arith.constant 0 : index
    %117 = vector.load %arg26[%c0_95, %c41, %c0_96] : memref<8x80x32xf32, #tpu.memory_space<vmem>>, vector<8x16x32xf32>
    %118 = vector.shape_cast %117 : vector<8x16x32xf32> to vector<128x32xf32>
    %c2_97 = arith.constant 2 : index
    %c2_98 = arith.constant 2 : index
    %c0_99 = arith.constant 0 : index
    %c0_100 = arith.constant 0 : index
    %119 = vector.load %arg5[%c2_97, %c2_98, %c0_99, %c0_100] : memref<5x3x32x64xf32, #tpu.memory_space<vmem>>, vector<1x1x32x64xf32>
    %120 = vector.shape_cast %119 : vector<1x1x32x64xf32> to vector<32x64xf32>
    %cst_101 = arith.constant dense<0.000000e+00> : vector<128x64xf32>
    %121 = tpu.matmul %118, %120, %cst_101 {dimension_numbers = #tpu.dot_dimension_numbers<[1], [0], [0], [1], [0, 0, 1, 1], [], []>} : vector<128x32xf32>, vector<32x64xf32>, vector<128x64xf32> -> vector<128x64xf32>
    %122 = arith.addf %116, %121 : vector<128x64xf32>
    %123 = vector.extract_strided_slice %122 {offsets = [0, 0], sizes = [128, 32], strides = [1, 1]} : vector<128x64xf32> to vector<128x32xf32>
    %124 = vector.extract_strided_slice %122 {offsets = [0, 32], sizes = [128, 32], strides = [1, 1]} : vector<128x64xf32> to vector<128x32xf32>
    %cst_102 = arith.constant 0.000000e+00 : f32
    %125 = vector.broadcast %cst_102 : f32 to vector<128x32xf32>
    %126 = arith.subf %125, %124 : vector<128x32xf32>
    %127 = math.exp %126 : vector<128x32xf32>
    %cst_103 = arith.constant 1.000000e+00 : f32
    %128 = vector.broadcast %cst_103 : f32 to vector<128x32xf32>
    %129 = arith.addf %128, %127 : vector<128x32xf32>
    %130 = tpu.reciprocal %129 {approx = true} : vector<128x32xf32> -> vector<128x32xf32>
    %131 = arith.mulf %123, %130 : vector<128x32xf32>
    %132 = arith.addf %131, %99 : vector<128x32xf32>
    %cst_104 = arith.constant 0.707106769 : f32
    %133 = vector.broadcast %cst_104 : f32 to vector<128x32xf32>
    %134 = arith.mulf %132, %133 : vector<128x32xf32>
    %cst_105 = arith.constant 0.000000e+00 : f32
    %135 = vector.broadcast %cst_105 : f32 to vector<128x64xf32>
    %c3 = arith.constant 3 : index
    %c0_106 = arith.constant 0 : index
    %c0_107 = arith.constant 0 : index
    %136 = vector.load %arg6[%c3, %c0_106, %c0_107] : memref<5x1x64xf32, #tpu.memory_space<vmem>>, vector<1x1x64xf32>
    %137 = vector.shape_cast %136 : vector<1x1x64xf32> to vector<1x64xf32>
    %138 = vector.broadcast %137 : vector<1x64xf32> to vector<128x64xf32>
    %139 = arith.addf %135, %138 : vector<128x64xf32>
    %c3_108 = arith.constant 3 : index
    %c1_109 = arith.constant 1 : index
    %c0_110 = arith.constant 0 : index
    %c0_111 = arith.constant 0 : index
    %140 = vector.load %arg5[%c3_108, %c1_109, %c0_110, %c0_111] : memref<5x3x32x64xf32, #tpu.memory_space<vmem>>, vector<1x1x32x64xf32>
    %141 = vector.shape_cast %140 : vector<1x1x32x64xf32> to vector<32x64xf32>
    %cst_112 = arith.constant dense<0.000000e+00> : vector<128x64xf32>
    %142 = tpu.matmul %134, %141, %cst_112 {dimension_numbers = #tpu.dot_dimension_numbers<[1], [0], [0], [1], [0, 0, 1, 1], [], []>} : vector<128x32xf32>, vector<32x64xf32>, vector<128x64xf32> -> vector<128x64xf32>
    %143 = arith.addf %139, %142 : vector<128x64xf32>
    %144 = vector.extract_strided_slice %143 {offsets = [0, 0], sizes = [128, 32], strides = [1, 1]} : vector<128x64xf32> to vector<128x32xf32>
    %145 = vector.extract_strided_slice %143 {offsets = [0, 32], sizes = [128, 32], strides = [1, 1]} : vector<128x64xf32> to vector<128x32xf32>
    %cst_113 = arith.constant 0.000000e+00 : f32
    %146 = vector.broadcast %cst_113 : f32 to vector<128x32xf32>
    %147 = arith.subf %146, %145 : vector<128x32xf32>
    %148 = math.exp %147 : vector<128x32xf32>
    %cst_114 = arith.constant 1.000000e+00 : f32
    %149 = vector.broadcast %cst_114 : f32 to vector<128x32xf32>
    %150 = arith.addf %149, %148 : vector<128x32xf32>
    %151 = tpu.reciprocal %150 {approx = true} : vector<128x32xf32> -> vector<128x32xf32>
    %152 = arith.mulf %144, %151 : vector<128x32xf32>
    %153 = arith.addf %152, %134 : vector<128x32xf32>
    %cst_115 = arith.constant 0.707106769 : f32
    %154 = vector.broadcast %cst_115 : f32 to vector<128x32xf32>
    %155 = arith.mulf %153, %154 : vector<128x32xf32>
    %156 = vector.shape_cast %155 : vector<128x32xf32> to vector<8x16x32xf32>
    %c0_116 = arith.constant 0 : index
    %c32_117 = arith.constant 32 : index
    %c0_118 = arith.constant 0 : index
    %157 = vector.load %arg26[%c0_116, %c32_117, %c0_118] : memref<8x80x32xf32, #tpu.memory_space<vmem>>, vector<8x16x32xf32>
    tpu.vector_store %arg26[%c0_116, %c32_117, %c0_118], %156 {strides = array<i32>} : memref<8x80x32xf32, #tpu.memory_space<vmem>>, vector<8x16x32xf32>,
    %cst_119 = arith.constant 0.000000e+00 : f32
    %158 = vector.broadcast %cst_119 : f32 to vector<128x64xf32>
    %c4 = arith.constant 4 : index
    %c0_120 = arith.constant 0 : index
    %c0_121 = arith.constant 0 : index
    %159 = vector.load %arg6[%c4, %c0_120, %c0_121] : memref<5x1x64xf32, #tpu.memory_space<vmem>>, vector<1x1x64xf32>
    %160 = vector.shape_cast %159 : vector<1x1x64xf32> to vector<1x64xf32>
    %161 = vector.broadcast %160 : vector<1x64xf32> to vector<128x64xf32>
    %162 = arith.addf %158, %161 : vector<128x64xf32>
    %c0_122 = arith.constant 0 : index
    %c31_123 = arith.constant 31 : index
    %c0_124 = arith.constant 0 : index
    %163 = vector.load %arg26[%c0_122, %c31_123, %c0_124] : memref<8x80x32xf32, #tpu.memory_space<vmem>>, vector<8x16x32xf32>
    %164 = vector.shape_cast %163 : vector<8x16x32xf32> to vector<128x32xf32>
    %c4_125 = arith.constant 4 : index
    %c0_126 = arith.constant 0 : index
    %c0_127 = arith.constant 0 : index
    %c0_128 = arith.constant 0 : index
    %165 = vector.load %arg5[%c4_125, %c0_126, %c0_127, %c0_128] : memref<5x3x32x64xf32, #tpu.memory_space<vmem>>, vector<1x1x32x64xf32>
    %166 = vector.shape_cast %165 : vector<1x1x32x64xf32> to vector<32x64xf32>
    %cst_129 = arith.constant dense<0.000000e+00> : vector<128x64xf32>
    %167 = tpu.matmul %164, %166, %cst_129 {dimension_numbers = #tpu.dot_dimension_numbers<[1], [0], [0], [1], [0, 0, 1, 1], [], []>} : vector<128x32xf32>, vector<32x64xf32>, vector<128x64xf32> -> vector<128x64xf32>
    %168 = arith.addf %162, %167 : vector<128x64xf32>
    %c4_130 = arith.constant 4 : index
    %c1_131 = arith.constant 1 : index
    %c0_132 = arith.constant 0 : index
    %c0_133 = arith.constant 0 : index
    %169 = vector.load %arg5[%c4_130, %c1_131, %c0_132, %c0_133] : memref<5x3x32x64xf32, #tpu.memory_space<vmem>>, vector<1x1x32x64xf32>
    %170 = vector.shape_cast %169 : vector<1x1x32x64xf32> to vector<32x64xf32>
    %cst_134 = arith.constant dense<0.000000e+00> : vector<128x64xf32>
    %171 = tpu.matmul %155, %170, %cst_134 {dimension_numbers = #tpu.dot_dimension_numbers<[1], [0], [0], [1], [0, 0, 1, 1], [], []>} : vector<128x32xf32>, vector<32x64xf32>, vector<128x64xf32> -> vector<128x64xf32>
    %172 = arith.addf %168, %171 : vector<128x64xf32>
    %c0_135 = arith.constant 0 : index
    %c33_136 = arith.constant 33 : index
    %c0_137 = arith.constant 0 : index
    %173 = vector.load %arg26[%c0_135, %c33_136, %c0_137] : memref<8x80x32xf32, #tpu.memory_space<vmem>>, vector<8x16x32xf32>
    %174 = vector.shape_cast %173 : vector<8x16x32xf32> to vector<128x32xf32>
    %c4_138 = arith.constant 4 : index
    %c2_139 = arith.constant 2 : index
    %c0_140 = arith.constant 0 : index
    %c0_141 = arith.constant 0 : index
    %175 = vector.load %arg5[%c4_138, %c2_139, %c0_140, %c0_141] : memref<5x3x32x64xf32, #tpu.memory_space<vmem>>, vector<1x1x32x64xf32>
    %176 = vector.shape_cast %175 : vector<1x1x32x64xf32> to vector<32x64xf32>
    %cst_142 = arith.constant dense<0.000000e+00> : vector<128x64xf32>
    %177 = tpu.matmul %174, %176, %cst_142 {dimension_numbers = #tpu.dot_dimension_numbers<[1], [0], [0], [1], [0, 0, 1, 1], [], []>} : vector<128x32xf32>, vector<32x64xf32>, vector<128x64xf32> -> vector<128x64xf32>
    %178 = arith.addf %172, %177 : vector<128x64xf32>
    %179 = vector.extract_strided_slice %178 {offsets = [0, 0], sizes = [128, 32], strides = [1, 1]} : vector<128x64xf32> to vector<128x32xf32>
    %180 = vector.extract_strided_slice %178 {offsets = [0, 32], sizes = [128, 32], strides = [1, 1]} : vector<128x64xf32> to vector<128x32xf32>
    %cst_143 = arith.constant 0.000000e+00 : f32
    %181 = vector.broadcast %cst_143 : f32 to vector<128x32xf32>
    %182 = arith.subf %181, %180 : vector<128x32xf32>
    %183 = math.exp %182 : vector<128x32xf32>
    %cst_144 = arith.constant 1.000000e+00 : f32
    %184 = vector.broadcast %cst_144 : f32 to vector<128x32xf32>
    %185 = arith.addf %184, %183 : vector<128x32xf32>
    %186 = tpu.reciprocal %185 {approx = true} : vector<128x32xf32> -> vector<128x32xf32>
    %187 = arith.mulf %179, %186 : vector<128x32xf32>
    %188 = arith.addf %187, %155 : vector<128x32xf32>
    %cst_145 = arith.constant 0.707106769 : f32
    %189 = vector.broadcast %cst_145 : f32 to vector<128x32xf32>
    %190 = arith.mulf %188, %189 : vector<128x32xf32>
    %191 = vector.shape_cast %190 : vector<128x32xf32> to vector<8x16x32xf32>
    %cst_146 = arith.constant dense<0.000000e+00> : vector<8x32xf32>
    %192 = vector.multi_reduction <add>, %191, %cst_146 [1] : vector<8x16x32xf32> to vector<8x32xf32>
    %cst_147 = arith.constant 1.600000e+01 : f32
    %193 = vector.broadcast %cst_147 : f32 to vector<8x32xf32>
    %194 = arith.divf %192, %193 : vector<8x32xf32>
    %c0_148 = arith.constant 0 : index
    %c0_149 = arith.constant 0 : index
    %195 = vector.load %arg7[%c0_148, %c0_149] : memref<32x32xf32, #tpu.memory_space<vmem>>, vector<32x32xf32>
    %cst_150 = arith.constant dense<0.000000e+00> : vector<8x32xf32>
    %196 = tpu.matmul %194, %195, %cst_150 {dimension_numbers = #tpu.dot_dimension_numbers<[1], [0], [0], [1], [0, 0, 1, 1], [], []>} : vector<8x32xf32>, vector<32x32xf32>, vector<8x32xf32> -> vector<8x32xf32>
    %c0_151 = arith.constant 0 : index
    %c0_152 = arith.constant 0 : index
    %197 = vector.load %arg8[%c0_151, %c0_152] : memref<1x32xf32, #tpu.memory_space<vmem>>, vector<1x32xf32>
    %198 = vector.broadcast %197 : vector<1x32xf32> to vector<8x32xf32>
    %199 = arith.addf %196, %198 : vector<8x32xf32>
    %cst_153 = arith.constant 0.000000e+00 : f32
    %200 = vector.broadcast %cst_153 : f32 to vector<8x32xf32>
    %201 = arith.cmpf ogt, %199, %200 : vector<8x32xf32>
    %cst_154 = arith.constant 0.000000e+00 : f32
    %202 = vector.broadcast %cst_154 : f32 to vector<8x32xf32>
    %203 = arith.minimumf %199, %202 : vector<8x32xf32>
    %204 = math.exp %203 : vector<8x32xf32>
    %cst_155 = arith.constant 1.000000e+00 : f32
    %205 = vector.broadcast %cst_155 : f32 to vector<8x32xf32>
    %206 = arith.subf %204, %205 : vector<8x32xf32>
    %207 = arith.select %201, %199, %206 : vector<8x32xi1>, vector<8x32xf32>
    %c0_156 = arith.constant 0 : index
    %c0_157 = arith.constant 0 : index
    %208 = vector.load %arg9[%c0_156, %c0_157] : memref<32x32xf32, #tpu.memory_space<vmem>>, vector<32x32xf32>
    %cst_158 = arith.constant dense<0.000000e+00> : vector<8x32xf32>
    %209 = tpu.matmul %194, %208, %cst_158 {dimension_numbers = #tpu.dot_dimension_numbers<[1], [0], [0], [1], [0, 0, 1, 1], [], []>} : vector<8x32xf32>, vector<32x32xf32>, vector<8x32xf32> -> vector<8x32xf32>
    %c0_159 = arith.constant 0 : index
    %c0_160 = arith.constant 0 : index
    %210 = vector.load %arg10[%c0_159, %c0_160] : memref<1x32xf32, #tpu.memory_space<vmem>>, vector<1x32xf32>
    %211 = vector.broadcast %210 : vector<1x32xf32> to vector<8x32xf32>
    %212 = arith.addf %209, %211 : vector<8x32xf32>
    %cst_161 = arith.constant 0.000000e+00 : f32
    %213 = vector.broadcast %cst_161 : f32 to vector<8x32xf32>
    %214 = arith.cmpf ogt, %212, %213 : vector<8x32xf32>
    %cst_162 = arith.constant 0.000000e+00 : f32
    %215 = vector.broadcast %cst_162 : f32 to vector<8x32xf32>
    %216 = arith.minimumf %212, %215 : vector<8x32xf32>
    %217 = math.exp %216 : vector<8x32xf32>
    %cst_163 = arith.constant 1.000000e+00 : f32
    %218 = vector.broadcast %cst_163 : f32 to vector<8x32xf32>
    %219 = arith.subf %217, %218 : vector<8x32xf32>
    %220 = arith.select %214, %212, %219 : vector<8x32xi1>, vector<8x32xf32>
    %c0_164 = arith.constant 0 : index
    %c0_165 = arith.constant 0 : index
    %221 = vector.load %arg11[%c0_164, %c0_165] : memref<32x32xf32, #tpu.memory_space<vmem>>, vector<32x32xf32>
    %cst_166 = arith.constant dense<0.000000e+00> : vector<8x32xf32>
    %222 = tpu.matmul %194, %221, %cst_166 {dimension_numbers = #tpu.dot_dimension_numbers<[1], [0], [0], [1], [0, 0, 1, 1], [], []>} : vector<8x32xf32>, vector<32x32xf32>, vector<8x32xf32> -> vector<8x32xf32>
    %c0_167 = arith.constant 0 : index
    %c0_168 = arith.constant 0 : index
    %223 = vector.load %arg12[%c0_167, %c0_168] : memref<1x32xf32, #tpu.memory_space<vmem>>, vector<1x32xf32>
    %224 = vector.broadcast %223 : vector<1x32xf32> to vector<8x32xf32>
    %225 = arith.addf %222, %224 : vector<8x32xf32>
    %cst_169 = arith.constant 0.000000e+00 : f32
    %226 = vector.broadcast %cst_169 : f32 to vector<8x32xf32>
    %227 = arith.cmpf ogt, %225, %226 : vector<8x32xf32>
    %cst_170 = arith.constant 0.000000e+00 : f32
    %228 = vector.broadcast %cst_170 : f32 to vector<8x32xf32>
    %229 = arith.minimumf %225, %228 : vector<8x32xf32>
    %230 = math.exp %229 : vector<8x32xf32>
    %cst_171 = arith.constant 1.000000e+00 : f32
    %231 = vector.broadcast %cst_171 : f32 to vector<8x32xf32>
    %232 = arith.subf %230, %231 : vector<8x32xf32>
    %233 = arith.select %227, %225, %232 : vector<8x32xi1>, vector<8x32xf32>
    %c0_172 = arith.constant 0 : index
    %c0_173 = arith.constant 0 : index
    %234 = vector.load %arg13[%c0_172, %c0_173] : memref<32x32xf32, #tpu.memory_space<vmem>>, vector<32x32xf32>
    %cst_174 = arith.constant dense<0.000000e+00> : vector<8x32xf32>
    %235 = tpu.matmul %207, %234, %cst_174 {dimension_numbers = #tpu.dot_dimension_numbers<[1], [0], [0], [1], [0, 0, 1, 1], [], []>} : vector<8x32xf32>, vector<32x32xf32>, vector<8x32xf32> -> vector<8x32xf32>
    %c0_175 = arith.constant 0 : index
    %c0_176 = arith.constant 0 : index
    %236 = vector.load %arg14[%c0_175, %c0_176] : memref<1x32xf32, #tpu.memory_space<vmem>>, vector<1x32xf32>
    %237 = vector.broadcast %236 : vector<1x32xf32> to vector<8x32xf32>
    %238 = arith.addf %235, %237 : vector<8x32xf32>
    %239 = vector.shape_cast %238 : vector<8x32xf32> to vector<2x4x32xf32>
    %c0_177 = arith.constant 0 : index
    %c0_178 = arith.constant 0 : index
    %240 = vector.load %arg15[%c0_177, %c0_178] : memref<32x32xf32, #tpu.memory_space<vmem>>, vector<32x32xf32>
    %cst_179 = arith.constant dense<0.000000e+00> : vector<8x32xf32>
    %241 = tpu.matmul %220, %240, %cst_179 {dimension_numbers = #tpu.dot_dimension_numbers<[1], [0], [0], [1], [0, 0, 1, 1], [], []>} : vector<8x32xf32>, vector<32x32xf32>, vector<8x32xf32> -> vector<8x32xf32>
    %c0_180 = arith.constant 0 : index
    %c0_181 = arith.constant 0 : index
    %242 = vector.load %arg16[%c0_180, %c0_181] : memref<1x32xf32, #tpu.memory_space<vmem>>, vector<1x32xf32>
    %243 = vector.broadcast %242 : vector<1x32xf32> to vector<8x32xf32>
    %244 = arith.addf %241, %243 : vector<8x32xf32>
    %245 = vector.shape_cast %244 : vector<8x32xf32> to vector<2x4x32xf32>
    %c0_182 = arith.constant 0 : index
    %c0_183 = arith.constant 0 : index
    %246 = vector.load %arg17[%c0_182, %c0_183] : memref<32x32xf32, #tpu.memory_space<vmem>>, vector<32x32xf32>
    %cst_184 = arith.constant dense<0.000000e+00> : vector<8x32xf32>
    %247 = tpu.matmul %233, %246, %cst_184 {dimension_numbers = #tpu.dot_dimension_numbers<[1], [0], [0], [1], [0, 0, 1, 1], [], []>} : vector<8x32xf32>, vector<32x32xf32>, vector<8x32xf32> -> vector<8x32xf32>
    %c0_185 = arith.constant 0 : index
    %c0_186 = arith.constant 0 : index
    %248 = vector.load %arg18[%c0_185, %c0_186] : memref<1x32xf32, #tpu.memory_space<vmem>>, vector<1x32xf32>
    %249 = vector.broadcast %248 : vector<1x32xf32> to vector<8x32xf32>
    %250 = arith.addf %247, %249 : vector<8x32xf32>
    %251 = vector.shape_cast %250 : vector<8x32xf32> to vector<2x4x32xf32>
    %cst_187 = arith.constant 0.000000e+00 : f32
    %252 = vector.broadcast %cst_187 : f32 to vector<8x32xf32>
    %c0_188 = arith.constant 0 : index
    %c0_189 = arith.constant 0 : index
    %253 = vector.load %arg20[%c0_188, %c0_189] : memref<1x32xf32, #tpu.memory_space<vmem>>, vector<1x32xf32>
    %254 = vector.broadcast %253 : vector<1x32xf32> to vector<8x32xf32>
    %255 = arith.addf %252, %254 : vector<8x32xf32>
    %256 = vector.extract_strided_slice %239 {offsets = [0, 0, 0], sizes = [2, 4, 8], strides = [1, 1, 1]} : vector<2x4x32xf32> to vector<2x4x8xf32>
    %257 = vector.extract_strided_slice %245 {offsets = [0, 0, 0], sizes = [2, 4, 8], strides = [1, 1, 1]} : vector<2x4x32xf32> to vector<2x4x8xf32>
    %258 = vector.extract_strided_slice %251 {offsets = [0, 0, 0], sizes = [2, 4, 8], strides = [1, 1, 1]} : vector<2x4x32xf32> to vector<2x4x8xf32>
    "tpu.trace_start"() <{level = 10 : i32, message = "bnd,bmd->bnm"}> : () -> ()
    %cst_190 = arith.constant dense<0.000000e+00> : vector<2x4x4xf32>
    %259 = tpu.matmul %257, %256, %cst_190 {dimension_numbers = #tpu.dot_dimension_numbers<[2], [2], [1], [1], [0, 0, 0, 1, 1, 1], [0], [0]>} : vector<2x4x8xf32>, vector<2x4x8xf32>, vector<2x4x4xf32> -> vector<2x4x4xf32>
    "tpu.trace_stop"() : () -> ()
    %cst_191 = arith.constant dense<0xFF800000> : vector<4x4xf32>
    %260 = vector.multi_reduction <maximumf>, %259, %cst_191 [0] : vector<2x4x4xf32> to vector<4x4xf32>
    %261 = vector.shape_cast %260 : vector<4x4xf32> to vector<1x4x4xf32>
    %262 = vector.broadcast %261 : vector<1x4x4xf32> to vector<2x4x4xf32>
    %263 = arith.subf %259, %262 : vector<2x4x4xf32>
    %264 = math.exp %263 : vector<2x4x4xf32>
    %cst_192 = arith.constant dense<0.000000e+00> : vector<4x4xf32>
    %265 = vector.multi_reduction <add>, %264, %cst_192 [0] : vector<2x4x4xf32> to vector<4x4xf32>
    %266 = vector.shape_cast %265 : vector<4x4xf32> to vector<1x4x4xf32>
    %267 = tpu.reciprocal %266 {approx = true} : vector<1x4x4xf32> -> vector<1x4x4xf32>
    %268 = vector.broadcast %267 : vector<1x4x4xf32> to vector<2x4x4xf32>
    %269 = arith.mulf %264, %268 : vector<2x4x4xf32>
    "tpu.trace_start"() <{level = 10 : i32, message = "bnm,bmd->bnd"}> : () -> ()
    %cst_193 = arith.constant dense<0.000000e+00> : vector<2x4x8xf32>
    %270 = tpu.matmul %269, %258, %cst_193 {dimension_numbers = #tpu.dot_dimension_numbers<[2], [1], [1], [2], [0, 0, 0, 1, 1, 2], [0], [0]>} : vector<2x4x4xf32>, vector<2x4x8xf32>, vector<2x4x8xf32> -> vector<2x4x8xf32>
    "tpu.trace_stop"() : () -> ()
    %271 = vector.shape_cast %270 : vector<2x4x8xf32> to vector<8x8xf32>
    %c0_194 = arith.constant 0 : index
    %c0_195 = arith.constant 0 : index
    %c0_196 = arith.constant 0 : index
    %272 = vector.load %arg19[%c0_194, %c0_195, %c0_196] : memref<4x8x32xf32, #tpu.memory_space<vmem>>, vector<1x8x32xf32>
    %273 = vector.shape_cast %272 : vector<1x8x32xf32> to vector<8x32xf32>
    %cst_197 = arith.constant dense<0.000000e+00> : vector<8x32xf32>
    %274 = tpu.matmul %271, %273, %cst_197 {dimension_numbers = #tpu.dot_dimension_numbers<[1], [0], [0], [1], [0, 0, 1, 1], [], []>} : vector<8x8xf32>, vector<8x32xf32>, vector<8x32xf32> -> vector<8x32xf32>
    %275 = arith.addf %255, %274 : vector<8x32xf32>
    %276 = vector.extract_strided_slice %239 {offsets = [0, 0, 8], sizes = [2, 4, 8], strides = [1, 1, 1]} : vector<2x4x32xf32> to vector<2x4x8xf32>
    %277 = vector.extract_strided_slice %245 {offsets = [0, 0, 8], sizes = [2, 4, 8], strides = [1, 1, 1]} : vector<2x4x32xf32> to vector<2x4x8xf32>
    %278 = vector.extract_strided_slice %251 {offsets = [0, 0, 8], sizes = [2, 4, 8], strides = [1, 1, 1]} : vector<2x4x32xf32> to vector<2x4x8xf32>
    "tpu.trace_start"() <{level = 10 : i32, message = "bnd,bmd->bnm"}> : () -> ()
    %cst_198 = arith.constant dense<0.000000e+00> : vector<2x4x4xf32>
    %279 = tpu.matmul %277, %276, %cst_198 {dimension_numbers = #tpu.dot_dimension_numbers<[2], [2], [1], [1], [0, 0, 0, 1, 1, 1], [0], [0]>} : vector<2x4x8xf32>, vector<2x4x8xf32>, vector<2x4x4xf32> -> vector<2x4x4xf32>
    "tpu.trace_stop"() : () -> ()
    %cst_199 = arith.constant dense<0xFF800000> : vector<4x4xf32>
    %280 = vector.multi_reduction <maximumf>, %279, %cst_199 [0] : vector<2x4x4xf32> to vector<4x4xf32>
    %281 = vector.shape_cast %280 : vector<4x4xf32> to vector<1x4x4xf32>
    %282 = vector.broadcast %281 : vector<1x4x4xf32> to vector<2x4x4xf32>
    %283 = arith.subf %279, %282 : vector<2x4x4xf32>
    %284 = math.exp %283 : vector<2x4x4xf32>
    %cst_200 = arith.constant dense<0.000000e+00> : vector<4x4xf32>
    %285 = vector.multi_reduction <add>, %284, %cst_200 [0] : vector<2x4x4xf32> to vector<4x4xf32>
    %286 = vector.shape_cast %285 : vector<4x4xf32> to vector<1x4x4xf32>
    %287 = tpu.reciprocal %286 {approx = true} : vector<1x4x4xf32> -> vector<1x4x4xf32>
    %288 = vector.broadcast %287 : vector<1x4x4xf32> to vector<2x4x4xf32>
    %289 = arith.mulf %284, %288 : vector<2x4x4xf32>
    "tpu.trace_start"() <{level = 10 : i32, message = "bnm,bmd->bnd"}> : () -> ()
    %cst_201 = arith.constant dense<0.000000e+00> : vector<2x4x8xf32>
    %290 = tpu.matmul %289, %278, %cst_201 {dimension_numbers = #tpu.dot_dimension_numbers<[2], [1], [1], [2], [0, 0, 0, 1, 1, 2], [0], [0]>} : vector<2x4x4xf32>, vector<2x4x8xf32>, vector<2x4x8xf32> -> vector<2x4x8xf32>
    "tpu.trace_stop"() : () -> ()
    %291 = vector.shape_cast %290 : vector<2x4x8xf32> to vector<8x8xf32>
    %c1_202 = arith.constant 1 : index
    %c0_203 = arith.constant 0 : index
    %c0_204 = arith.constant 0 : index
    %292 = vector.load %arg19[%c1_202, %c0_203, %c0_204] : memref<4x8x32xf32, #tpu.memory_space<vmem>>, vector<1x8x32xf32>
    %293 = vector.shape_cast %292 : vector<1x8x32xf32> to vector<8x32xf32>
    %cst_205 = arith.constant dense<0.000000e+00> : vector<8x32xf32>
    %294 = tpu.matmul %291, %293, %cst_205 {dimension_numbers = #tpu.dot_dimension_numbers<[1], [0], [0], [1], [0, 0, 1, 1], [], []>} : vector<8x8xf32>, vector<8x32xf32>, vector<8x32xf32> -> vector<8x32xf32>
    %295 = arith.addf %275, %294 : vector<8x32xf32>
    %296 = vector.extract_strided_slice %239 {offsets = [0, 0, 16], sizes = [2, 4, 8], strides = [1, 1, 1]} : vector<2x4x32xf32> to vector<2x4x8xf32>
    %297 = vector.extract_strided_slice %245 {offsets = [0, 0, 16], sizes = [2, 4, 8], strides = [1, 1, 1]} : vector<2x4x32xf32> to vector<2x4x8xf32>
    %298 = vector.extract_strided_slice %251 {offsets = [0, 0, 16], sizes = [2, 4, 8], strides = [1, 1, 1]} : vector<2x4x32xf32> to vector<2x4x8xf32>
    "tpu.trace_start"() <{level = 10 : i32, message = "bnd,bmd->bnm"}> : () -> ()
    %cst_206 = arith.constant dense<0.000000e+00> : vector<2x4x4xf32>
    %299 = tpu.matmul %297, %296, %cst_206 {dimension_numbers = #tpu.dot_dimension_numbers<[2], [2], [1], [1], [0, 0, 0, 1, 1, 1], [0], [0]>} : vector<2x4x8xf32>, vector<2x4x8xf32>, vector<2x4x4xf32> -> vector<2x4x4xf32>
    "tpu.trace_stop"() : () -> ()
    %cst_207 = arith.constant dense<0xFF800000> : vector<4x4xf32>
    %300 = vector.multi_reduction <maximumf>, %299, %cst_207 [0] : vector<2x4x4xf32> to vector<4x4xf32>
    %301 = vector.shape_cast %300 : vector<4x4xf32> to vector<1x4x4xf32>
    %302 = vector.broadcast %301 : vector<1x4x4xf32> to vector<2x4x4xf32>
    %303 = arith.subf %299, %302 : vector<2x4x4xf32>
    %304 = math.exp %303 : vector<2x4x4xf32>
    %cst_208 = arith.constant dense<0.000000e+00> : vector<4x4xf32>
    %305 = vector.multi_reduction <add>, %304, %cst_208 [0] : vector<2x4x4xf32> to vector<4x4xf32>
    %306 = vector.shape_cast %305 : vector<4x4xf32> to vector<1x4x4xf32>
    %307 = tpu.reciprocal %306 {approx = true} : vector<1x4x4xf32> -> vector<1x4x4xf32>
    %308 = vector.broadcast %307 : vector<1x4x4xf32> to vector<2x4x4xf32>
    %309 = arith.mulf %304, %308 : vector<2x4x4xf32>
    "tpu.trace_start"() <{level = 10 : i32, message = "bnm,bmd->bnd"}> : () -> ()
    %cst_209 = arith.constant dense<0.000000e+00> : vector<2x4x8xf32>
    %310 = tpu.matmul %309, %298, %cst_209 {dimension_numbers = #tpu.dot_dimension_numbers<[2], [1], [1], [2], [0, 0, 0, 1, 1, 2], [0], [0]>} : vector<2x4x4xf32>, vector<2x4x8xf32>, vector<2x4x8xf32> -> vector<2x4x8xf32>
    "tpu.trace_stop"() : () -> ()
    %311 = vector.shape_cast %310 : vector<2x4x8xf32> to vector<8x8xf32>
    %c2_210 = arith.constant 2 : index
    %c0_211 = arith.constant 0 : index
    %c0_212 = arith.constant 0 : index
    %312 = vector.load %arg19[%c2_210, %c0_211, %c0_212] : memref<4x8x32xf32, #tpu.memory_space<vmem>>, vector<1x8x32xf32>
    %313 = vector.shape_cast %312 : vector<1x8x32xf32> to vector<8x32xf32>
    %cst_213 = arith.constant dense<0.000000e+00> : vector<8x32xf32>
    %314 = tpu.matmul %311, %313, %cst_213 {dimension_numbers = #tpu.dot_dimension_numbers<[1], [0], [0], [1], [0, 0, 1, 1], [], []>} : vector<8x8xf32>, vector<8x32xf32>, vector<8x32xf32> -> vector<8x32xf32>
    %315 = arith.addf %295, %314 : vector<8x32xf32>
    %316 = vector.extract_strided_slice %239 {offsets = [0, 0, 24], sizes = [2, 4, 8], strides = [1, 1, 1]} : vector<2x4x32xf32> to vector<2x4x8xf32>
    %317 = vector.extract_strided_slice %245 {offsets = [0, 0, 24], sizes = [2, 4, 8], strides = [1, 1, 1]} : vector<2x4x32xf32> to vector<2x4x8xf32>
    %318 = vector.extract_strided_slice %251 {offsets = [0, 0, 24], sizes = [2, 4, 8], strides = [1, 1, 1]} : vector<2x4x32xf32> to vector<2x4x8xf32>
    "tpu.trace_start"() <{level = 10 : i32, message = "bnd,bmd->bnm"}> : () -> ()
    %cst_214 = arith.constant dense<0.000000e+00> : vector<2x4x4xf32>
    %319 = tpu.matmul %317, %316, %cst_214 {dimension_numbers = #tpu.dot_dimension_numbers<[2], [2], [1], [1], [0, 0, 0, 1, 1, 1], [0], [0]>} : vector<2x4x8xf32>, vector<2x4x8xf32>, vector<2x4x4xf32> -> vector<2x4x4xf32>
    "tpu.trace_stop"() : () -> ()
    %cst_215 = arith.constant dense<0xFF800000> : vector<4x4xf32>
    %320 = vector.multi_reduction <maximumf>, %319, %cst_215 [0] : vector<2x4x4xf32> to vector<4x4xf32>
    %321 = vector.shape_cast %320 : vector<4x4xf32> to vector<1x4x4xf32>
    %322 = vector.broadcast %321 : vector<1x4x4xf32> to vector<2x4x4xf32>
    %323 = arith.subf %319, %322 : vector<2x4x4xf32>
    %324 = math.exp %323 : vector<2x4x4xf32>
    %cst_216 = arith.constant dense<0.000000e+00> : vector<4x4xf32>
    %325 = vector.multi_reduction <add>, %324, %cst_216 [0] : vector<2x4x4xf32> to vector<4x4xf32>
    %326 = vector.shape_cast %325 : vector<4x4xf32> to vector<1x4x4xf32>
    %327 = tpu.reciprocal %326 {approx = true} : vector<1x4x4xf32> -> vector<1x4x4xf32>
    %328 = vector.broadcast %327 : vector<1x4x4xf32> to vector<2x4x4xf32>
    %329 = arith.mulf %324, %328 : vector<2x4x4xf32>
    "tpu.trace_start"() <{level = 10 : i32, message = "bnm,bmd->bnd"}> : () -> ()
    %cst_217 = arith.constant dense<0.000000e+00> : vector<2x4x8xf32>
    %330 = tpu.matmul %329, %318, %cst_217 {dimension_numbers = #tpu.dot_dimension_numbers<[2], [1], [1], [2], [0, 0, 0, 1, 1, 2], [0], [0]>} : vector<2x4x4xf32>, vector<2x4x8xf32>, vector<2x4x8xf32> -> vector<2x4x8xf32>
    "tpu.trace_stop"() : () -> ()
    %331 = vector.shape_cast %330 : vector<2x4x8xf32> to vector<8x8xf32>
    %c3_218 = arith.constant 3 : index
    %c0_219 = arith.constant 0 : index
    %c0_220 = arith.constant 0 : index
    %332 = vector.load %arg19[%c3_218, %c0_219, %c0_220] : memref<4x8x32xf32, #tpu.memory_space<vmem>>, vector<1x8x32xf32>
    %333 = vector.shape_cast %332 : vector<1x8x32xf32> to vector<8x32xf32>
    %cst_221 = arith.constant dense<0.000000e+00> : vector<8x32xf32>
    %334 = tpu.matmul %331, %333, %cst_221 {dimension_numbers = #tpu.dot_dimension_numbers<[1], [0], [0], [1], [0, 0, 1, 1], [], []>} : vector<8x8xf32>, vector<8x32xf32>, vector<8x32xf32> -> vector<8x32xf32>
    %335 = arith.addf %315, %334 : vector<8x32xf32>
    %336 = vector.shape_cast %335 : vector<8x32xf32> to vector<2x4x32xf32>
    %c0_222 = arith.constant 0 : index
    %c0_223 = arith.constant 0 : index
    %337 = vector.load %arg21[%c0_222, %c0_223] : memref<1x32xf32, #tpu.memory_space<vmem>>, vector<1x32xf32>
    %338 = vector.shape_cast %337 : vector<1x32xf32> to vector<1x1x32xf32>
    %339 = vector.broadcast %338 : vector<1x1x32xf32> to vector<2x4x32xf32>
    %340 = arith.mulf %336, %339 : vector<2x4x32xf32>
    %cst_224 = arith.constant dense<0.000000e+00> : vector<2x4xf32>
    %341 = vector.multi_reduction <add>, %340, %cst_224 [2] : vector<2x4x32xf32> to vector<2x4xf32>
    %c0_225 = arith.constant 0 : index
    %c0_226 = arith.constant 0 : index
    %342 = vector.load %arg22[%c0_225, %c0_226] : memref<1x1xf32, #tpu.memory_space<vmem>>, vector<1x1xf32>
    %343 = vector.broadcast %342 : vector<1x1xf32> to vector<2x4xf32>
    %344 = arith.addf %341, %343 : vector<2x4xf32>
    %cst_227 = arith.constant dense<0xFF800000> : vector<2xf32>
    %345 = vector.multi_reduction <maximumf>, %344, %cst_227 [1] : vector<2x4xf32> to vector<2xf32>
    %346 = vector.shape_cast %345 : vector<2xf32> to vector<2x1xf32>
    %347 = vector.broadcast %346 : vector<2x1xf32> to vector<2x4xf32>
    %348 = arith.subf %344, %347 : vector<2x4xf32>
    %349 = math.exp %348 : vector<2x4xf32>
    %cst_228 = arith.constant dense<0.000000e+00> : vector<2xf32>
    %350 = vector.multi_reduction <add>, %349, %cst_228 [1] : vector<2x4xf32> to vector<2xf32>
    %351 = vector.shape_cast %350 : vector<2xf32> to vector<2x1xf32>
    %352 = tpu.reciprocal %351 {approx = true} : vector<2x1xf32> -> vector<2x1xf32>
    %353 = vector.broadcast %352 : vector<2x1xf32> to vector<2x4xf32>
    %354 = arith.mulf %349, %353 : vector<2x4xf32>
    %c0_229 = arith.constant 0 : index
    %c0_230 = arith.constant 0 : index
    %355 = vector.load %arg23[%c0_229, %c0_230] : memref<32x32xf32, #tpu.memory_space<vmem>>, vector<32x32xf32>
    %cst_231 = arith.constant dense<0.000000e+00> : vector<8x32xf32>
    %356 = tpu.matmul %194, %355, %cst_231 {dimension_numbers = #tpu.dot_dimension_numbers<[1], [0], [0], [1], [0, 0, 1, 1], [], []>} : vector<8x32xf32>, vector<32x32xf32>, vector<8x32xf32> -> vector<8x32xf32>
    %c0_232 = arith.constant 0 : index
    %c0_233 = arith.constant 0 : index
    %357 = vector.load %arg24[%c0_232, %c0_233] : memref<1x32xf32, #tpu.memory_space<vmem>>, vector<1x32xf32>
    %358 = vector.broadcast %357 : vector<1x32xf32> to vector<8x32xf32>
    %359 = arith.addf %356, %358 : vector<8x32xf32>
    %360 = vector.shape_cast %359 : vector<8x32xf32> to vector<2x4x32xf32>
    %361 = vector.shape_cast %354 : vector<2x4xf32> to vector<2x4x1xf32>
    %362 = vector.broadcast %361 : vector<2x4x1xf32> to vector<2x4x32xf32>
    %363 = arith.mulf %362, %360 : vector<2x4x32xf32>
    %cst_234 = arith.constant dense<0.000000e+00> : vector<2x32xf32>
    %364 = vector.multi_reduction <add>, %363, %cst_234 [1] : vector<2x4x32xf32> to vector<2x32xf32>
    %c0_235 = arith.constant 0 : index
    %c0_236 = arith.constant 0 : index
    %365 = vector.load %arg25[%c0_235, %c0_236] : memref<2x32xf32, #tpu.memory_space<vmem>>, vector<2x32xf32>
    tpu.vector_store %arg25[%c0_235, %c0_236], %364 {strides = array<i32>} : memref<2x32xf32, #tpu.memory_space<vmem>>, vector<2x32xf32>,
    return
  }
}

</mosaic_0001>

<bundles_post_ra>
// kernel: tpu_custom_call.1
= control target key start
LH: loop header
LB: loop body
LE: loop exit
PB: predicated region body
PF: predicated region fallthrough
CT: control target
= control target key end

     0   :  { %s11718_s0 = inlined_call_operand.hbm [shape: f32[8,16,16], index: 0, kind: input, shape index: {}]   ;;  %s11719_s1 = inlined_call_operand.hbm [shape: f32[16,32], index: 1, kind: input, shape index: {}]   ;;  %s11720_s2 = inlined_call_operand.vmem [shape: f32[1,32], index: 2, kind: input, shape index: {}]   ;;  %s11721_s3 = inlined_call_operand.hbm [shape: f32[32,32], index: 3, kind: input, shape index: {}]   ;;  %s11722_s4 = inlined_call_operand.hbm [shape: f32[1,32], index: 4, kind: input, shape index: {}]   ;;  %s11723_s5 = inlined_call_operand.hbm [shape: f32[5,3,32,64], index: 5, kind: input, shape index: {}]   ;;  %s11724_s6 = inlined_call_operand.hbm [shape: f32[5,1,64], index: 6, kind: input, shape index: {}]   ;;  %s11725_s7 = inlined_call_operand.hbm [shape: f32[32,32], index: 7, kind: input, shape index: {}]   ;;  %s11726_s8 = inlined_call_operand.hbm [shape: f32[1,32], index: 8, kind: input, shape index: {}]   ;;  %s11727_s9 = inlined_call_operand.hbm [shape: f32[32,32], index: 9, kind: input, shape index: {}]   ;;  %s11728_s10 = inlined_call_operand.hbm [shape: f32[1,32], index: 10, kind: input, shape index: {}]   ;;  %s11729_s11 = inlined_call_operand.hbm [shape: f32[32,32], index: 11, kind: input, shape index: {}]   ;;  %s11730_s12 = inlined_call_operand.hbm [shape: f32[1,32], index: 12, kind: input, shape index: {}]   ;;  %s11731_s13 = inlined_call_operand.hbm [shape: f32[32,32], index: 13, kind: input, shape index: {}]   ;;  %s11732_s14 = inlined_call_operand.hbm [shape: f32[1,32], index: 14, kind: input, shape index: {}]   ;;  %s11733_s15 = inlined_call_operand.hbm [shape: f32[32,32], index: 15, kind: input, shape index: {}]   ;;  %s11734_s16 = inlined_call_operand.hbm [shape: f32[1,32], index: 16, kind: input, shape index: {}]   ;;  %s11735_s17 = inlined_call_operand.vmem [shape: f32[32,32], index: 17, kind: input, shape index: {}]   ;;  %s11736_s18 = inlined_call_operand.vmem [shape: f32[1,32], index: 18, kind: input, shape index: {}]   ;;  %s11737_s19 = inlined_call_operand.hbm [shape: f32[4,8,32], index: 19, kind: input, shape index: {}]   ;;  %s11738_s20 = inlined_call_operand.vmem [shape: f32[1,32], index: 20, kind: input, shape index: {}]   ;;  %s11739_s21 = inlined_call_operand.vmem [shape: f32[1,32], index: 21, kind: input, shape index: {}]   ;;  %s11740_s22 = inlined_call_operand.<no memory space> [shape: f32[1,1], index: 22, kind: input, shape index: {}]   ;;  %s11741_s23 = inlined_call_operand.hbm [shape: f32[32,32], index: 23, kind: input, shape index: {}]   ;;  %s11742_s24 = inlined_call_operand.vmem [shape: f32[1,32], index: 24, kind: input, shape index: {}]   ;;  %s11743_s25 = inlined_call_operand.hbm [shape: f32[2,32], index: 25, kind: output, shape index: {}]  }
   0x1   :  { %11746 = sst [smem:[#allocation45_spill]] %s11718_s0  ;;  %v30_v0 = vstv %s11740_s22 }
   0x2   :  { %11747 = sst [smem:[#allocation46_spill]] %s11719_s1  ;;  %31 = vst [vmem:[#allocation3] sm:$0x1] %v30_v0 }
   0x3   :  { %11748 = sst [smem:[#allocation47_spill]] %s11720_s2 }
   0x4   :  { %11749 = sst [smem:[#allocation48_spill]] %s11721_s3 }
   0x5   :  { %11750 = sst [smem:[#allocation49_spill]] %s11722_s4 }
   0x6   :  { %11751 = sst [smem:[#allocation50_spill]] %s11723_s5 }
   0x7   :  { %11752 = sst [smem:[#allocation51_spill]] %s11724_s6 }
   0x8   :  { %11753 = sst [smem:[#allocation52_spill]] %s11725_s7 }
   0x9   :  { %11754 = sst [smem:[#allocation53_spill]] %s11726_s8 }
   0xa   :  { %11755 = sst [smem:[#allocation54_spill]] %s11727_s9 }
   0xb   :  { %32 = vsyncpa [#allocation5], 0 }
   0xc   :  { %33 = vsyncpa [#allocation8], 0 }
   0xd   :  { %34 = vsyncpa [#allocation11], 0 }
   0xe   :  { %35 = vsyncpa [#allocation14], 0 }
   0xf   :  { %36 = vsyncpa [#allocation17], 0 }
  0x10   :  { %37 = vsyncpa [#allocation20], 0 }
  0x11   :  { %38 = vsyncpa [#allocation23], 0 }
  0x12   :  { %39 = vsyncpa [#allocation26], 0 }
  0x13   :  { %40 = vsyncpa [#allocation29], 0 }
  0x14   :  { %41 = vsyncpa [#allocation32], 0 }
  0x15   :  { %42 = vsyncpa [#allocation6], 0  ;;  %s9679_s6 = smov [#allocation7]   ;;  %s9680_s7 = smov [#allocation10]  }
  0x16   :  { %s60_s30 = sshll.u32 %s9679_s6, 4  ;;  %s87_s3 = sshll.u32 %s9680_s7, 4  ;;  %s61_s30 = int_to_ptr.vmem [resolvable:$true] %s60_s30  ;;  %s88_s3 = int_to_ptr.vmem [resolvable:$true] %s87_s3 }
  0x17   :  { %s9285_s26 = scalar_lea.vmem %s61_s30, 256  ;;  %p9290_p1 = scmp.lt.s32.totalorder %s61_s30, %s61_s30 }
  0x18   :  { %p9286_p0 = scmp.ne.s32.totalorder %s61_s30, %s9285_s26  ;;  %p9291_p2 = scmp.lt.s32.totalorder %s9285_s26, %s9285_s26 }
  0x1a   :  { %p9292_p3 = por %p9291_p2, %p9290_p1 }
  0x1c   :  { %p9293_p4 = pnand %p9292_p3, %p9286_p0 }
  0x1e   :  { %9296 = shalt.err (!%p9293_p4)
}
  0x1f   :  { %s11744_s22 = smov 128   ;;  %s9682_s1 = smov 8  }
  0x20   :  { %s11756_s4 = sld [smem:[#allocation46_spill]]  ;;  %s9305_s28 = scalar_lea.vmem %s88_s3, 16 }
  0x21   :  { %p9306_p5 = scmp.ne.s32.totalorder %s88_s3, %s9305_s28  ;;  %s9309_s9 = scalar_lea.vmem %s88_s3, 32 }
  0x22   :  { %p9310_p6 = scmp.lt.s32.totalorder %s88_s3, %s88_s3  ;;  %p9311_p7 = scmp.lt.s32.totalorder %s9309_s9, %s9305_s28 }
  0x24   :  { %p9312_p8 = por %p9311_p7, %p9310_p6 }
  0x26   :  { %66 = dma.hbm_to_vmem [thread:$0]  %s11756_s4, 256, %s61_s30, [#allocation8], %s11744_s22, %s11744_s22, %s9682_s1  }
  0x27   :  { %p9313_p9 = pnand %p9312_p8, %p9306_p5 }
  0x29   :  { %9316 = shalt.err (!%p9313_p9)
}
  0x2a   :  { %s11757_s29 = sld [smem:[#allocation49_spill]]  ;;  %s9683_s2 = smov [#allocation13]  }
  0x2b   :  { %s108_s6 = sshll.u32 %s9683_s2, 4  ;;  %s109_s6 = int_to_ptr.vmem [resolvable:$true] %s108_s6 }
  0x2c   :  { %s9325_s7 = scalar_lea.vmem %s109_s6, 80  ;;  %s9329_s26 = scalar_lea.vmem %s109_s6, 96 }
  0x2d   :  { %p9326_p10 = scmp.ne.s32.totalorder %s109_s6, %s9325_s7  ;;  %p9330_p11 = scmp.lt.s32.totalorder %s109_s6, %s109_s6 }
  0x2e   :  { %p9331_p12 = scmp.lt.s32.totalorder %s9329_s26, %s9325_s7 }
  0x30   :  { %90 = dma.hbm_to_vmem [thread:$0]  %s11757_s29, 16, %s88_s3, [#allocation11]  }
  0x31   :  { %p9332_p13 = por %p9331_p12, %p9330_p11 }
  0x33   :  { %p9333_p0 = pnand %p9332_p13, %p9326_p10 }
  0x35   :  { %9336 = shalt.err (!%p9333_p0)
}
  0x36   :  { %s9684_s30 = smov 16   ;;  %s9685_s8 = smov 1  }
  0x37   :  { %s11758_s28 = sld [smem:[#allocation51_spill]]  ;;  %s9686_s9 = smov [#allocation16]  }
  0x38   :  { %s133_s5 = sshll.u32 %s9686_s9, 4  ;;  %s9687_s3 = smov [#allocation19]   ;;  %s134_s5 = int_to_ptr.vmem [resolvable:$true] %s133_s5 }
  0x39   :  { %s155_s0 = sshll.u32 %s9687_s3, 4  ;;  %s9345_s29 = scalar_lea.vmem %s134_s5, 16  ;;  %s156_s0 = int_to_ptr.vmem [resolvable:$true] %s155_s0 }
  0x3a   :  { %p9346_p1 = scmp.ne.s32.totalorder %s134_s5, %s9345_s29  ;;  %s9349_s2 = scalar_lea.vmem %s134_s5, 32 }
  0x3b   :  { %p9350_p2 = scmp.lt.s32.totalorder %s134_s5, %s134_s5  ;;  %p9351_p3 = scmp.lt.s32.totalorder %s9349_s2, %s9345_s29 }
  0x3d   :  { %114 = dma.hbm_to_vmem [thread:$0]  %s11758_s28, 80, %s109_s6, [#allocation14], %s9684_s30, %s9684_s30, %s9685_s8  }
  0x3e   :  { %p9352_p4 = por %p9351_p3, %p9350_p2 }
  0x40   :  { %p9353_p5 = pnand %p9352_p4, %p9346_p1 }
  0x42   :  { %9356 = shalt.err (!%p9353_p5)
}
  0x43   :  { %s11759_s22 = sld [smem:[#allocation53_spill]]  ;;  %s9365_s27 = scalar_lea.vmem %s156_s0, 16 }
  0x44   :  { %p9366_p6 = scmp.ne.s32.totalorder %s156_s0, %s9365_s27  ;;  %s9369_s6 = scalar_lea.vmem %s156_s0, 32 }
  0x45   :  { %p9370_p7 = scmp.lt.s32.totalorder %s156_s0, %s156_s0  ;;  %p9371_p8 = scmp.lt.s32.totalorder %s9369_s6, %s9365_s27 }
  0x47   :  { %p9372_p9 = por %p9371_p8, %p9370_p7 }
  0x49   :  { %136 = dma.hbm_to_vmem [thread:$0]  %s11759_s22, 16, %s134_s5, [#allocation17]  }
  0x4a   :  { %p9373_p10 = pnand %p9372_p9, %p9366_p6 }
  0x4c   :  { %9376 = shalt.err (!%p9373_p10)
}
  0x4d   :  { %158 = dma.hbm_to_vmem [thread:$0]  %s11728_s10, 16, %s156_s0, [#allocation20]  }
  0x4e   :  { %s9688_s4 = smov [#allocation22]   ;;  %s9689_s9 = smov [#allocation25]  }
  0x4f   :  { %s177_s28 = sshll.u32 %s9688_s4, 4  ;;  %s199_s3 = sshll.u32 %s9689_s9, 4  ;;  %s178_s28 = int_to_ptr.vmem [resolvable:$true] %s177_s28  ;;  %s200_s3 = int_to_ptr.vmem [resolvable:$true] %s199_s3 }
  0x50   :  { %s9385_s29 = scalar_lea.vmem %s178_s28, 16  ;;  %s9389_s22 = scalar_lea.vmem %s178_s28, 32 }
  0x51   :  { %p9386_p11 = scmp.ne.s32.totalorder %s178_s28, %s9385_s29  ;;  %p9390_p12 = scmp.lt.s32.totalorder %s178_s28, %s178_s28 }
  0x52   :  { %p9391_p13 = scmp.lt.s32.totalorder %s9389_s22, %s9385_s29 }
  0x54   :  { %p9392_p0 = por %p9391_p13, %p9390_p12 }
  0x56   :  { %p9393_p1 = pnand %p9392_p0, %p9386_p11 }
  0x58   :  { %9396 = shalt.err (!%p9393_p1)
}
  0x59   :  { %180 = dma.hbm_to_vmem [thread:$0]  %s11730_s12, 16, %s178_s28, [#allocation23]  }
  0x5a   :  { %s9405_s7 = scalar_lea.vmem %s200_s3, 16  ;;  %s9409_s10 = scalar_lea.vmem %s200_s3, 32 }
  0x5b   :  { %p9406_p2 = scmp.ne.s32.totalorder %s200_s3, %s9405_s7  ;;  %p9410_p3 = scmp.lt.s32.totalorder %s200_s3, %s200_s3 }
  0x5c   :  { %p9411_p4 = scmp.lt.s32.totalorder %s9409_s10, %s9405_s7 }
  0x5e   :  { %p9412_p5 = por %p9411_p4, %p9410_p3 }
  0x60   :  { %p9413_p6 = pnand %p9412_p5, %p9406_p2 }
  0x62   :  { %9416 = shalt.err (!%p9413_p6)
}
  0x63   :  { %202 = dma.hbm_to_vmem [thread:$0]  %s11732_s14, 16, %s200_s3, [#allocation26]  }
  0x64   :  { %s9690_s27 = smov [#allocation28]   ;;  %s9691_s30 = smov [#allocation4]  }
  0x65   :  { %s221_s6 = sshll.u32 %s9690_s27, 4  ;;  %s48_s8 = sshll.u32 %s9691_s30, 4  ;;  %s222_s6 = int_to_ptr.vmem [resolvable:$true] %s221_s6  ;;  %s49_s8 = int_to_ptr.vmem [resolvable:$true] %s48_s8 }
  0x66   :  { %s9425_s4 = scalar_lea.vmem %s222_s6, 16  ;;  %s9429_s12 = scalar_lea.vmem %s222_s6, 32 }
  0x67   :  { %p9426_p7 = scmp.ne.s32.totalorder %s222_s6, %s9425_s4  ;;  %p9430_p8 = scmp.lt.s32.totalorder %s222_s6, %s222_s6 }
  0x68   :  { %p9431_p9 = scmp.lt.s32.totalorder %s9429_s12, %s9425_s4 }
  0x6a   :  { %p9432_p10 = por %p9431_p9, %p9430_p8 }
  0x6c   :  { %p9433_p11 = pnand %p9432_p10, %p9426_p7 }
  0x6e   :  { %9436 = shalt.err (!%p9433_p11)
}
  0x6f   :  { %224 = dma.hbm_to_vmem [thread:$0]  %s11734_s16, 16, %s222_s6, [#allocation29]  }
  0x70   :  { %s9445_s29 = scalar_lea.vmem %s49_s8, 2048  ;;  %p9450_p13 = scmp.lt.s32.totalorder %s49_s8, %s49_s8 }
  0x71   :  { %p9446_p12 = scmp.ne.s32.totalorder %s49_s8, %s9445_s29  ;;  %p9451_p0 = scmp.lt.s32.totalorder %s9445_s29, %s9445_s29 }
  0x73   :  { %p9452_p1 = por %p9451_p0, %p9450_p13 }
  0x75   :  { %p9453_p2 = pnand %p9452_p1, %p9446_p12 }
  0x77   :  { %9456 = shalt.err (!%p9453_p2)
}
  0x78   :  { %s11760_s14 = smov 128   ;;  %s11761_s5 = sld [smem:[#allocation45_spill]] }
  0x79   :  { %s9692_s2 = smov [#allocation9]   ;;  %s9693_s10 = smov [#allocation12]  }
  0x7a   :  { %s74_s7 = sshll.u32 %s9692_s2, 4  ;;  %s96_s16 = sshll.u32 %s9693_s10, 4  ;;  %s75_s7 = int_to_ptr.vmem [resolvable:$true] %s74_s7  ;;  %s97_s16 = int_to_ptr.vmem [resolvable:$true] %s96_s16 }
  0x7b   :  { %s9465_s0 = scalar_lea.vmem %s75_s7, 512  ;;  %p9470_p4 = scmp.lt.s32.totalorder %s75_s7, %s75_s7 }
  0x7c   :  { %p9466_p3 = scmp.ne.s32.totalorder %s75_s7, %s9465_s0  ;;  %p9471_p5 = scmp.lt.s32.totalorder %s9465_s0, %s9465_s0 }
  0x7e   :  { %54 = dma.hbm_to_vmem [thread:$0]  %s11761_s5, 2048, %s49_s8, [#allocation5], %s11760_s14, %s11760_s14, %s9682_s1  }
  0x7f   :  { %p9472_p6 = por %p9471_p5, %p9470_p4 }
  0x81   :  { %p9473_p7 = pnand %p9472_p6, %p9466_p3 }
  0x83   :  { %9476 = shalt.err (!%p9473_p7)
}
  0x84   :  { %s11762_s6 = sld [smem:[#allocation48_spill]]  ;;  %s9485_s30 = scalar_lea.vmem %s97_s16, 7680 }
  0x85   :  { %p9486_p8 = scmp.ne.s32.totalorder %s97_s16, %s9485_s30  ;;  %p9490_p9 = scmp.lt.s32.totalorder %s97_s16, %s97_s16 }
  0x86   :  { %p9491_p10 = scmp.lt.s32.totalorder %s9485_s30, %s9485_s30 }
  0x88   :  { %p9492_p11 = por %p9491_p10, %p9490_p9 }
  0x8a   :  { %80 = dma.hbm_to_vmem [thread:$0]  %s11762_s6, 512, %s75_s7, [#allocation8], %s11760_s14, %s11760_s14, %s9682_s1  }
  0x8b   :  { %p9493_p12 = pnand %p9492_p11, %p9486_p8 }
  0x8d   :  { %9496 = shalt.err (!%p9493_p12)
}
  0x8e   :  { %s11763_s12 = sld [smem:[#allocation50_spill]]  ;;  %s9694_s28 = smov [#allocation15]  }
  0x8f   :  { %s120_s9 = sshll.u32 %s9694_s28, 4  ;;  %s9695_s29 = smov [#allocation18]   ;;  %s121_s9 = int_to_ptr.vmem [resolvable:$true] %s120_s9 }
  0x90   :  { %s142_s3 = sshll.u32 %s9695_s29, 4  ;;  %s9505_s22 = scalar_lea.vmem %s121_s9, 512  ;;  %s143_s3 = int_to_ptr.vmem [resolvable:$true] %s142_s3 }
  0x91   :  { %p9506_p13 = scmp.ne.s32.totalorder %s121_s9, %s9505_s22  ;;  %p9510_p0 = scmp.lt.s32.totalorder %s121_s9, %s121_s9 }
  0x92   :  { %p9511_p1 = scmp.lt.s32.totalorder %s9505_s22, %s9505_s22 }
  0x94   :  { %102 = dma.hbm_to_vmem [thread:$0]  %s11763_s12, 7680, %s97_s16, [#allocation11], %s11760_s14, %s11760_s14, %s9682_s1  }
  0x95   :  { %p9512_p2 = por %p9511_p1, %p9510_p0 }
  0x97   :  { %p9513_p3 = pnand %p9512_p2, %p9506_p13 }
  0x99   :  { %9516 = shalt.err (!%p9513_p3)
}
  0x9a   :  { %s11764_s7 = sld [smem:[#allocation52_spill]]  ;;  %s9525_s10 = scalar_lea.vmem %s143_s3, 512 }
  0x9b   :  { %p9526_p4 = scmp.ne.s32.totalorder %s143_s3, %s9525_s10  ;;  %p9530_p5 = scmp.lt.s32.totalorder %s143_s3, %s143_s3 }
  0x9c   :  { %p9531_p6 = scmp.lt.s32.totalorder %s9525_s10, %s9525_s10 }
  0x9e   :  { %p9532_p7 = por %p9531_p6, %p9530_p5 }
  0xa0   :  { %126 = dma.hbm_to_vmem [thread:$0]  %s11764_s7, 512, %s121_s9, [#allocation14], %s11760_s14, %s11760_s14, %s9682_s1  }
  0xa1   :  { %p9533_p8 = pnand %p9532_p7, %p9526_p4 }
  0xa3   :  { %9536 = shalt.err (!%p9533_p8)
}
  0xa4   :  { %s11765_s26 = sld [smem:[#allocation54_spill]]  ;;  %s9696_s27 = smov [#allocation21]  }
  0xa5   :  { %s164_s6 = sshll.u32 %s9696_s27, 4  ;;  %s9697_s30 = smov [#allocation24]   ;;  %s165_s6 = int_to_ptr.vmem [resolvable:$true] %s164_s6 }
  0xa6   :  { %s186_s8 = sshll.u32 %s9697_s30, 4  ;;  %s9545_s4 = scalar_lea.vmem %s165_s6, 512  ;;  %s187_s8 = int_to_ptr.vmem [resolvable:$true] %s186_s8 }
  0xa7   :  { %p9546_p9 = scmp.ne.s32.totalorder %s165_s6, %s9545_s4  ;;  %p9550_p10 = scmp.lt.s32.totalorder %s165_s6, %s165_s6 }
  0xa8   :  { %p9551_p11 = scmp.lt.s32.totalorder %s9545_s4, %s9545_s4 }
  0xaa   :  { %148 = dma.hbm_to_vmem [thread:$0]  %s11765_s26, 512, %s143_s3, [#allocation17], %s11760_s14, %s11760_s14, %s9682_s1  }
  0xab   :  { %p9552_p12 = por %p9551_p11, %p9550_p10 }
  0xad   :  { %p9553_p13 = pnand %p9552_p12, %p9546_p9 }
  0xaf   :  { %9556 = shalt.err (!%p9553_p13)
}
  0xb0   :  { %170 = dma.hbm_to_vmem [thread:$0]  %s11729_s11, 512, %s165_s6, [#allocation20], %s11760_s14, %s11760_s14, %s9682_s1  }
  0xb1   :  { %s9565_s9 = scalar_lea.vmem %s187_s8, 512  ;;  %p9570_p1 = scmp.lt.s32.totalorder %s187_s8, %s187_s8 }
  0xb2   :  { %p9566_p0 = scmp.ne.s32.totalorder %s187_s8, %s9565_s9  ;;  %p9571_p2 = scmp.lt.s32.totalorder %s9565_s9, %s9565_s9 }
  0xb4   :  { %p9572_p3 = por %p9571_p2, %p9570_p1 }
  0xb6   :  { %p9573_p4 = pnand %p9572_p3, %p9566_p0 }
  0xb8   :  { %9576 = shalt.err (!%p9573_p4)
}
  0xb9   :  { %192 = dma.hbm_to_vmem [thread:$0]  %s11731_s13, 512, %s187_s8, [#allocation23], %s11760_s14, %s11760_s14, %s9682_s1  }
  0xba   :  { %s9698_s22 = smov [#allocation27]   ;;  %s9699_s2 = smov [#allocation30]  }
  0xbb   :  { %s208_s5 = sshll.u32 %s9698_s22, 4  ;;  %s234_s11 = sshll.u32 %s9699_s2, 4  ;;  %s209_s5 = int_to_ptr.vmem [resolvable:$true] %s208_s5  ;;  %s235_s11 = int_to_ptr.vmem [resolvable:$true] %s234_s11 }
  0xbc   :  { %s9585_s7 = scalar_lea.vmem %s209_s5, 512  ;;  %p9590_p6 = scmp.lt.s32.totalorder %s209_s5, %s209_s5 }
  0xbd   :  { %p9586_p5 = scmp.ne.s32.totalorder %s209_s5, %s9585_s7  ;;  %p9591_p7 = scmp.lt.s32.totalorder %s9585_s7, %s9585_s7 }
  0xbf   :  { %p9592_p8 = por %p9591_p7, %p9590_p6 }
  0xc1   :  { %p9593_p9 = pnand %p9592_p8, %p9586_p5 }
  0xc3   :  { %9596 = shalt.err (!%p9593_p9)
}
  0xc4   :  { %214 = dma.hbm_to_vmem [thread:$0]  %s11733_s15, 512, %s209_s5, [#allocation26], %s11760_s14, %s11760_s14, %s9682_s1  }
  0xc5   :  { %s9605_s13 = scalar_lea.vmem %s235_s11, 512  ;;  %p9610_p11 = scmp.lt.s32.totalorder %s235_s11, %s235_s11 }
  0xc6   :  { %p9606_p10 = scmp.ne.s32.totalorder %s235_s11, %s9605_s13  ;;  %p9611_p12 = scmp.lt.s32.totalorder %s9605_s13, %s9605_s13 }
  0xc8   :  { %p9612_p13 = por %p9611_p12, %p9610_p11 }
  0xca   :  { %p9613_p0 = pnand %p9612_p13, %p9606_p10 }
  0xcc   :  { %9616 = shalt.err (!%p9613_p0)
}
  0xcd   :  { %240 = dma.hbm_to_vmem [thread:$0]  %s11737_s19, 512, %s235_s11, [#allocation29], %s11760_s14, %s11760_s14, %s9682_s1  }
  0xce   :  { %s9700_s27 = smov [#allocation31]  }
  0xcf   :  { %s252_s6 = sshll.u32 %s9700_s27, 4  ;;  %s253_s6 = int_to_ptr.vmem [resolvable:$true] %s252_s6 }
  0xd0   :  { %s9625_s30 = scalar_lea.vmem %s253_s6, 512  ;;  %p9630_p2 = scmp.lt.s32.totalorder %s253_s6, %s253_s6 }
  0xd1   :  { %p9626_p1 = scmp.ne.s32.totalorder %s253_s6, %s9625_s30  ;;  %p9631_p3 = scmp.lt.s32.totalorder %s9625_s30, %s9625_s30 }
  0xd3   :  { %p9632_p4 = por %p9631_p3, %p9630_p2 }
  0xd5   :  { %p9633_p5 = pnand %p9632_p4, %p9626_p1 }
  0xd7   :  { %9636 = shalt.err (!%p9633_p5)
}
  0xd8   :  { %258 = dma.hbm_to_vmem [thread:$0]  %s11741_s23, 512, %s253_s6, [#allocation32], %s11760_s14, %s11760_s14, %s9682_s1  }
  0xd9   :  { %9657 = dma.done.wait [#allocation5], 2048  }
  0xda   :  { %9658 = vsyncadd [#allocation5], 4294965248 }
  0xdb   :  { %9659 = dma.done.wait [#allocation8], 768  }
  0xdc   :  { %9660 = vsyncadd [#allocation8], 4294966528 }
  0xdd   :  { %9661 = dma.done.wait [#allocation11], 7696  }
  0xde   :  { %9662 = vsyncadd [#allocation11], 4294959600 }
  0xdf   :  { %9663 = dma.done.wait [#allocation14], 592  }
  0xe0   :  { %9664 = vsyncadd [#allocation14], 4294966704 }
  0xe1   :  { %9665 = dma.done.wait [#allocation17], 528  }
  0xe2   :  { %9666 = vsyncadd [#allocation17], 4294966768 }
  0xe3   :  { %9667 = dma.done.wait [#allocation20], 528  }
  0xe4   :  { %9668 = vsyncadd [#allocation20], 4294966768 }
  0xe5   :  { %9669 = dma.done.wait [#allocation23], 528  }
  0xe6   :  { %9670 = vsyncadd [#allocation23], 4294966768 }
  0xe7   :  { %9671 = dma.done.wait [#allocation26], 528  }
  0xe8   :  { %9672 = vsyncadd [#allocation26], 4294966768 }
  0xe9   :  { %9673 = dma.done.wait [#allocation29], 528  }
  0xea   :  { %9674 = vsyncadd [#allocation29], 4294966768 }
  0xeb   :  { %9675 = dma.done.wait [#allocation32], 512  }
  0xec   :  { %9676 = vsyncadd [#allocation32], 4294966784  ;;  %vm641_vm0 = vcmask 261120   ;;  %v9701_v1 = vmov 0.0   ;;  %vm340_vm1 = vcmask 130048   ;;  %v332_v2 = vld [vmem:[#allocation7 + $0x8] sm:$0xff] }
  0xed   :  { %933 = vst.msk [vmem:[#allocation2 + $0x10] sm:$0xff] %vm641_vm0, %v9701_v1  ;;  %934 = vst.msk [vmem:[#allocation2 + $0x18] sm:$0xff] %vm641_vm0, %v9701_v1  ;;  %v331_v3 = vld [vmem:[#allocation7] sm:$0xff]  ;;  %8172 = vmatprep.subr.mxu0 %v332_v2  ;;  %v316_v5 = vld [vmem:[#allocation4 + $0x8] sm:$0xff]  ;;  %s11766_s1 = sld [smem:[#allocation47_spill]]  ;;  %s9702_s14 = smov 96  }
  0xee   :  { %935 = vst.msk [vmem:[#allocation2 + $0x20] sm:$0xff] %vm641_vm0, %v9701_v1  ;;  %936 = vst.msk [vmem:[#allocation2 + $0x28] sm:$0xff] %vm641_vm0, %v9701_v1  ;;  %v315_v4 = vld [vmem:[#allocation4] sm:$0xff]  ;;  %8173 = vmatpush3.msra.mxu0 %v332_v2  ;;  %v317_v6 = vld [vmem:[#allocation4 + $0x10] sm:$0xff]  ;;  %s9706_s7 = smov 104  }
  0xef   :  { %937 = vst.msk [vmem:[#allocation2 + $0x30] sm:$0xff] %vm641_vm0, %v9701_v1  ;;  %938 = vst.msk [vmem:[#allocation2 + $0x38] sm:$0xff] %vm641_vm0, %v9701_v1  ;;  %8176 = vmatprep.mubr.msk.f32.mxu0 %vm340_vm1, %v315_v4  ;;  %8174 = vmatprep.subr.mxu0 %v331_v3  ;;  %v318_v7 = vld [vmem:[#allocation4 + $0x18] sm:$0xff]  ;;  %v319_v8 = vld [vmem:[#allocation4 + $0x20] sm:$0xff] }
  0xf0   :  { %943 = vst.msk [vmem:[#allocation2 + $0x60] sm:$0xff] %vm641_vm0, %v9701_v1  ;;  %944 = vst.msk [vmem:[#allocation2 + $0x68] sm:$0xff] %vm641_vm0, %v9701_v1  ;;  %8175 = vmatpush3.msra.mxu0 %v331_v3  ;;  %v320_v9 = vld [vmem:[#allocation4 + $0x28] sm:$0xff]  ;;  %v321_v10 = vld [vmem:[#allocation4 + $0x30] sm:$0xff] }
  0xf1   :  { %945 = vst.msk [vmem:[#allocation2 + $0x70] sm:$0xff] %vm641_vm0, %v9701_v1  ;;  %946 = vst.msk [vmem:[#allocation2 + $0x78] sm:$0xff] %vm641_vm0, %v9701_v1  ;;  %8177 = vmatmul.mubr.msk.f32.vlgmr.msra.gmra.mxu0 %vm340_vm1, %v316_v5  ;;  %v322_v11 = vld [vmem:[#allocation4 + $0x38] sm:$0xff]  ;;  %v323_v12 = vld [vmem:[#allocation4 + $0x40] sm:$0xff] }
  0xf2   :  { %947 = vst.msk [vmem:[#allocation2 + $0x80] sm:$0xff] %vm641_vm0, %v9701_v1  ;;  %948 = vst.msk [vmem:[#allocation2 + $0x88] sm:$0xff] %vm641_vm0, %v9701_v1  ;;  %8179 = vmatprep.mubr.msk.f32.mxu0 %vm340_vm1, %v317_v6  ;;  %v324_v13 = vld [vmem:[#allocation4 + $0x48] sm:$0xff]  ;;  %v325_v14 = vld [vmem:[#allocation4 + $0x50] sm:$0xff] }
  0xf3   :  { %953 = vst.msk [vmem:[#allocation2 + $0xb0] sm:$0xff] %vm641_vm0, %v9701_v1  ;;  %954 = vst.msk [vmem:[#allocation2 + $0xb8] sm:$0xff] %vm641_vm0, %v9701_v1  ;;  %v326_v15 = vld [vmem:[#allocation4 + $0x58] sm:$0xff]  ;;  %v327_v16 = vld [vmem:[#allocation4 + $0x60] sm:$0xff] }
  0xf4   :  { %955 = vst.msk [vmem:[#allocation2 + $0xc0] sm:$0xff] %vm641_vm0, %v9701_v1  ;;  %956 = vst.msk [vmem:[#allocation2 + $0xc8] sm:$0xff] %vm641_vm0, %v9701_v1  ;;  %v328_v17 = vld [vmem:[#allocation4 + $0x68] sm:$0xff]  ;;  %v329_v18 = vld [vmem:[#allocation4 + $0x70] sm:$0xff] }
  0xf5   :  { %957 = vst.msk [vmem:[#allocation2 + $0xd0] sm:$0xff] %vm641_vm0, %v9701_v1  ;;  %958 = vst.msk [vmem:[#allocation2 + $0xd8] sm:$0xff] %vm641_vm0, %v9701_v1  ;;  %8180 = vmatmul.mubr.msk.f32.gmra.mxu0 %vm340_vm1, %v318_v7  ;;  %v330_v19 = vld [vmem:[#allocation4 + $0x78] sm:$0xff]  ;;  %v633_v20 = vld [vmem:[#allocation9 + $0x18] sm:$0xff] }
  0xf6   :  { %963 = vst.msk [vmem:[#allocation2 + $0x100] sm:$0xff] %vm641_vm0, %v9701_v1  ;;  %964 = vst.msk [vmem:[#allocation2 + $0x108] sm:$0xff] %vm641_vm0, %v9701_v1  ;;  %8182 = vmatprep.mubr.msk.f32.mxu0 %vm340_vm1, %v319_v8  ;;  %8200 = vmatprep.subr.mxu1 %v633_v20  ;;  %v632_v21 = vld [vmem:[#allocation9 + $0x10] sm:$0xff]  ;;  %v631_v22 = vld [vmem:[#allocation9 + $0x8] sm:$0xff] }
  0xf7   :  { %965 = vst.msk [vmem:[#allocation2 + $0x110] sm:$0xff] %vm641_vm0, %v9701_v1  ;;  %966 = vst.msk [vmem:[#allocation2 + $0x118] sm:$0xff] %vm641_vm0, %v9701_v1  ;;  %8201 = vmatpush3.msra.mxu1 %v633_v20  ;;  %v630_v23 = vld [vmem:[#allocation9] sm:$0xff]  ;;  %v10044_v24 = vld [vmem:[%s11766_s1] ss:$0 sm:$0xff] }
  0xf8   :  { %967 = vst.msk [vmem:[#allocation2 + $0x120] sm:$0xff] %vm641_vm0, %v9701_v1  ;;  %968 = vst.msk [vmem:[#allocation2 + $0x128] sm:$0xff] %vm641_vm0, %v9701_v1  ;;  %8202 = vmatprep.subr.mxu1 %v632_v21 }
  0xf9   :  { %973 = vst.msk [vmem:[#allocation2 + $0x150] sm:$0xff] %vm641_vm0, %v9701_v1  ;;  %974 = vst.msk [vmem:[#allocation2 + $0x158] sm:$0xff] %vm641_vm0, %v9701_v1  ;;  %8183 = vmatmul.mubr.msk.f32.gmra.mxu0 %vm340_vm1, %v320_v9  ;;  %8203 = vmatpush3.msra.mxu1 %v632_v21 }
  0xfa   :  { %975 = vst.msk [vmem:[#allocation2 + $0x160] sm:$0xff] %vm641_vm0, %v9701_v1  ;;  %976 = vst.msk [vmem:[#allocation2 + $0x168] sm:$0xff] %vm641_vm0, %v9701_v1  ;;  %8185 = vmatprep.mubr.msk.f32.mxu0 %vm340_vm1, %v321_v10  ;;  %8204 = vmatprep.subr.mxu1 %v631_v22 }
  0xfb   :  { %977 = vst.msk [vmem:[#allocation2 + $0x170] sm:$0xff] %vm641_vm0, %v9701_v1  ;;  %978 = vst.msk [vmem:[#allocation2 + $0x178] sm:$0xff] %vm641_vm0, %v9701_v1  ;;  %8205 = vmatpush3.msra.mxu1 %v631_v22 }
  0xfc   :  { %983 = vst.msk [vmem:[#allocation2 + $0x1a0] sm:$0xff] %vm641_vm0, %v9701_v1  ;;  %984 = vst.msk [vmem:[#allocation2 + $0x1a8] sm:$0xff] %vm641_vm0, %v9701_v1  ;;  %8206 = vmatprep.subr.mxu1 %v630_v23 }
  0xfd   :  { %985 = vst.msk [vmem:[#allocation2 + $0x1b0] sm:$0xff] %vm641_vm0, %v9701_v1  ;;  %986 = vst.msk [vmem:[#allocation2 + $0x1b8] sm:$0xff] %vm641_vm0, %v9701_v1  ;;  %8186 = vmatmul.mubr.msk.f32.gmra.mxu0 %vm340_vm1, %v322_v11  ;;  %8207 = vmatpush3.msra.mxu1 %v630_v23 }
  0xfe   :  { %987 = vst.msk [vmem:[#allocation2 + $0x1c0] sm:$0xff] %vm641_vm0, %v9701_v1  ;;  %988 = vst.msk [vmem:[#allocation2 + $0x1c8] sm:$0xff] %vm641_vm0, %v9701_v1  ;;  %8188 = vmatprep.mubr.msk.f32.mxu0 %vm340_vm1, %v323_v12 }
  0xff   :  { %993 = vst.msk [vmem:[#allocation2 + $0x1f0] sm:$0xff] %vm641_vm0, %v9701_v1  ;;  %994 = vst.msk [vmem:[#allocation2 + $0x1f8] sm:$0xff] %vm641_vm0, %v9701_v1 }
 0x100   :  { %995 = vst.msk [vmem:[#allocation2 + $0x200] sm:$0xff] %vm641_vm0, %v9701_v1  ;;  %996 = vst.msk [vmem:[#allocation2 + $0x208] sm:$0xff] %vm641_vm0, %v9701_v1 }
 0x101   :  { %997 = vst.msk [vmem:[#allocation2 + $0x210] sm:$0xff] %vm641_vm0, %v9701_v1  ;;  %998 = vst.msk [vmem:[#allocation2 + $0x218] sm:$0xff] %vm641_vm0, %v9701_v1  ;;  %8189 = vmatmul.mubr.msk.f32.gmra.mxu0 %vm340_vm1, %v324_v13 }
 0x102   :  { %1003 = vst.msk [vmem:[#allocation2 + $0x240] sm:$0xff] %vm641_vm0, %v9701_v1  ;;  %1004 = vst.msk [vmem:[#allocation2 + $0x248] sm:$0xff] %vm641_vm0, %v9701_v1  ;;  %8191 = vmatprep.mubr.msk.f32.mxu0 %vm340_vm1, %v325_v14 }
 0x103   :  { %1005 = vst.msk [vmem:[#allocation2 + $0x250] sm:$0xff] %vm641_vm0, %v9701_v1  ;;  %1006 = vst.msk [vmem:[#allocation2 + $0x258] sm:$0xff] %vm641_vm0, %v9701_v1 }
 0x104   :  { %1007 = vst.msk [vmem:[#allocation2 + $0x260] sm:$0xff] %vm641_vm0, %v9701_v1  ;;  %1008 = vst.msk [vmem:[#allocation2 + $0x268] sm:$0xff] %vm641_vm0, %v9701_v1 }
 0x105   :  { %8192 = vmatmul.mubr.msk.f32.gmra.mxu0 %vm340_vm1, %v326_v15 }
 0x106   :  { %8194 = vmatprep.mubr.msk.f32.mxu0 %vm340_vm1, %v327_v16 }
 0x109   :  { %8195 = vmatmul.mubr.msk.f32.gmra.mxu0 %vm340_vm1, %v328_v17 }
 0x10a   :  { %8197 = vmatprep.mubr.msk.f32.mxu0 %vm340_vm1, %v329_v18 }
 0x10d   :  { %8198 = vmatmul.mubr.msk.f32.gmra.mxu0 %vm340_vm1, %v330_v19 }
 0x1b1   :  { %v8178_v25 = vpop.f32.mrf.mxu0 }
 0x1b2   :  { %v10047_v26 = vadd.f32 %v8178_v25, %v10044_v24 }
 0x1b3   :  { %v455_v27 = vpop.f32.mrf.mxu0 }
 0x1b4   :  { %v551_v28 = vmin.f32 %v10047_v26, 0.0  ;;  %v10051_v29 = vadd.f32 %v10044_v24, %v455_v27  ;;  %vm535_vm3 = vcmp.gt.f32.partialorder %v10047_v26, 0.0 }
 0x1b5   :  { %v8181_v30 = vpop.f32.mrf.mxu0 }
 0x1b6   :  { %v568_v31 = vmul.f32 1.442695, %v551_v28  ;;  %v550_v32 = vmin.f32 %v10051_v29, 0.0  ;;  %v10055_v33 = vadd.f32 %v8181_v30, %v10044_v24  ;;  %vm534_vm2 = vcmp.gt.f32.partialorder %v10051_v29, 0.0 }
 0x1b7   :  { %v465_v34 = vpop.f32.mrf.mxu0 }
 0x1b8   :  { %8857 = vpow2.f32 %v568_v31  ;;  %v566_v35 = vmul.f32 1.442695, %v550_v32  ;;  %v553_v36 = vmin.f32 %v10055_v33, 0.0  ;;  %v10059_v37 = vadd.f32 %v10044_v24, %v465_v34 }
 0x1b9   :  { %v8184_v38 = vpop.f32.mrf.mxu0  ;;  %vm537_vm4 = vcmp.gt.f32.partialorder %v10055_v33, 0.0 }
 0x1ba   :  { %8859 = vpow2.f32 %v566_v35  ;;  %v572_v39 = vmul.f32 1.442695, %v553_v36  ;;  %v10062_v40 = vadd.f32 %v8184_v38, %v10044_v24  ;;  %v552_v41 = vmin.f32 %v10059_v37, 0.0 }
 0x1bb   :  { %v475_v42 = vpop.f32.mrf.mxu0  ;;  %vm536_vm5 = vcmp.gt.f32.partialorder %v10059_v37, 0.0 }
 0x1bc   :  { %8861 = vpow2.f32 %v572_v39  ;;  %v555_v43 = vmin.f32 %v10062_v40, 0.0  ;;  %v10067_v44 = vadd.f32 %v10044_v24, %v475_v42  ;;  %v570_v45 = vmul.f32 1.442695, %v552_v41 }
 0x1bd   :  { %v8187_v46 = vpop.f32.mrf.mxu0  ;;  %vm539_vm7 = vcmp.gt.f32.partialorder %v10062_v40, 0.0 }
 0x1be   :  { %v576_v47 = vmul.f32 1.442695, %v555_v43  ;;  %v554_v48 = vmin.f32 %v10067_v44, 0.0  ;;  %v10071_v49 = vadd.f32 %v8187_v46, %v10044_v24  ;;  %8863 = vpow2.f32 %v570_v45 }
 0x1bf   :  { %v485_v50 = vpop.f32.mrf.mxu0  ;;  %vm538_vm6 = vcmp.gt.f32.partialorder %v10067_v44, 0.0 }
 0x1c0   :  { %8865 = vpow2.f32 %v576_v47  ;;  %v574_v51 = vmul.f32 1.442695, %v554_v48  ;;  %v557_v52 = vmin.f32 %v10071_v49, 0.0  ;;  %v10075_v53 = vadd.f32 %v10044_v24, %v485_v50 }
 0x1c1   :  { %v8190_v54 = vpop.f32.mrf.mxu0  ;;  %vm541_vm9 = vcmp.gt.f32.partialorder %v10071_v49, 0.0 }
 0x1c2   :  { %8867 = vpow2.f32 %v574_v51  ;;  %v580_v55 = vmul.f32 1.442695, %v557_v52  ;;  %v10078_v56 = vadd.f32 %v8190_v54, %v10044_v24  ;;  %v556_v57 = vmin.f32 %v10075_v53, 0.0 }
 0x1c3   :  { %v495_v58 = vpop.f32.mrf.mxu0  ;;  %vm540_vm8 = vcmp.gt.f32.partialorder %v10075_v53, 0.0 }
 0x1c4   :  { %8869 = vpow2.f32 %v580_v55  ;;  %v559_v59 = vmin.f32 %v10078_v56, 0.0  ;;  %v10083_v60 = vadd.f32 %v10044_v24, %v495_v58  ;;  %v578_v62 = vmul.f32 1.442695, %v556_v57 }
 0x1c5   :  { %v8858_v61 = vpop.eup %8857  ;;  %v8193_v63 = vpop.f32.mrf.mxu0  ;;  %vm543_vm11 = vcmp.gt.f32.partialorder %v10078_v56, 0.0 }
 0x1c6   :  { %v584_v0 = vmul.f32 1.442695, %v559_v59  ;;  %v558_v2 = vmin.f32 %v10083_v60, 0.0  ;;  %v10087_v3 = vadd.f32 %v8193_v63, %v10044_v24  ;;  %8871 = vpow2.f32 %v578_v62 }
 0x1c7   :  { %v8860_v4 = vpop.eup %8859  ;;  %v505_v5 = vpop.f32.mrf.mxu0  ;;  %v7482_v8 = vadd.f32 -1.0, %v8858_v61  ;;  %vm542_vm10 = vcmp.gt.f32.partialorder %v10083_v60, 0.0 }
 0x1c8   :  { %8873 = vpow2.f32 %v584_v0  ;;  %v582_v6 = vmul.f32 1.442695, %v558_v2  ;;  %v561_v7 = vmin.f32 %v10087_v3, 0.0  ;;  %v10091_v10 = vadd.f32 %v10044_v24, %v505_v5 }
 0x1c9   :  { %v8862_v9 = vpop.eup %8861  ;;  %v8196_v11 = vpop.f32.mrf.mxu0  ;;  %v7481_v12 = vadd.f32 -1.0, %v8860_v4  ;;  %v615_v22 = vsel %vm535_vm3, %v10047_v26, %v7482_v8  ;;  %vm545_vm13 = vcmp.gt.f32.partialorder %v10087_v3, 0.0 }
 0x1ca   :  { %8875 = vpow2.f32 %v582_v6  ;;  %v588_v13 = vmul.f32 1.442695, %v561_v7  ;;  %v10094_v14 = vadd.f32 %v8196_v11, %v10044_v24  ;;  %v560_v15 = vmin.f32 %v10091_v10, 0.0  ;;  %v1268_v11 = vld [vmem:[#allocation12 + $0x38] sm:$0xff] }
 0x1cb   :  { %v515_v16 = vpop.f32.mrf.mxu0  ;;  %v614_v17 = vsel %vm534_vm2, %v10051_v29, %v7481_v12  ;;  %v7484_v18 = vadd.f32 -1.0, %v8862_v9  ;;  %v8864_v19 = vpop.eup %8863  ;;  %vm544_vm12 = vcmp.gt.f32.partialorder %v10091_v10, 0.0  ;;  %8264 = vmatprep.subr.mxu1 %v1268_v11  ;;  %v1267_v12 = vld [vmem:[#allocation12 + $0x30] sm:$0xff] }
 0x1cc   :  { %8877 = vpow2.f32 %v588_v13  ;;  %v563_v20 = vmin.f32 %v10094_v14, 0.0  ;;  %v10102_v21 = vadd.f32 %v10044_v24, %v515_v16  ;;  %8208 = vmatprep.mubr.msk.f32.mxu1 %vm641_vm0, %v614_v17  ;;  %v586_v25 = vmul.f32 1.442695, %v560_v15  ;;  %v1266_v13 = vld [vmem:[#allocation12 + $0x28] sm:$0xff]  ;;  %v1053_v15 = vld [vmem:[#allocation12 + $0x10] sm:$0xff]  ;;  %v1265_v16 = vld [vmem:[#allocation12 + $0x20] sm:$0xff] }
 0x1cd   :  { %v8866_v23 = vpop.eup %8865  ;;  %8209 = vmatmul.mubr.msk.f32.vlgmr.msra.gmra.mxu1 %vm641_vm0, %v615_v22  ;;  %v8199_v27 = vpop.f32.mrf.mxu0  ;;  %v7483_v28 = vadd.f32 -1.0, %v8864_v19  ;;  %v617_v35 = vsel %vm537_vm4, %v10055_v33, %v7484_v18  ;;  %vm547_vm15 = vcmp.gt.f32.partialorder %v10094_v14, 0.0  ;;  %v1052_v17 = vld [vmem:[#allocation12 + $0x8] sm:$0xff]  ;;  %v1051_v18 = vld [vmem:[#allocation12] sm:$0xff]  ;;  %v10153_v19 = vld [vmem:[#allocation12 + $0x58] sm:$0xff] }
 0x1ce   :  { %v592_v29 = vmul.f32 1.442695, %v563_v20  ;;  %v562_v30 = vmin.f32 %v10102_v21, 0.0  ;;  %v10110_v31 = vadd.f32 %v8199_v27, %v10044_v24  ;;  %8879 = vpow2.f32 %v586_v25  ;;  %8265 = vmatpush3.msra.mxu1 %v1268_v11  ;;  %v10156_v20 = vld [vmem:[#allocation10] ss:$0 sm:$0xff] }
 0x1cf   :  { %v8868_v32 = vpop.eup %8867  ;;  %v525_v34 = vpop.f32.mrf.mxu0  ;;  %v616_v26 = vsel %vm536_vm5, %v10059_v37, %v7483_v28  ;;  %v7486_v39 = vadd.f32 -1.0, %v8866_v23  ;;  %vm546_vm14 = vcmp.gt.f32.partialorder %v10102_v21, 0.0  ;;  %8266 = vmatprep.subr.mxu1 %v1267_v12 }
 0x1d0   :  { %8881 = vpow2.f32 %v592_v29  ;;  %v590_v36 = vmul.f32 1.442695, %v562_v30  ;;  %v565_v38 = vmin.f32 %v10110_v31, 0.0  ;;  %8211 = vmatprep.mubr.msk.f32.mxu1 %vm641_vm0, %v616_v26  ;;  %v526_v42 = vadd.f32 %v10044_v24, %v525_v34  ;;  %8267 = vmatpush3.msra.mxu1 %v1267_v12 }
 0x1d1   :  { %v8870_v41 = vpop.eup %8869  ;;  %8212 = vmatmul.mubr.msk.f32.gmra.mxu1 %vm641_vm0, %v617_v35  ;;  %v7485_v43 = vadd.f32 -1.0, %v8868_v32  ;;  %v619_v47 = vsel %vm539_vm7, %v10062_v40, %v7486_v39  ;;  %vm549_vm2 = vcmp.gt.f32.partialorder %v10110_v31, 0.0  ;;  %8268 = vmatprep.subr.mxu1 %v1266_v13 }
 0x1d2   :  { %8883 = vpow2.f32 %v590_v36  ;;  %v596_v45 = vmul.f32 1.442695, %v565_v38  ;;  %v564_v33 = vmin.f32 %v526_v42, 0.0  ;;  %v7488_v48 = vadd.f32 -1.0, %v8870_v41  ;;  %8269 = vmatpush3.msra.mxu1 %v1266_v13 }
 0x1d3   :  { %v618_v37 = vsel %vm538_vm6, %v10067_v44, %v7485_v43  ;;  %v8872_v46 = vpop.eup %8871  ;;  %vm548_vm1 = vcmp.gt.f32.partialorder %v526_v42, 0.0  ;;  %8270 = vmatprep.subr.mxu1 %v1265_v16 }
 0x1d4   :  { %8885 = vpow2.f32 %v596_v45  ;;  %8214 = vmatprep.mubr.msk.f32.mxu1 %vm641_vm0, %v618_v37  ;;  %v594_v50 = vmul.f32 1.442695, %v564_v33  ;;  %v7487_v51 = vadd.f32 -1.0, %v8872_v46  ;;  %v621_v54 = vsel %vm541_vm9, %v10071_v49, %v7488_v48  ;;  %8271 = vmatpush3.msra.mxu1 %v1265_v16 }
 0x1d5   :  { %v8874_v24 = vpop.eup %8873  ;;  %8215 = vmatmul.mubr.msk.f32.gmra.mxu1 %vm641_vm0, %v619_v47 }
 0x1d6   :  { %8887 = vpow2.f32 %v594_v50  ;;  %v620_v44 = vsel %vm540_vm8, %v10075_v53, %v7487_v51  ;;  %v7490_v40 = vadd.f32 -1.0, %v8874_v24 }
 0x1d7   :  { %v8876_v52 = vpop.eup %8875  ;;  %8217 = vmatprep.mubr.msk.f32.mxu1 %vm641_vm0, %v620_v44 }
 0x1d8   :  { %v7489_v55 = vadd.f32 -1.0, %v8876_v52  ;;  %v623_v53 = vsel %vm543_vm11, %v10078_v56, %v7490_v40 }
 0x1d9   :  { %v8878_v57 = vpop.eup %8877  ;;  %8218 = vmatmul.mubr.msk.f32.gmra.mxu1 %vm641_vm0, %v621_v54 }
 0x1da   :  { %v622_v58 = vsel %vm542_vm10, %v10083_v60, %v7489_v55  ;;  %v7492_v61 = vadd.f32 -1.0, %v8878_v57 }
 0x1db   :  { %8220 = vmatprep.mubr.msk.f32.mxu1 %vm641_vm0, %v622_v58  ;;  %v8880_v59 = vpop.eup %8879 }
 0x1dc   :  { %v7491_v49 = vadd.f32 -1.0, %v8880_v59  ;;  %v625_v60 = vsel %vm545_vm13, %v10087_v3, %v7492_v61 }
 0x1dd   :  { %v8882_v62 = vpop.eup %8881  ;;  %8221 = vmatmul.mubr.msk.f32.gmra.mxu1 %vm641_vm0, %v623_v53 }
 0x1de   :  { %v624_v0 = vsel %vm544_vm12, %v10091_v10, %v7491_v49  ;;  %v7494_v4 = vadd.f32 -1.0, %v8882_v62 }
 0x1df   :  { %v8884_v63 = vpop.eup %8883  ;;  %8223 = vmatprep.mubr.msk.f32.mxu1 %vm641_vm0, %v624_v0 }
 0x1e0   :  { %v7493_v2 = vadd.f32 -1.0, %v8884_v63  ;;  %v627_v7 = vsel %vm547_vm15, %v10094_v14, %v7494_v4  ;;  %v1054_v14 = vld [vmem:[#allocation12 + $0x18] sm:$0xff] }
 0x1e1   :  { %v8886_v5 = vpop.eup %8885  ;;  %8224 = vmatmul.mubr.msk.f32.gmra.mxu1 %vm641_vm0, %v625_v60  ;;  %8232 = vmatprep.subr.mxu0 %v1054_v14 }
 0x1e2   :  { %v626_v56 = vsel %vm546_vm14, %v10102_v21, %v7493_v2  ;;  %v7496_v8 = vadd.f32 -1.0, %v8886_v5  ;;  %8233 = vmatpush3.msra.mxu0 %v1054_v14 }
 0x1e3   :  { %8226 = vmatprep.mubr.msk.f32.mxu1 %vm641_vm0, %v626_v56  ;;  %v8888_v6 = vpop.eup %8887  ;;  %8234 = vmatprep.subr.mxu0 %v1053_v15 }
 0x1e4   :  { %v7495_v3 = vadd.f32 -1.0, %v8888_v6  ;;  %v629_v10 = vsel %vm549_vm2, %v10110_v31, %v7496_v8  ;;  %8235 = vmatpush3.msra.mxu0 %v1053_v15 }
 0x1e5   :  { %8227 = vmatmul.mubr.msk.f32.gmra.mxu1 %vm641_vm0, %v627_v7  ;;  %8236 = vmatprep.subr.mxu0 %v1052_v17 }
 0x1e6   :  { %v628_v9 = vsel %vm548_vm1, %v526_v42, %v7495_v3  ;;  %8237 = vmatpush3.msra.mxu0 %v1052_v17 }
 0x1e7   :  { %8229 = vmatprep.mubr.msk.f32.mxu1 %vm641_vm0, %v628_v9  ;;  %8238 = vmatprep.subr.mxu0 %v1051_v18 }
 0x1e8   :  { %8239 = vmatpush3.msra.mxu0 %v1051_v18 }
 0x1e9   :  { %8230 = vmatmul.mubr.msk.f32.gmra.mxu1 %vm641_vm0, %v629_v10  ;;  %8296 = vmatprep.subr.mxu0 %v10153_v19 }
 0x28d   :  { %v8210_v21 = vpop.f32.mrf.mxu1 }
 0x28e   :  { %v762_v22 = vadd.f32 %v8210_v21, %v10156_v20 }
 0x28f   :  { %v756_v23 = vpop.f32.mrf.mxu1 }
 0x290   :  { %v852_v25 = vmin.f32 %v762_v22, 0.0  ;;  %v10160_v27 = vadd.f32 %v10156_v20, %v756_v23  ;;  %vm836_vm3 = vcmp.gt.f32.partialorder %v762_v22, 0.0 }
 0x291   :  { %v8213_v28 = vpop.f32.mrf.mxu1 }
 0x292   :  { %v869_v29 = vmul.f32 1.442695, %v852_v25  ;;  %v851_v30 = vmin.f32 %v10160_v27, 0.0  ;;  %v10164_v31 = vadd.f32 %v8213_v28, %v10156_v20  ;;  %vm835_vm4 = vcmp.gt.f32.partialorder %v10160_v27, 0.0 }
 0x293   :  { %v766_v32 = vpop.f32.mrf.mxu1 }
 0x294   :  { %8889 = vpow2.f32 %v869_v29  ;;  %v867_v34 = vmul.f32 1.442695, %v851_v30  ;;  %v854_v26 = vmin.f32 %v10164_v31, 0.0  ;;  %v10168_v35 = vadd.f32 %v10156_v20, %v766_v32 }
 0x295   :  { %v8216_v36 = vpop.f32.mrf.mxu1  ;;  %vm838_vm5 = vcmp.gt.f32.partialorder %v10164_v31, 0.0 }
 0x296   :  { %8891 = vpow2.f32 %v867_v34  ;;  %v873_v38 = vmul.f32 1.442695, %v854_v26  ;;  %v10171_v39 = vadd.f32 %v8216_v36, %v10156_v20  ;;  %v853_v41 = vmin.f32 %v10168_v35, 0.0 }
 0x297   :  { %v776_v42 = vpop.f32.mrf.mxu1  ;;  %vm837_vm6 = vcmp.gt.f32.partialorder %v10168_v35, 0.0 }
 0x298   :  { %8893 = vpow2.f32 %v873_v38  ;;  %v856_v43 = vmin.f32 %v10171_v39, 0.0  ;;  %v10176_v45 = vadd.f32 %v10156_v20, %v776_v42  ;;  %v871_v33 = vmul.f32 1.442695, %v853_v41 }
 0x299   :  { %v8219_v37 = vpop.f32.mrf.mxu1  ;;  %vm840_vm7 = vcmp.gt.f32.partialorder %v10171_v39, 0.0 }
 0x29a   :  { %v877_v46 = vmul.f32 1.442695, %v856_v43  ;;  %v855_v47 = vmin.f32 %v10176_v45, 0.0  ;;  %v10180_v48 = vadd.f32 %v8219_v37, %v10156_v20  ;;  %8895 = vpow2.f32 %v871_v33 }
 0x29b   :  { %v786_v24 = vpop.f32.mrf.mxu1  ;;  %vm839_vm8 = vcmp.gt.f32.partialorder %v10176_v45, 0.0 }
 0x29c   :  { %8897 = vpow2.f32 %v877_v46  ;;  %v875_v50 = vmul.f32 1.442695, %v855_v47  ;;  %v858_v51 = vmin.f32 %v10180_v48, 0.0  ;;  %v10184_v52 = vadd.f32 %v10156_v20, %v786_v24 }
 0x29d   :  { %v8222_v44 = vpop.f32.mrf.mxu1  ;;  %vm842_vm9 = vcmp.gt.f32.partialorder %v10180_v48, 0.0 }
 0x29e   :  { %8899 = vpow2.f32 %v875_v50  ;;  %v881_v54 = vmul.f32 1.442695, %v858_v51  ;;  %v10187_v55 = vadd.f32 %v8222_v44, %v10156_v20  ;;  %v857_v40 = vmin.f32 %v10184_v52, 0.0  ;;  %v1497_v51 = vld [vmem:[#allocation12 + $0x50] sm:$0xff] }
 0x29f   :  { %v796_v57 = vpop.f32.mrf.mxu1  ;;  %vm841_vm10 = vcmp.gt.f32.partialorder %v10184_v52, 0.0 }
 0x2a0   :  { %8901 = vpow2.f32 %v881_v54  ;;  %v860_v58 = vmin.f32 %v10187_v55, 0.0  ;;  %v10192_v59 = vadd.f32 %v10156_v20, %v796_v57  ;;  %v879_v61 = vmul.f32 1.442695, %v857_v40 }
 0x2a1   :  { %v8890_v53 = vpop.eup %8889  ;;  %v8225_v62 = vpop.f32.mrf.mxu1  ;;  %vm844_vm11 = vcmp.gt.f32.partialorder %v10187_v55, 0.0 }
 0x2a2   :  { %v7515_v49 = vadd.f32 -1.0, %v8890_v53  ;;  %v885_v63 = vmul.f32 1.442695, %v860_v58  ;;  %v859_v0 = vmin.f32 %v10192_v59, 0.0  ;;  %v10196_v60 = vadd.f32 %v8225_v62, %v10156_v20  ;;  %v1496_v62 = vld [vmem:[#allocation12 + $0x48] sm:$0xff] }
 0x2a3   :  { %v8892_v2 = vpop.eup %8891  ;;  %8903 = vpow2.f32 %v879_v61  ;;  %v806_v4 = vpop.f32.mrf.mxu1  ;;  %vm843_vm12 = vcmp.gt.f32.partialorder %v10192_v59, 0.0 }
 0x2a4   :  { %v10198_v5 = vsel %vm836_vm3, %v762_v22, %v7515_v49  ;;  %8905 = vpow2.f32 %v885_v63  ;;  %v883_v56 = vmul.f32 1.442695, %v859_v0  ;;  %v862_v7 = vmin.f32 %v10196_v60, 0.0 }
 0x2a5   :  { %v8894_v6 = vpop.eup %8893  ;;  %1012 = vst.msk [vmem:[#allocation2 + $0x28] sm:$0xff] %vm641_vm0, %v10198_v5  ;;  %v10204_v8 = vadd.f32 %v10156_v20, %v806_v4  ;;  %v8228_v3 = vpop.f32.mrf.mxu1  ;;  %v7514_v9 = vadd.f32 -1.0, %v8892_v2  ;;  %v1495_v2 = vld [vmem:[#allocation12 + $0x40] sm:$0xff]  ;;  %vm846_vm13 = vcmp.gt.f32.partialorder %v10196_v60, 0.0 }
 0x2a6   :  { %8907 = vpow2.f32 %v883_v56  ;;  %v10207_v10 = vadd.f32 %v8228_v3, %v10156_v20  ;;  %v7517_v11 = vadd.f32 -1.0, %v8894_v6  ;;  %v889_v12 = vmul.f32 1.442695, %v862_v7 }
 0x2a7   :  { %v861_v13 = vmin.f32 %v10204_v8, 0.0  ;;  %v816_v14 = vpop.f32.mrf.mxu1  ;;  %v10213_v15 = vsel %vm835_vm4, %v10160_v27, %v7514_v9  ;;  %v8896_v16 = vpop.eup %8895  ;;  %vm845_vm14 = vcmp.gt.f32.partialorder %v10204_v8, 0.0  ;;  %vm9703_vm4 = vmmov 0  }
 0x2a8   :  { %v864_v17 = vmin.f32 %v10207_v10, 0.0  ;;  %v10217_v18 = vadd.f32 %v10156_v20, %v816_v14  ;;  %1011 = vst.msk [vmem:[#allocation2 + $0x20] sm:$0xff] %vm641_vm0, %v10213_v15  ;;  %8272 = vmatprep.mubr.msk.f32.mxu1 %vm641_vm0, %v10213_v15  ;;  %v10224_v21 = vsel %vm838_vm5, %v10164_v31, %v7517_v11  ;;  %8909 = vpow2.f32 %v889_v12 }
 0x2a9   :  { %v8898_v22 = vpop.eup %8897  ;;  %v887_v23 = vmul.f32 1.442695, %v861_v13  ;;  %8273 = vmatmul.mubr.msk.f32.vlgmr.msra.gmra.mxu1 %vm641_vm0, %v10198_v5  ;;  %v8231_v25 = vpop.f32.mrf.mxu1  ;;  %v7516_v27 = vadd.f32 -1.0, %v8896_v16  ;;  %1014 = vst.msk [vmem:[#allocation2 + $0x78] sm:$0xff] %vm641_vm0, %v10224_v21  ;;  %vm848_vm15 = vcmp.gt.f32.partialorder %v10207_v10, 0.0  ;;  %vm5088_vm5 = vcmask 1041409  }
 0x2aa   :  { %v893_v28 = vmul.f32 1.442695, %v864_v17  ;;  %v863_v29 = vmin.f32 %v10217_v18, 0.0  ;;  %v10233_v30 = vadd.f32 %v8231_v25, %v10156_v20  ;;  %v7519_v31 = vadd.f32 -1.0, %v8898_v22 }
 0x2ab   :  { %v8900_v32 = vpop.eup %8899  ;;  %8911 = vpow2.f32 %v887_v23  ;;  %v826_v34 = vpop.f32.mrf.mxu1  ;;  %v10236_v26 = vsel %vm837_vm6, %v10168_v35, %v7516_v27  ;;  %vm847_vm1 = vcmp.gt.f32.partialorder %v10217_v18, 0.0  ;;  %vm5090_vm6 = vcmask 1042434  }
 0x2ac   :  { %8913 = vpow2.f32 %v893_v28  ;;  %v891_v36 = vmul.f32 1.442695, %v863_v29  ;;  %v866_v38 = vmin.f32 %v10233_v30, 0.0  ;;  %1013 = vst.msk [vmem:[#allocation2 + $0x70] sm:$0xff] %vm641_vm0, %v10236_v26  ;;  %8275 = vmatprep.mubr.msk.f32.mxu1 %vm641_vm0, %v10236_v26  ;;  %v10245_v42 = vadd.f32 %v10156_v20, %v826_v34 }
 0x2ad   :  { %v8902_v41 = vpop.eup %8901  ;;  %8276 = vmatmul.mubr.msk.f32.gmra.mxu1 %vm641_vm0, %v10224_v21  ;;  %v7518_v35 = vadd.f32 -1.0, %v8900_v32  ;;  %v10250_v43 = vsel %vm840_vm7, %v10171_v39, %v7519_v31  ;;  %vm850_vm2 = vcmp.gt.f32.partialorder %v10233_v30, 0.0  ;;  %vm5092_vm7 = vcmask 1043459  }
 0x2ae   :  { %8915 = vpow2.f32 %v891_v36  ;;  %v897_v33 = vmul.f32 1.442695, %v866_v38  ;;  %1016 = vst.msk [vmem:[#allocation2 + $0xc8] sm:$0xff] %vm641_vm0, %v10250_v43  ;;  %v7521_v37 = vadd.f32 -1.0, %v8902_v41  ;;  %v865_v20 = vmin.f32 %v10245_v42, 0.0  ;;  %v1479_v36 = vld [vmem:[#allocation2 + $0x29] sm:$0xff] }
 0x2af   :  { %v1035_v46 = vld [vmem:[#allocation2 + $0x1f] sm:$0xff]  ;;  %v10258_v47 = vsel %vm839_vm8, %v10176_v45, %v7518_v35  ;;  %v1036_v24 = vld [vmem:[#allocation2 + $0x27] sm:$0xff]  ;;  %vm849_vm3 = vcmp.gt.f32.partialorder %v10245_v42, 0.0  ;;  %vm5094_vm8 = vcmask 1044484  }
 0x2b0   :  { %v8904_v50 = vpop.eup %8903  ;;  %8917 = vpow2.f32 %v897_v33  ;;  %8240 = vmatprep.mubr.msk.f32.mxu0 %vm641_vm0, %v1035_v46  ;;  %1015 = vst.msk [vmem:[#allocation2 + $0xc0] sm:$0xff] %vm641_vm0, %v10258_v47  ;;  %8278 = vmatprep.mubr.msk.f32.mxu1 %vm641_vm0, %v10258_v47  ;;  %v10266_v39 = vsel %vm842_vm9, %v10180_v48, %v7521_v37  ;;  %v895_v54 = vmul.f32 1.442695, %v865_v20  ;;  %v1478_v34 = vld [vmem:[#allocation2 + $0x21] sm:$0xff]  ;;  %v1481_v41 = vld [vmem:[#allocation2 + $0x79] sm:$0xff]  ;;  %vm5096_vm9 = vcmask 1045509  }
 0x2b1   :  { %v8906_v44 = vpop.eup %8905  ;;  %8241 = vmatmul.mubr.msk.f32.vlgmr.msra.gmra.mxu0 %vm641_vm0, %v1036_v24  ;;  %8279 = vmatmul.mubr.msk.f32.gmra.mxu1 %vm641_vm0, %v10250_v43  ;;  %v7520_v45 = vadd.f32 -1.0, %v8904_v50  ;;  %1018 = vst.msk [vmem:[#allocation2 + $0x118] sm:$0xff] %vm641_vm0, %v10266_v39 }
 0x2b2   :  { %8297 = vmatpush3.msra.mxu0 %v10153_v19  ;;  %v7523_v40 = vadd.f32 -1.0, %v8906_v44  ;;  %8919 = vpow2.f32 %v895_v54 }
 0x2b3   :  { %v8908_v57 = vpop.eup %8907  ;;  %v1037_v48 = vld [vmem:[#allocation2 + $0x6f] sm:$0xff]  ;;  %v10277_v58 = vsel %vm841_vm10, %v10184_v52, %v7520_v45  ;;  %v1038_v53 = vld [vmem:[#allocation2 + $0x77] sm:$0xff]  ;;  %8298 = vmatprep.subr.mxu0 %v1497_v51  ;;  %vm5098_vm10 = vcmask 1046534  }
 0x2b4   :  { %8243 = vmatprep.mubr.msk.f32.mxu0 %vm641_vm0, %v1037_v48  ;;  %1017 = vst.msk [vmem:[#allocation2 + $0x110] sm:$0xff] %vm641_vm0, %v10277_v58  ;;  %8281 = vmatprep.mubr.msk.f32.mxu1 %vm641_vm0, %v10277_v58  ;;  %v7522_v19 = vadd.f32 -1.0, %v8908_v57  ;;  %v10285_v61 = vsel %vm844_vm11, %v10187_v55, %v7523_v40  ;;  %v1480_v38 = vld [vmem:[#allocation2 + $0x71] sm:$0xff]  ;;  %v1944_v57 = vld [vmem:[#allocation12 + $0x70] sm:$0xff]  ;;  %vm5100_vm11 = vcmask 1047559  }
 0x2b5   :  { %8244 = vmatmul.mubr.msk.f32.gmra.mxu0 %vm641_vm0, %v1038_v53  ;;  %8282 = vmatmul.mubr.msk.f32.gmra.mxu1 %vm641_vm0, %v10266_v39  ;;  %1020 = vst.msk [vmem:[#allocation2 + $0x168] sm:$0xff] %vm641_vm0, %v10285_v61  ;;  %v8910_v52 = vpop.eup %8909  ;;  %v1483_v35 = vld [vmem:[#allocation2 + $0xc9] sm:$0xff] }
 0x2b6   :  { %v10294_v49 = vsel %vm843_vm12, %v10192_v59, %v7522_v19  ;;  %8299 = vmatpush3.msra.mxu0 %v1497_v51  ;;  %v7525_v0 = vadd.f32 -1.0, %v8910_v52  ;;  %v1945_v40 = vld [vmem:[#allocation12 + $0x78] sm:$0xff] }
 0x2b7   :  { %v1039_v63 = vld [vmem:[#allocation2 + $0xbf] sm:$0xff]  ;;  %1019 = vst.msk [vmem:[#allocation2 + $0x160] sm:$0xff] %vm641_vm0, %v10294_v49  ;;  %8284 = vmatprep.mubr.msk.f32.mxu1 %vm641_vm0, %v10294_v49  ;;  %v1040_v55 = vld [vmem:[#allocation2 + $0xc7] sm:$0xff]  ;;  %8300 = vmatprep.subr.mxu0 %v1496_v62 }
 0x2b8   :  { %v8912_v4 = vpop.eup %8911  ;;  %8246 = vmatprep.mubr.msk.f32.mxu0 %vm641_vm0, %v1039_v63  ;;  %8301 = vmatpush3.msra.mxu0 %v1496_v62  ;;  %v10306_v6 = vsel %vm846_vm13, %v10196_v60, %v7525_v0  ;;  %v1485_v37 = vld [vmem:[#allocation2 + $0x119] sm:$0xff] }
 0x2b9   :  { %v8914_v59 = vpop.eup %8913  ;;  %8247 = vmatmul.mubr.msk.f32.gmra.mxu0 %vm641_vm0, %v1040_v55  ;;  %8285 = vmatmul.mubr.msk.f32.gmra.mxu1 %vm641_vm0, %v10285_v61  ;;  %v7524_v56 = vadd.f32 -1.0, %v8912_v4  ;;  %1022 = vst.msk [vmem:[#allocation2 + $0x1b8] sm:$0xff] %vm641_vm0, %v10306_v6 }
 0x2ba   :  { %v7527_v7 = vadd.f32 -1.0, %v8914_v59  ;;  %8302 = vmatprep.subr.mxu0 %v1495_v2  ;;  %8328 = vmatprep.subr.mxu1 %v1945_v40 }
 0x2bb   :  { %v8916_v3 = vpop.eup %8915  ;;  %v1041_v9 = vld [vmem:[#allocation2 + $0x10f] sm:$0xff]  ;;  %v10313_v11 = vsel %vm845_vm14, %v10204_v8, %v7524_v56  ;;  %v1042_v12 = vld [vmem:[#allocation2 + $0x117] sm:$0xff]  ;;  %8303 = vmatpush3.msra.mxu0 %v1495_v2  ;;  %8329 = vmatpush3.msra.mxu1 %v1945_v40 }
 0x2bc   :  { %8249 = vmatprep.mubr.msk.f32.mxu0 %vm641_vm0, %v1041_v9  ;;  %1021 = vst.msk [vmem:[#allocation2 + $0x1b0] sm:$0xff] %vm641_vm0, %v10313_v11  ;;  %8287 = vmatprep.mubr.msk.f32.mxu1 %vm641_vm0, %v10313_v11  ;;  %v7526_v60 = vadd.f32 -1.0, %v8916_v3  ;;  %v10321_v13 = vsel %vm848_vm15, %v10207_v10, %v7527_v7  ;;  %v1484_v33 = vld [vmem:[#allocation2 + $0x111] sm:$0xff]  ;;  %v1487_v46 = vld [vmem:[#allocation2 + $0x169] sm:$0xff]  ;;  %vm5620_vm15 = vcmask 64512  }
 0x2bd   :  { %v8918_v14 = vpop.eup %8917  ;;  %8250 = vmatmul.mubr.msk.f32.gmra.mxu0 %vm641_vm0, %v1042_v12  ;;  %8288 = vmatmul.mubr.msk.f32.gmra.mxu1 %vm641_vm0, %v10306_v6  ;;  %1024 = vst.msk [vmem:[#allocation2 + $0x208] sm:$0xff] %vm641_vm0, %v10321_v13 }
 0x2be   :  { %v1043_v8 = vld [vmem:[#allocation2 + $0x15f] sm:$0xff]  ;;  %v10330_v16 = vsel %vm847_vm1, %v10217_v18, %v7526_v60  ;;  %v1044_v17 = vld [vmem:[#allocation2 + $0x167] sm:$0xff]  ;;  %v7529_v22 = vadd.f32 -1.0, %v8918_v14  ;;  %8330 = vmatprep.subr.mxu1 %v1944_v57  ;;  %vm5789_vm1 = vcmask 1043456  }
 0x2bf   :  { %8252 = vmatprep.mubr.msk.f32.mxu0 %vm641_vm0, %v1043_v8  ;;  %1023 = vst.msk [vmem:[#allocation2 + $0x200] sm:$0xff] %vm641_vm0, %v10330_v16  ;;  %8290 = vmatprep.mubr.msk.f32.mxu1 %vm641_vm0, %v10330_v16  ;;  %v8920_v10 = vpop.eup %8919  ;;  %v1486_v20 = vld [vmem:[#allocation2 + $0x161] sm:$0xff]  ;;  %v10382_v8 = vld [vmem:[#allocation13] ss:$0 sm:$0xff] }
 0x2c0   :  { %v10339_v23 = vsel %vm850_vm2, %v10233_v30, %v7529_v22  ;;  %v7528_v18 = vadd.f32 -1.0, %v8920_v10  ;;  %v1489_v50 = vld [vmem:[#allocation2 + $0x1b9] sm:$0xff]  ;;  %8331 = vmatpush3.msra.mxu1 %v1944_v57  ;;  %vm5769_vm2 = vcmask 27648  }
 0x2c1   :  { %8253 = vmatmul.mubr.msk.f32.gmra.mxu0 %vm641_vm0, %v1044_v17  ;;  %8291 = vmatmul.mubr.msk.f32.gmra.mxu1 %vm641_vm0, %v10321_v13  ;;  %1026 = vst.msk [vmem:[#allocation2 + $0x258] sm:$0xff] %vm641_vm0, %v10339_v23 }
 0x2c2   :  { %v10348_v27 = vsel %vm849_vm3, %v10245_v42, %v7528_v18  ;;  %v1482_v42 = vld [vmem:[#allocation2 + $0xc1] sm:$0xff]  ;;  %vm5785_vm3 = vcmask 31744  }
 0x2c3   :  { %v1045_v25 = vld [vmem:[#allocation2 + $0x1af] sm:$0xff]  ;;  %v1046_v28 = vld [vmem:[#allocation2 + $0x1b7] sm:$0xff]  ;;  %1025 = vst.msk [vmem:[#allocation2 + $0x250] sm:$0xff] %vm641_vm0, %v10348_v27  ;;  %8293 = vmatprep.mubr.msk.f32.mxu1 %vm641_vm0, %v10348_v27 }
 0x2c4   :  { %8255 = vmatprep.mubr.msk.f32.mxu0 %vm641_vm0, %v1045_v25  ;;  %v1488_v24 = vld [vmem:[#allocation2 + $0x1b1] sm:$0xff]  ;;  %v1491_v44 = vld [vmem:[#allocation2 + $0x209] sm:$0xff] }
 0x2c5   :  { %8256 = vmatmul.mubr.msk.f32.gmra.mxu0 %vm641_vm0, %v1046_v28  ;;  %8294 = vmatmul.mubr.msk.f32.gmra.mxu1 %vm641_vm0, %v10339_v23 }
 0x2c6   :  { %v1047_v29 = vld [vmem:[#allocation2 + $0x1ff] sm:$0xff]  ;;  %v1048_v30 = vld [vmem:[#allocation2 + $0x207] sm:$0xff] }
 0x2c7   :  { %8258 = vmatprep.mubr.msk.f32.mxu0 %vm641_vm0, %v1047_v29  ;;  %v1490_v51 = vld [vmem:[#allocation2 + $0x201] sm:$0xff] }
 0x2c8   :  { %v1493_v45 = vld [vmem:[#allocation2 + $0x259] sm:$0xff] }
 0x2c9   :  { %8259 = vmatmul.mubr.msk.f32.gmra.mxu0 %vm641_vm0, %v1048_v30 }
 0x2ca   :  { %v1049_v31 = vld [vmem:[#allocation2 + $0x24f] sm:$0xff]  ;;  %v1050_v32 = vld [vmem:[#allocation2 + $0x257] sm:$0xff] }
 0x2cb   :  { %8261 = vmatprep.mubr.msk.f32.mxu0 %vm641_vm0, %v1049_v31  ;;  %v1492_v54 = vld [vmem:[#allocation2 + $0x251] sm:$0xff] }
 0x2cd   :  { %8262 = vmatmul.mubr.msk.f32.gmra.mxu0 %vm641_vm0, %v1050_v32 }
 0x2ce   :  { %8304 = vmatprep.mubr.msk.f32.mxu0 %vm641_vm0, %v1478_v34 }
 0x2d1   :  { %8305 = vmatmul.mubr.msk.f32.vlgmr.msra.gmra.mxu0 %vm641_vm0, %v1479_v36 }
 0x2d2   :  { %8307 = vmatprep.mubr.msk.f32.mxu0 %vm641_vm0, %v1480_v38 }
 0x2d5   :  { %8308 = vmatmul.mubr.msk.f32.gmra.mxu0 %vm641_vm0, %v1481_v41 }
 0x2d6   :  { %8310 = vmatprep.mubr.msk.f32.mxu0 %vm641_vm0, %v1482_v42 }
 0x2d9   :  { %8311 = vmatmul.mubr.msk.f32.gmra.mxu0 %vm641_vm0, %v1483_v35 }
 0x2da   :  { %8313 = vmatprep.mubr.msk.f32.mxu0 %vm641_vm0, %v1484_v33 }
 0x2dd   :  { %8314 = vmatmul.mubr.msk.f32.gmra.mxu0 %vm641_vm0, %v1485_v37 }
 0x2de   :  { %8316 = vmatprep.mubr.msk.f32.mxu0 %vm641_vm0, %v1486_v20 }
 0x2e1   :  { %8317 = vmatmul.mubr.msk.f32.gmra.mxu0 %vm641_vm0, %v1487_v46 }
 0x2e2   :  { %8319 = vmatprep.mubr.msk.f32.mxu0 %vm641_vm0, %v1488_v24 }
 0x2e5   :  { %8320 = vmatmul.mubr.msk.f32.gmra.mxu0 %vm641_vm0, %v1489_v50 }
 0x2e6   :  { %8322 = vmatprep.mubr.msk.f32.mxu0 %vm641_vm0, %v1490_v51 }
 0x2e9   :  { %8323 = vmatmul.mubr.msk.f32.gmra.mxu0 %vm641_vm0, %v1491_v44 }
 0x2ea   :  { %8325 = vmatprep.mubr.msk.f32.mxu0 %vm641_vm0, %v1492_v54 }
 0x2ed   :  { %8326 = vmatmul.mubr.msk.f32.gmra.mxu0 %vm641_vm0, %v1493_v45 }
 0x369   :  { %v8274_v48 = vpop.f32.mrf.mxu1 }
 0x36b   :  { %v1383_v62 = vpop.f32.mrf.mxu1 }
 0x36d   :  { %v8277_v55 = vpop.f32.mrf.mxu1 }
 0x36f   :  { %v1393_v4 = vpop.f32.mrf.mxu1 }
 0x371   :  { %v8242_v53 = vpop.f32.mrf.mxu0  ;;  %v8280_v7 = vpop.f32.mrf.mxu1 }
 0x372   :  { %v1249_v18 = vadd.f32 %v8242_v53, %v10382_v8 }
 0x373   :  { %v1169_v19 = vpop.f32.mrf.mxu0  ;;  %v1403_v12 = vpop.f32.mrf.mxu1 }
 0x374   :  { %v1248_v29 = vadd.f32 %v10382_v8, %v1169_v19  ;;  %v1463_v32 = vadd.f32 %v8274_v48, %v1249_v18 }
 0x375   :  { %v8245_v52 = vpop.f32.mrf.mxu0  ;;  %v8283_v17 = vpop.f32.mrf.mxu1 }
 0x376   :  { %v1251_v31 = vadd.f32 %v8245_v52, %v10382_v8  ;;  %v1462_v42 = vadd.f32 %v1383_v62, %v1248_v29 }
 0x377   :  { %v1179_v63 = vpop.f32.mrf.mxu0  ;;  %v1413_v25 = vpop.f32.mrf.mxu1 }
 0x378   :  { %v1250_v38 = vadd.f32 %v10382_v8, %v1179_v63  ;;  %v1465_v46 = vadd.f32 %v8277_v55, %v1251_v31 }
 0x379   :  { %v8248_v0 = vpop.f32.mrf.mxu0  ;;  %v8286_v34 = vpop.f32.mrf.mxu1 }
 0x37a   :  { %v1253_v35 = vadd.f32 %v8248_v0, %v10382_v8  ;;  %v1464_v40 = vadd.f32 %v1393_v4, %v1250_v38 }
 0x37b   :  { %v1189_v2 = vpop.f32.mrf.mxu0  ;;  %v1423_v50 = vpop.f32.mrf.mxu1 }
 0x37c   :  { %v1252_v24 = vadd.f32 %v10382_v8, %v1189_v2  ;;  %v1467_v53 = vadd.f32 %v8280_v7, %v1253_v35 }
 0x37d   :  { %v8251_v59 = vpop.f32.mrf.mxu0  ;;  %v8289_v63 = vpop.f32.mrf.mxu1 }
 0x37e   :  { %v1255_v57 = vadd.f32 %v8251_v59, %v10382_v8  ;;  %v1466_v2 = vadd.f32 %v1403_v12, %v1252_v24 }
 0x37f   :  { %v1199_v56 = vpop.f32.mrf.mxu0 }
 0x380   :  { %v1254_v55 = vadd.f32 %v10382_v8, %v1199_v56  ;;  %v1469_v31 = vadd.f32 %v8283_v17, %v1255_v57 }
 0x381   :  { %v8254_v3 = vpop.f32.mrf.mxu0 }
 0x382   :  { %v1257_v59 = vadd.f32 %v8254_v3, %v10382_v8  ;;  %v1468_v35 = vadd.f32 %v1413_v25, %v1254_v55 }
 0x383   :  { %v1209_v9 = vpop.f32.mrf.mxu0 }
 0x384   :  { %v1256_v56 = vadd.f32 %v10382_v8, %v1209_v9  ;;  %v1471_v24 = vadd.f32 %v8286_v34, %v1257_v59 }
 0x385   :  { %v10378_v60 = vpop.f32.mrf.mxu0 }
 0x386   :  { %v1259_v9 = vadd.f32 %v10378_v60, %v10382_v8  ;;  %v1470_v57 = vadd.f32 %v1423_v50, %v1256_v56 }
 0x387   :  { %v10380_v14 = vpop.f32.mrf.mxu0 }
 0x388   :  { %v1258_v25 = vadd.f32 %v10382_v8, %v10380_v14  ;;  %v1473_v14 = vadd.f32 %v8289_v63, %v1259_v9 }
 0x389   :  { %v10384_v22 = vpop.f32.mrf.mxu0 }
 0x38b   :  { %v10386_v10 = vpop.f32.mrf.mxu0 }
 0x38d   :  { %v10389_v28 = vpop.f32.mrf.mxu0 }
 0x38f   :  { %v10392_v30 = vpop.f32.mrf.mxu0 }
 0x391   :  { %v8306_v36 = vpop.f32.mrf.mxu0 }
 0x392   :  { %v10396_v41 = vadd.f32 %v8306_v36, %v1463_v32 }
 0x393   :  { %v1613_v33 = vpop.f32.mrf.mxu0 }
 0x394   :  { %v1709_v37 = vsub.f32 0.0, %v10396_v41  ;;  %v10400_v20 = vadd.f32 %v1613_v33, %v1462_v42  ;;  %v1433_v42 = vpop.f32.mrf.mxu1 }
 0x395   :  { %v8309_v51 = vpop.f32.mrf.mxu0 }
 0x396   :  { %v1726_v44 = vmul.f32 1.442695, %v1709_v37  ;;  %v1708_v54 = vsub.f32 0.0, %v10400_v20  ;;  %v10404_v45 = vadd.f32 %v8309_v51, %v1465_v46 }
 0x397   :  { %v1623_v48 = vpop.f32.mrf.mxu0 }
 0x398   :  { %8921 = vpow2.f32 %v1726_v44  ;;  %v1724_v19 = vmul.f32 1.442695, %v1708_v54  ;;  %v1711_v62 = vsub.f32 0.0, %v10404_v45  ;;  %v10408_v52 = vadd.f32 %v1623_v48, %v1464_v40  ;;  %v8292_v54 = vpop.f32.mrf.mxu1 }
 0x399   :  { %v8312_v0 = vpop.f32.mrf.mxu0 }
 0x39a   :  { %8923 = vpow2.f32 %v1724_v19  ;;  %v1730_v18 = vmul.f32 1.442695, %v1711_v62  ;;  %v1710_v29 = vsub.f32 0.0, %v10408_v52  ;;  %v10412_v4 = vadd.f32 %v8312_v0, %v1467_v53 }
 0x39b   :  { %v1633_v7 = vpop.f32.mrf.mxu0  ;;  %v1261_v19 = vadd.f32 %v10384_v22, %v10382_v8  ;;  %v1260_v22 = vadd.f32 %v10382_v8, %v10386_v10 }
 0x39c   :  { %8925 = vpow2.f32 %v1730_v18  ;;  %v1728_v32 = vmul.f32 1.442695, %v1710_v29  ;;  %v1713_v36 = vsub.f32 0.0, %v10412_v4  ;;  %v10416_v38 = vadd.f32 %v1633_v7, %v1466_v2  ;;  %v1443_v18 = vpop.f32.mrf.mxu1 }
 0x39d   :  { %v8315_v12 = vpop.f32.mrf.mxu0  ;;  %v1472_v29 = vadd.f32 %v1433_v42, %v1258_v25 }
 0x39e   :  { %8927 = vpow2.f32 %v1728_v32  ;;  %v1734_v33 = vmul.f32 1.442695, %v1713_v36  ;;  %v1712_v37 = vsub.f32 0.0, %v10416_v38  ;;  %v10420_v46 = vadd.f32 %v8315_v12, %v1469_v31 }
 0x39f   :  { %v1643_v3 = vpop.f32.mrf.mxu0  ;;  %v1263_v36 = vadd.f32 %v10389_v28, %v10382_v8 }
 0x3a0   :  { %8929 = vpow2.f32 %v1734_v33  ;;  %v1732_v17 = vmul.f32 1.442695, %v1712_v37  ;;  %v1715_v51 = vsub.f32 0.0, %v10420_v46  ;;  %v10423_v44 = vadd.f32 %v1643_v3, %v1468_v35  ;;  %v8295_v3 = vpop.f32.mrf.mxu1 }
 0x3a1   :  { %v8318_v40 = vpop.f32.mrf.mxu0  ;;  %v1475_v35 = vadd.f32 %v8292_v54, %v1261_v19 }
 0x3a2   :  { %8931 = vpow2.f32 %v1732_v17  ;;  %v1738_v48 = vmul.f32 1.442695, %v1715_v51  ;;  %v1714_v53 = vsub.f32 0.0, %v10423_v44  ;;  %v10430_v34 = vadd.f32 %v8318_v40, %v1471_v24 }
 0x3a3   :  { %v1653_v62 = vpop.f32.mrf.mxu0  ;;  %v1262_v24 = vadd.f32 %v10382_v8, %v10392_v30  ;;  %v1474_v40 = vadd.f32 %v1443_v18, %v1260_v22 }
 0x3a4   :  { %v1736_v55 = vmul.f32 1.442695, %v1714_v53  ;;  %v1717_v0 = vsub.f32 0.0, %v10430_v34  ;;  %v10435_v2 = vadd.f32 %v1653_v62, %v1470_v57  ;;  %8933 = vpow2.f32 %v1738_v48  ;;  %v1453_v62 = vpop.f32.mrf.mxu1 }
 0x3a5   :  { %v8922_v60 = vpop.eup %8921  ;;  %v8321_v50 = vpop.f32.mrf.mxu0  ;;  %v1477_v48 = vadd.f32 %v8295_v3, %v1263_v36 }
 0x3a6   :  { %v1757_v59 = vadd.f32 1.0, %v8922_v60  ;;  %8935 = vpow2.f32 %v1736_v55  ;;  %v1742_v7 = vmul.f32 1.442695, %v1717_v0  ;;  %v1716_v31 = vsub.f32 0.0, %v10435_v2  ;;  %v2159_v60 = vld [vmem:[#allocation12 + $0x98] sm:$0xff] }
 0x3a7   :  { %v8924_v32 = vpop.eup %8923  ;;  %v10442_v56 = vadd.f32 %v8321_v50, %v1473_v14  ;;  %v1663_v12 = vpop.f32.mrf.mxu0  ;;  %8360 = vmatprep.subr.mxu0 %v2159_v60 }
 0x3a8   :  { %8937 = vrcp.f32 %v1757_v59  ;;  %v1756_v63 = vadd.f32 1.0, %v8924_v32  ;;  %v1740_v33 = vmul.f32 1.442695, %v1716_v31  ;;  %v10444_v42 = vadd.f32 %v1663_v12, %v1472_v29  ;;  %8361 = vmatpush3.msra.mxu0 %v2159_v60  ;;  %v2158_v31 = vld [vmem:[#allocation12 + $0x90] sm:$0xff] }
 0x3a9   :  { %v8926_v37 = vpop.eup %8925  ;;  %8939 = vpow2.f32 %v1742_v7  ;;  %v1719_v10 = vsub.f32 0.0, %v10442_v56  ;;  %v8324_v17 = vpop.f32.mrf.mxu0  ;;  %v1476_v29 = vadd.f32 %v1453_v62, %v1262_v24  ;;  %8362 = vmatprep.subr.mxu0 %v2158_v31 }
 0x3aa   :  { %8941 = vrcp.f32 %v1756_v63  ;;  %v1759_v28 = vadd.f32 1.0, %v8926_v37  ;;  %v1718_v51 = vsub.f32 0.0, %v10444_v42  ;;  %v10450_v9 = vadd.f32 %v8324_v17, %v1475_v35  ;;  %v1943_v63 = vld [vmem:[#allocation12 + $0x68] sm:$0xff]  ;;  %8363 = vmatpush3.msra.mxu0 %v2158_v31  ;;  %v2156_v17 = vld [vmem:[#allocation12 + $0x80] sm:$0xff] }
 0x3ab   :  { %v8928_v54 = vpop.eup %8927  ;;  %8943 = vpow2.f32 %v1740_v33  ;;  %v1746_v25 = vmul.f32 1.442695, %v1719_v10  ;;  %v1673_v57 = vpop.f32.mrf.mxu0  ;;  %v2157_v33 = vld [vmem:[#allocation12 + $0x88] sm:$0xff]  ;;  %8332 = vmatprep.subr.mxu1 %v1943_v63 }
 0x3ac   :  { %8945 = vrcp.f32 %v1759_v28  ;;  %v1758_v53 = vadd.f32 1.0, %v8928_v54  ;;  %v1744_v19 = vmul.f32 1.442695, %v1718_v51  ;;  %v1721_v8 = vsub.f32 0.0, %v10450_v9  ;;  %8364 = vmatprep.subr.mxu0 %v2157_v33  ;;  %8333 = vmatpush3.msra.mxu1 %v1943_v63 }
 0x3ad   :  { %v8930_v30 = vpop.eup %8929  ;;  %8947 = vpow2.f32 %v1746_v25  ;;  %v10453_v55 = vadd.f32 %v1673_v57, %v1474_v40  ;;  %v8327_v0 = vpop.f32.mrf.mxu0  ;;  %8365 = vmatpush3.msra.mxu0 %v2157_v33 }
 0x3ae   :  { %8949 = vrcp.f32 %v1758_v53  ;;  %v1750_v14 = vmul.f32 1.442695, %v1721_v8  ;;  %v10455_v50 = vadd.f32 %v8327_v0, %v1477_v48  ;;  %v1761_v32 = vadd.f32 1.0, %v8930_v30  ;;  %8366 = vmatprep.subr.mxu0 %v2156_v17  ;;  %v1942_v8 = vld [vmem:[#allocation12 + $0x60] sm:$0xff] }
 0x3af   :  { %v8932_v18 = vpop.eup %8931  ;;  %8951 = vpow2.f32 %v1744_v19  ;;  %v1720_v59 = vsub.f32 0.0, %v10453_v55  ;;  %v1683_v7 = vpop.f32.mrf.mxu0  ;;  %8367 = vmatpush3.msra.mxu0 %v2156_v17  ;;  %8334 = vmatprep.subr.mxu1 %v1942_v8 }
 0x3b0   :  { %v1760_v22 = vadd.f32 1.0, %v8932_v18  ;;  %v1723_v36 = vsub.f32 0.0, %v10455_v50  ;;  %v10459_v12 = vadd.f32 %v1683_v7, %v1476_v29  ;;  %8953 = vpow2.f32 %v1750_v14  ;;  %8335 = vmatpush3.msra.mxu1 %v1942_v8 }
 0x3b1   :  { %v1748_v35 = vmul.f32 1.442695, %v1720_v59  ;;  %v8934_v37 = vpop.eup %8933 }
 0x3b2   :  { %8955 = vrcp.f32 %v1760_v22  ;;  %v1754_v3 = vmul.f32 1.442695, %v1723_v36  ;;  %v1722_v24 = vsub.f32 0.0, %v10459_v12  ;;  %v1763_v40 = vadd.f32 1.0, %v8934_v37 }
 0x3b3   :  { %v8936_v10 = vpop.eup %8935  ;;  %8957 = vpow2.f32 %v1748_v35  ;;  %v10467_v35 = vld [vmem:[#allocation12 + $0xb8] sm:$0xff] }
 0x3b4   :  { %8959 = vrcp.f32 %v1761_v32  ;;  %v1762_v28 = vadd.f32 1.0, %v8936_v10  ;;  %v1752_v51 = vmul.f32 1.442695, %v1722_v24  ;;  %8392 = vmatprep.subr.mxu1 %v10467_v35 }
 0x3b5   :  { %v8938_v54 = vpop.eup %8937  ;;  %8961 = vpow2.f32 %v1754_v3 }
 0x3b6   :  { %v8940_v25 = vpop.eup %8939  ;;  %8963 = vrcp.f32 %v1762_v28 }
 0x3b7   :  { %v8942_v57 = vpop.eup %8941  ;;  %8965 = vpow2.f32 %v1752_v51  ;;  %v1765_v62 = vadd.f32 1.0, %v8940_v25 }
 0x3b8   :  { %v8944_v48 = vpop.eup %8943  ;;  %1804 = vrot.lane.b32.xlu0 %v8942_v57, %s9702_s14  ;;  %8967 = vrcp.f32 %v1763_v40 }
 0x3b9   :  { %v8946_v53 = vpop.eup %8945  ;;  %v1764_v19 = vadd.f32 1.0, %v8944_v48 }
 0x3ba   :  { %v8948_v30 = vpop.eup %8947 }
 0x3bb   :  { %v8950_v0 = vpop.eup %8949  ;;  %8969 = vrcp.f32 %v1764_v19  ;;  %v1767_v18 = vadd.f32 1.0, %v8948_v30 }
 0x3bc   :  { %v8952_v60 = vpop.eup %8951  ;;  %1806 = vrot.lane.b32.xlu0 %v8938_v54, %s9702_s14  ;;  %1808 = vrot.lane.b32.xlu1 %v8950_v0, %s9702_s14  ;;  %8971 = vrcp.f32 %v1765_v62 }
 0x3bd   :  { %v1766_v14 = vadd.f32 1.0, %v8952_v60  ;;  %v8954_v29 = vpop.eup %8953 }
 0x3be   :  { %v1769_v36 = vadd.f32 1.0, %v8954_v29 }
 0x3bf   :  { %v8956_v59 = vpop.eup %8955  ;;  %8973 = vrcp.f32 %v1766_v14 }
 0x3c0   :  { %v8958_v7 = vpop.eup %8957  ;;  %1810 = vrot.lane.b32.xlu1 %v8946_v53, %s9702_s14  ;;  %1812 = vrot.lane.b32.xlu0 %v8956_v59, %s9702_s14  ;;  %8975 = vrcp.f32 %v1767_v18 }
 0x3c1   :  { %v8960_v31 = vpop.eup %8959  ;;  %v1768_v32 = vadd.f32 1.0, %v8958_v7 }
 0x3c2   :  { %v8962_v22 = vpop.eup %8961 }
 0x3c3   :  { %v8964_v63 = vpop.eup %8963  ;;  %8977 = vrcp.f32 %v1768_v32  ;;  %v1771_v3 = vadd.f32 1.0, %v8962_v22 }
 0x3c4   :  { %v8966_v33 = vpop.eup %8965  ;;  %1814 = vrot.lane.b32.xlu1 %v8960_v31, %s9702_s14  ;;  %1816 = vrot.lane.b32.xlu0 %v8964_v63, %s9702_s14  ;;  %8979 = vrcp.f32 %v1769_v36 }
 0x3c5   :  { %v1770_v37 = vadd.f32 1.0, %v8966_v33  ;;  %v8968_v24 = vpop.eup %8967 }
 0x3c7   :  { %8981 = vrcp.f32 %v1770_v37 }
 0x3c8   :  { %v8970_v10 = vpop.eup %8969  ;;  %1818 = vrot.lane.b32.xlu1 %v8968_v24, %s9702_s14  ;;  %8983 = vrcp.f32 %v1771_v3  ;;  %v2388_v24 = vld [vmem:[#allocation12 + $0xb0] sm:$0xff] }
 0x3c9   :  { %1820 = vrot.lane.b32.xlu0 %v8970_v10, %s9702_s14  ;;  %v8972_v17 = vpop.eup %8971 }
 0x3cc   :  { %v8974_v28 = vpop.eup %8973  ;;  %1822 = vrot.lane.b32.xlu1 %v8972_v17, %s9702_s14 }
 0x3cd   :  { %1824 = vrot.lane.b32.xlu0 %v8974_v28, %s9702_s14  ;;  %v8976_v51 = vpop.eup %8975 }
 0x3d0   :  { %v8978_v54 = vpop.eup %8977  ;;  %1826 = vrot.lane.b32.xlu1 %v8976_v51, %s9702_s14 }
 0x3d1   :  { %1828 = vrot.lane.b32.xlu0 %v8978_v54, %s9702_s14  ;;  %v8980_v25 = vpop.eup %8979 }
 0x3d4   :  { %v8982_v40 = vpop.eup %8981  ;;  %1830 = vrot.lane.b32.xlu1 %v8980_v25, %s9702_s14 }
 0x3d5   :  { %1832 = vrot.lane.b32.xlu0 %v8982_v40, %s9702_s14  ;;  %v8984_v57 = vpop.eup %8983 }
 0x3d8   :  { %1834 = vrot.lane.b32.xlu1 %v8984_v57, %s9702_s14 }
 0x42a   :  { %v1805_v48 = vpop.permute.xlu0 %1804 }
 0x42b   :  { %v1852_v53 = vmul.f32 %v1805_v48, %v10400_v20 }
 0x42d   :  { %v1868_v19 = vadd.f32 %v1852_v53, %v10213_v15 }
 0x42e   :  { %v1807_v8 = vpop.permute.xlu0 %1806  ;;  %v1809_v30 = vpop.permute.xlu1 %1808 }
 0x42f   :  { %v10483_v62 = vmul.f32 0.70710677, %v1868_v19  ;;  %v1853_v0 = vmul.f32 %v1807_v8, %v10396_v41  ;;  %v1854_v60 = vmul.f32 %v1809_v30, %v10408_v52 }
 0x431   :  { %1900 = vst.msk [vmem:[#allocation2 + $0x20] sm:$0xff] %vm641_vm0, %v10483_v62  ;;  %v1869_v14 = vadd.f32 %v1853_v0, %v10198_v5  ;;  %v1870_v29 = vadd.f32 %v1854_v60, %v10236_v26  ;;  %8368 = vmatprep.mubr.msk.f32.mxu0 %vm641_vm0, %v10483_v62 }
 0x432   :  { %v1811_v20 = vpop.permute.xlu1 %1810  ;;  %v1813_v15 = vpop.permute.xlu0 %1812 }
 0x433   :  { %v10493_v18 = vmul.f32 0.70710677, %v1869_v14  ;;  %v10495_v59 = vmul.f32 0.70710677, %v1870_v29  ;;  %v1855_v41 = vmul.f32 %v1811_v20, %v10404_v45  ;;  %v1856_v52 = vmul.f32 %v1813_v15, %v10416_v38 }
 0x435   :  { %1901 = vst.msk [vmem:[#allocation2 + $0x28] sm:$0xff] %vm641_vm0, %v10493_v18  ;;  %1902 = vst.msk [vmem:[#allocation2 + $0x70] sm:$0xff] %vm641_vm0, %v10495_v59  ;;  %v1871_v5 = vadd.f32 %v1855_v41, %v10224_v21  ;;  %v1872_v26 = vadd.f32 %v1856_v52, %v10258_v47  ;;  %8369 = vmatmul.mubr.msk.f32.vlgmr.msra.gmra.mxu0 %vm641_vm0, %v10493_v18 }
 0x436   :  { %8371 = vmatprep.mubr.msk.f32.mxu0 %vm641_vm0, %v10495_v59  ;;  %v1815_v7 = vpop.permute.xlu1 %1814  ;;  %v1817_v45 = vpop.permute.xlu0 %1816 }
 0x437   :  { %v10509_v31 = vmul.f32 0.70710677, %v1871_v5  ;;  %v10511_v38 = vmul.f32 0.70710677, %v1872_v26  ;;  %v1857_v32 = vmul.f32 %v1815_v7, %v10412_v4  ;;  %v1858_v22 = vmul.f32 %v1817_v45, %v10423_v44 }
 0x438   :  { %v1925_v36 = vld [vmem:[#allocation2 + $0x1d] sm:$0xff] }
 0x439   :  { %1903 = vst.msk [vmem:[#allocation2 + $0x78] sm:$0xff] %vm641_vm0, %v10509_v31  ;;  %1904 = vst.msk [vmem:[#allocation2 + $0xc0] sm:$0xff] %vm641_vm0, %v10511_v38  ;;  %v1873_v21 = vadd.f32 %v1857_v32, %v10250_v43  ;;  %v1874_v47 = vadd.f32 %v1858_v22, %v10277_v58  ;;  %8336 = vmatprep.mubr.msk.f32.mxu1 %vm641_vm0, %v1925_v36  ;;  %8372 = vmatmul.mubr.msk.f32.gmra.mxu0 %vm641_vm0, %v10509_v31 }
 0x43a   :  { %8374 = vmatprep.mubr.msk.f32.mxu0 %vm641_vm0, %v10511_v38  ;;  %v1819_v4 = vpop.permute.xlu1 %1818 }
 0x43b   :  { %v10526_v44 = vmul.f32 0.70710677, %v1873_v21  ;;  %v10528_v63 = vmul.f32 0.70710677, %v1874_v47  ;;  %v1859_v33 = vmul.f32 %v1819_v4, %v10420_v46  ;;  %v1821_v37 = vpop.permute.xlu0 %1820 }
 0x43c   :  { %v1860_v43 = vmul.f32 %v1821_v37, %v10435_v2  ;;  %v1926_v3 = vld [vmem:[#allocation2 + $0x25] sm:$0xff]  ;;  %v1927_v58 = vld [vmem:[#allocation2 + $0x6d] sm:$0xff] }
 0x43d   :  { %1905 = vst.msk [vmem:[#allocation2 + $0xc8] sm:$0xff] %vm641_vm0, %v10526_v44  ;;  %1906 = vst.msk [vmem:[#allocation2 + $0x110] sm:$0xff] %vm641_vm0, %v10528_v63  ;;  %v1875_v10 = vadd.f32 %v1859_v33, %v10266_v39  ;;  %8337 = vmatmul.mubr.msk.f32.vlgmr.msra.gmra.mxu1 %vm641_vm0, %v1926_v3  ;;  %8375 = vmatmul.mubr.msk.f32.gmra.mxu0 %vm641_vm0, %v10526_v44  ;;  %v2369_v21 = vld [vmem:[#allocation2 + $0x23] sm:$0xff]  ;;  %v2370_v47 = vld [vmem:[#allocation2 + $0x2b] sm:$0xff] }
 0x43e   :  { %v1876_v46 = vadd.f32 %v1860_v43, %v10294_v49  ;;  %8393 = vmatpush3.msra.mxu1 %v10467_v35  ;;  %8339 = vmatprep.mubr.msk.f32.mxu1 %vm641_vm0, %v1927_v58  ;;  %v1823_v2 = vpop.permute.xlu1 %1822  ;;  %v2387_v35 = vld [vmem:[#allocation12 + $0xa8] sm:$0xff] }
 0x43f   :  { %v10543_v17 = vmul.f32 0.70710677, %v1875_v10  ;;  %8377 = vmatprep.mubr.msk.f32.mxu0 %vm641_vm0, %v10528_v63  ;;  %v1861_v28 = vmul.f32 %v1823_v2, %v10430_v34  ;;  %v1825_v39 = vpop.permute.xlu0 %1824  ;;  %8394 = vmatprep.subr.mxu1 %v2388_v24 }
 0x440   :  { %v10548_v51 = vmul.f32 0.70710677, %v1876_v46  ;;  %v1862_v54 = vmul.f32 %v1825_v39, %v10444_v42  ;;  %v1928_v25 = vld [vmem:[#allocation2 + $0x75] sm:$0xff]  ;;  %v1929_v49 = vld [vmem:[#allocation2 + $0xbd] sm:$0xff]  ;;  %8395 = vmatpush3.msra.mxu1 %v2388_v24 }
 0x441   :  { %1907 = vst.msk [vmem:[#allocation2 + $0x118] sm:$0xff] %vm641_vm0, %v10543_v17  ;;  %v1877_v40 = vadd.f32 %v1861_v28, %v10285_v61  ;;  %8340 = vmatmul.mubr.msk.f32.gmra.mxu1 %vm641_vm0, %v1928_v25  ;;  %8378 = vmatmul.mubr.msk.f32.gmra.mxu0 %vm641_vm0, %v10543_v17  ;;  %v2371_v4 = vld [vmem:[#allocation2 + $0x73] sm:$0xff]  ;;  %v2372_v33 = vld [vmem:[#allocation2 + $0x7b] sm:$0xff] }
 0x442   :  { %1908 = vst.msk [vmem:[#allocation2 + $0x160] sm:$0xff] %vm641_vm0, %v10548_v51  ;;  %v1878_v34 = vadd.f32 %v1862_v54, %v10313_v11  ;;  %8342 = vmatprep.mubr.msk.f32.mxu1 %vm641_vm0, %v1929_v49  ;;  %8380 = vmatprep.mubr.msk.f32.mxu0 %vm641_vm0, %v10548_v51  ;;  %v1827_v42 = vpop.permute.xlu1 %1826  ;;  %v2386_v11 = vld [vmem:[#allocation12 + $0xa0] sm:$0xff]  ;;  %v2836_v49 = vld [vmem:[#allocation12 + $0xd8] sm:$0xff] }
 0x443   :  { %v10563_v57 = vmul.f32 0.70710677, %v1877_v40  ;;  %v1863_v61 = vmul.f32 %v1827_v42, %v10442_v56  ;;  %v1829_v48 = vpop.permute.xlu0 %1828  ;;  %8396 = vmatprep.subr.mxu1 %v2387_v35  ;;  %8424 = vmatprep.subr.mxu0 %v2836_v49  ;;  %v2834_v40 = vld [vmem:[#allocation12 + $0xc8] sm:$0xff] }
 0x444   :  { %v10566_v53 = vmul.f32 0.70710677, %v1878_v34  ;;  %v1864_v19 = vmul.f32 %v1829_v48, %v10453_v55  ;;  %v1930_v8 = vld [vmem:[#allocation2 + $0xc5] sm:$0xff]  ;;  %v1931_v30 = vld [vmem:[#allocation2 + $0x10d] sm:$0xff]  ;;  %8397 = vmatpush3.msra.mxu1 %v2387_v35  ;;  %8425 = vmatpush3.msra.mxu0 %v2836_v49 }
 0x445   :  { %1909 = vst.msk [vmem:[#allocation2 + $0x168] sm:$0xff] %vm641_vm0, %v10563_v57  ;;  %v1879_v0 = vadd.f32 %v1863_v61, %v10306_v6  ;;  %8343 = vmatmul.mubr.msk.f32.gmra.mxu1 %vm641_vm0, %v1930_v8  ;;  %8381 = vmatmul.mubr.msk.f32.gmra.mxu0 %vm641_vm0, %v10563_v57  ;;  %v2373_v37 = vld [vmem:[#allocation2 + $0xc3] sm:$0xff]  ;;  %v2374_v43 = vld [vmem:[#allocation2 + $0xcb] sm:$0xff] }
 0x446   :  { %1910 = vst.msk [vmem:[#allocation2 + $0x1b0] sm:$0xff] %vm641_vm0, %v10566_v53  ;;  %v1880_v56 = vadd.f32 %v1864_v19, %v10330_v16  ;;  %8345 = vmatprep.mubr.msk.f32.mxu1 %vm641_vm0, %v1931_v30  ;;  %8383 = vmatprep.mubr.msk.f32.mxu0 %vm641_vm0, %v10566_v53  ;;  %v1831_v55 = vpop.permute.xlu1 %1830  ;;  %v2835_v35 = vld [vmem:[#allocation12 + $0xd0] sm:$0xff] }
 0x447   :  { %v10581_v60 = vmul.f32 0.70710677, %v1879_v0  ;;  %v1865_v6 = vmul.f32 %v1831_v55, %v10450_v9  ;;  %v1833_v14 = vpop.permute.xlu0 %1832  ;;  %8398 = vmatprep.subr.mxu1 %v2386_v11  ;;  %8426 = vmatprep.subr.mxu0 %v2835_v35 }
 0x448   :  { %v10584_v29 = vmul.f32 0.70710677, %v1880_v56  ;;  %v1866_v20 = vmul.f32 %v1833_v14, %v10459_v12  ;;  %v1932_v15 = vld [vmem:[#allocation2 + $0x115] sm:$0xff]  ;;  %8399 = vmatpush3.msra.mxu1 %v2386_v11  ;;  %8427 = vmatpush3.msra.mxu0 %v2835_v35 }
 0x449   :  { %1911 = vst.msk [vmem:[#allocation2 + $0x1b8] sm:$0xff] %vm641_vm0, %v10581_v60  ;;  %v1881_v16 = vadd.f32 %v1865_v6, %v10321_v13  ;;  %8346 = vmatmul.mubr.msk.f32.gmra.mxu1 %vm641_vm0, %v1932_v15  ;;  %8384 = vmatmul.mubr.msk.f32.gmra.mxu0 %vm641_vm0, %v10581_v60  ;;  %v1933_v41 = vld [vmem:[#allocation2 + $0x15d] sm:$0xff]  ;;  %v2375_v3 = vld [vmem:[#allocation2 + $0x113] sm:$0xff] }
 0x44a   :  { %1912 = vst.msk [vmem:[#allocation2 + $0x200] sm:$0xff] %vm641_vm0, %v10584_v29  ;;  %v1882_v9 = vadd.f32 %v1866_v20, %v10348_v27  ;;  %8348 = vmatprep.mubr.msk.f32.mxu1 %vm641_vm0, %v1933_v41  ;;  %8386 = vmatprep.mubr.msk.f32.mxu0 %vm641_vm0, %v10584_v29  ;;  %v1835_v12 = vpop.permute.xlu1 %1834  ;;  %v2376_v58 = vld [vmem:[#allocation2 + $0x11b] sm:$0xff] }
 0x44b   :  { %v10599_v52 = vmul.f32 0.70710677, %v1881_v16  ;;  %v1867_v13 = vmul.f32 %v1835_v12, %v10455_v50  ;;  %8428 = vmatprep.subr.mxu0 %v2834_v40 }
 0x44c   :  { %v10602_v5 = vmul.f32 0.70710677, %v1882_v9  ;;  %v1934_v26 = vld [vmem:[#allocation2 + $0x165] sm:$0xff]  ;;  %8429 = vmatpush3.msra.mxu0 %v2834_v40 }
 0x44d   :  { %1913 = vst.msk [vmem:[#allocation2 + $0x208] sm:$0xff] %vm641_vm0, %v10599_v52  ;;  %v1883_v7 = vadd.f32 %v1867_v13, %v10339_v23  ;;  %8349 = vmatmul.mubr.msk.f32.gmra.mxu1 %vm641_vm0, %v1934_v26  ;;  %8387 = vmatmul.mubr.msk.f32.gmra.mxu0 %vm641_vm0, %v10599_v52  ;;  %v1935_v27 = vld [vmem:[#allocation2 + $0x1ad] sm:$0xff]  ;;  %v2377_v24 = vld [vmem:[#allocation2 + $0x163] sm:$0xff] }
 0x44e   :  { %1914 = vst.msk [vmem:[#allocation2 + $0x250] sm:$0xff] %vm641_vm0, %v10602_v5  ;;  %8351 = vmatprep.mubr.msk.f32.mxu1 %vm641_vm0, %v1935_v27  ;;  %8389 = vmatprep.mubr.msk.f32.mxu0 %vm641_vm0, %v10602_v5  ;;  %v2378_v10 = vld [vmem:[#allocation2 + $0x16b] sm:$0xff] }
 0x44f   :  { %v10615_v50 = vmul.f32 0.70710677, %v1883_v7  ;;  %v10654_v7 = vld [vmem:[#allocation13 + $0x1] ss:$0 sm:$0xff] }
 0x450   :  { %v1936_v45 = vld [vmem:[#allocation2 + $0x1b5] sm:$0xff] }
 0x451   :  { %1915 = vst.msk [vmem:[#allocation2 + $0x258] sm:$0xff] %vm641_vm0, %v10615_v50  ;;  %8352 = vmatmul.mubr.msk.f32.gmra.mxu1 %vm641_vm0, %v1936_v45  ;;  %8390 = vmatmul.mubr.msk.f32.gmra.mxu0 %vm641_vm0, %v10615_v50  ;;  %v1937_v23 = vld [vmem:[#allocation2 + $0x1fd] sm:$0xff]  ;;  %v2379_v46 = vld [vmem:[#allocation2 + $0x1b3] sm:$0xff] }
 0x452   :  { %8354 = vmatprep.mubr.msk.f32.mxu1 %vm641_vm0, %v1937_v23  ;;  %v2380_v2 = vld [vmem:[#allocation2 + $0x1bb] sm:$0xff] }
 0x454   :  { %v1938_v32 = vld [vmem:[#allocation2 + $0x205] sm:$0xff] }
 0x455   :  { %8355 = vmatmul.mubr.msk.f32.gmra.mxu1 %vm641_vm0, %v1938_v32  ;;  %v1939_v22 = vld [vmem:[#allocation2 + $0x24d] sm:$0xff]  ;;  %v2381_v28 = vld [vmem:[#allocation2 + $0x203] sm:$0xff] }
 0x456   :  { %8357 = vmatprep.mubr.msk.f32.mxu1 %vm641_vm0, %v1939_v22  ;;  %v2382_v39 = vld [vmem:[#allocation2 + $0x20b] sm:$0xff] }
 0x458   :  { %v1940_v36 = vld [vmem:[#allocation2 + $0x255] sm:$0xff] }
 0x459   :  { %8358 = vmatmul.mubr.msk.f32.gmra.mxu1 %vm641_vm0, %v1940_v36  ;;  %v2383_v54 = vld [vmem:[#allocation2 + $0x253] sm:$0xff]  ;;  %v2384_v25 = vld [vmem:[#allocation2 + $0x25b] sm:$0xff] }
 0x45a   :  { %8400 = vmatprep.mubr.msk.f32.mxu1 %vm641_vm0, %v2369_v21 }
 0x45d   :  { %8401 = vmatmul.mubr.msk.f32.vlgmr.msra.gmra.mxu1 %vm641_vm0, %v2370_v47 }
 0x45e   :  { %8403 = vmatprep.mubr.msk.f32.mxu1 %vm641_vm0, %v2371_v4 }
 0x461   :  { %8404 = vmatmul.mubr.msk.f32.gmra.mxu1 %vm641_vm0, %v2372_v33 }
 0x462   :  { %8406 = vmatprep.mubr.msk.f32.mxu1 %vm641_vm0, %v2373_v37 }
 0x465   :  { %8407 = vmatmul.mubr.msk.f32.gmra.mxu1 %vm641_vm0, %v2374_v43 }
 0x466   :  { %8409 = vmatprep.mubr.msk.f32.mxu1 %vm641_vm0, %v2375_v3 }
 0x469   :  { %8410 = vmatmul.mubr.msk.f32.gmra.mxu1 %vm641_vm0, %v2376_v58 }
 0x46a   :  { %8412 = vmatprep.mubr.msk.f32.mxu1 %vm641_vm0, %v2377_v24 }
 0x46d   :  { %8413 = vmatmul.mubr.msk.f32.gmra.mxu1 %vm641_vm0, %v2378_v10 }
 0x46e   :  { %8415 = vmatprep.mubr.msk.f32.mxu1 %vm641_vm0, %v2379_v46 }
 0x471   :  { %8416 = vmatmul.mubr.msk.f32.gmra.mxu1 %vm641_vm0, %v2380_v2 }
 0x472   :  { %8418 = vmatprep.mubr.msk.f32.mxu1 %vm641_vm0, %v2381_v28 }
 0x475   :  { %8419 = vmatmul.mubr.msk.f32.gmra.mxu1 %vm641_vm0, %v2382_v39 }
 0x476   :  { %8421 = vmatprep.mubr.msk.f32.mxu1 %vm641_vm0, %v2383_v54 }
 0x479   :  { %8422 = vmatmul.mubr.msk.f32.gmra.mxu1 %vm641_vm0, %v2384_v25 }
 0x4f5   :  { %v8370_v34 = vpop.f32.mrf.mxu0 }
 0x4f7   :  { %v2274_v48 = vpop.f32.mrf.mxu0 }
 0x4f9   :  { %v10642_v30 = vpop.f32.mrf.mxu0 }
 0x4fb   :  { %v2284_v56 = vpop.f32.mrf.mxu0 }
 0x4fd   :  { %v8338_v42 = vpop.f32.mrf.mxu1  ;;  %v10644_v14 = vpop.f32.mrf.mxu0 }
 0x4ff   :  { %v2060_v61 = vpop.f32.mrf.mxu1  ;;  %v2294_v16 = vpop.f32.mrf.mxu0 }
 0x500   :  { %v2139_v23 = vadd.f32 %v10654_v7, %v2060_v61 }
 0x501   :  { %v8341_v19 = vpop.f32.mrf.mxu1  ;;  %v10650_v12 = vpop.f32.mrf.mxu0 }
 0x502   :  { %v2353_v47 = vadd.f32 %v2274_v48, %v2139_v23  ;;  %v2140_v48 = vadd.f32 %v8338_v42, %v10654_v7 }
 0x503   :  { %v2070_v8 = vpop.f32.mrf.mxu1  ;;  %v2304_v27 = vpop.f32.mrf.mxu0 }
 0x504   :  { %v2141_v21 = vadd.f32 %v10654_v7, %v2070_v8 }
 0x505   :  { %v8344_v11 = vpop.f32.mrf.mxu1  ;;  %v10661_v22 = vpop.f32.mrf.mxu0 }
 0x506   :  { %v2355_v24 = vadd.f32 %v2284_v56, %v2141_v21 }
 0x507   :  { %v2080_v0 = vpop.f32.mrf.mxu1  ;;  %v2314_v37 = vpop.f32.mrf.mxu0 }
 0x508   :  { %v2143_v3 = vadd.f32 %v10654_v7, %v2080_v0 }
 0x509   :  { %v8347_v55 = vpop.f32.mrf.mxu1  ;;  %v10670_v28 = vpop.f32.mrf.mxu0 }
 0x50a   :  { %v2357_v49 = vadd.f32 %v2294_v16, %v2143_v3  ;;  %v2142_v16 = vadd.f32 %v8341_v19, %v10654_v7 }
 0x50b   :  { %v2090_v6 = vpop.f32.mrf.mxu1  ;;  %v2324_v8 = vpop.f32.mrf.mxu0 }
 0x50c   :  { %v2145_v54 = vadd.f32 %v10654_v7, %v2090_v6 }
 0x50d   :  { %v10646_v20 = vpop.f32.mrf.mxu1  ;;  %v8388_v3 = vpop.f32.mrf.mxu0 }
 0x50e   :  { %v2359_v21 = vadd.f32 %v2304_v27, %v2145_v54 }
 0x50f   :  { %v2100_v15 = vpop.f32.mrf.mxu1  ;;  %v2334_v19 = vpop.f32.mrf.mxu0 }
 0x510   :  { %v2147_v56 = vadd.f32 %v10654_v7, %v2100_v15  ;;  %v2144_v15 = vadd.f32 %v8344_v11, %v10654_v7  ;;  %v2148_v11 = vadd.f32 %v10646_v20, %v10654_v7 }
 0x511   :  { %v10648_v41 = vpop.f32.mrf.mxu1 }
 0x512   :  { %v2150_v20 = vadd.f32 %v10648_v41, %v10654_v7 }
 0x513   :  { %v2110_v9 = vpop.f32.mrf.mxu1 }
 0x515   :  { %v10652_v13 = vpop.f32.mrf.mxu1 }
 0x517   :  { %v2120_v26 = vpop.f32.mrf.mxu1 }
 0x519   :  { %v10656_v45 = vpop.f32.mrf.mxu1 }
 0x51b   :  { %v10659_v32 = vpop.f32.mrf.mxu1 }
 0x51d   :  { %v8402_v36 = vpop.f32.mrf.mxu1 }
 0x51f   :  { %v2504_v4 = vpop.f32.mrf.mxu1 }
 0x520   :  { %v10664_v33 = vadd.f32 %v2504_v4, %v2353_v47 }
 0x521   :  { %v8405_v43 = vpop.f32.mrf.mxu1 }
 0x522   :  { %v2599_v58 = vsub.f32 0.0, %v10664_v33 }
 0x523   :  { %v2514_v10 = vpop.f32.mrf.mxu1 }
 0x524   :  { %v2615_v46 = vmul.f32 1.442695, %v2599_v58  ;;  %v10668_v2 = vadd.f32 %v2514_v10, %v2355_v24  ;;  %v2354_v58 = vadd.f32 %v8370_v34, %v2140_v48  ;;  %v2149_v10 = vadd.f32 %v10654_v7, %v2110_v9 }
 0x525   :  { %v8408_v39 = vpop.f32.mrf.mxu1  ;;  %v2356_v34 = vadd.f32 %v10642_v30, %v2142_v16  ;;  %v8391_v16 = vpop.f32.mrf.mxu0 }
 0x526   :  { %8985 = vpow2.f32 %v2615_v46  ;;  %v2601_v25 = vsub.f32 0.0, %v10668_v2  ;;  %v2361_v46 = vadd.f32 %v2314_v37, %v2147_v56  ;;  %v2363_v48 = vadd.f32 %v2324_v8, %v2149_v10 }
 0x527   :  { %v2524_v35 = vpop.f32.mrf.mxu1  ;;  %v2358_v56 = vadd.f32 %v10644_v14, %v2144_v15 }
 0x528   :  { %v2619_v40 = vmul.f32 1.442695, %v2601_v25  ;;  %v10674_v61 = vadd.f32 %v2524_v35, %v2357_v49  ;;  %v10685_v25 = vadd.f32 %v8402_v36, %v2354_v58  ;;  %v2146_v35 = vadd.f32 %v8347_v55, %v10654_v7 }
 0x529   :  { %v8411_v0 = vpop.f32.mrf.mxu1  ;;  %v2151_v36 = vadd.f32 %v10654_v7, %v2120_v26  ;;  %v10701_v58 = vadd.f32 %v8408_v39, %v2358_v56  ;;  %v2153_v26 = vadd.f32 %v10654_v7, %v10659_v32 }
 0x52a   :  { %8987 = vpow2.f32 %v2619_v40  ;;  %v2603_v23 = vsub.f32 0.0, %v10674_v61  ;;  %v2600_v37 = vsub.f32 0.0, %v10685_v25  ;;  %v2360_v8 = vadd.f32 %v10650_v12, %v2146_v35  ;;  %v2344_v35 = vpop.f32.mrf.mxu0 }
 0x52b   :  { %v2534_v47 = vpop.f32.mrf.mxu1  ;;  %v2365_v39 = vadd.f32 %v2334_v19, %v2151_v36  ;;  %v2604_v32 = vsub.f32 0.0, %v10701_v58  ;;  %v2367_v19 = vadd.f32 %v2344_v35, %v2153_v26  ;;  %v3050_v35 = vld [vmem:[#allocation12 + $0xf8] sm:$0xff] }
 0x52c   :  { %v2623_v6 = vmul.f32 1.442695, %v2603_v23  ;;  %v10679_v4 = vadd.f32 %v2534_v47, %v2359_v21  ;;  %v10697_v47 = vadd.f32 %v8405_v43, %v2356_v34  ;;  %v2617_v12 = vmul.f32 1.442695, %v2600_v37  ;;  %8456 = vmatprep.subr.mxu1 %v3050_v35 }
 0x52d   :  { %v8414_v24 = vpop.f32.mrf.mxu1  ;;  %v10714_v34 = vadd.f32 %v8411_v0, %v2360_v8  ;;  %8457 = vmatpush3.msra.mxu1 %v3050_v35 }
 0x52e   :  { %8989 = vpow2.f32 %v2623_v6  ;;  %v2605_v42 = vsub.f32 0.0, %v10679_v4 }
 0x52f   :  { %v2544_v27 = vpop.f32.mrf.mxu1 }
 0x530   :  { %v2627_v54 = vmul.f32 1.442695, %v2605_v42  ;;  %v10687_v49 = vadd.f32 %v2544_v27, %v2361_v46  ;;  %v2152_v42 = vadd.f32 %v10652_v13, %v10654_v7  ;;  %v2362_v46 = vadd.f32 %v10661_v22, %v2148_v11 }
 0x531   :  { %v8417_v40 = vpop.f32.mrf.mxu1  ;;  %v2602_v27 = vsub.f32 0.0, %v10697_v47  ;;  %v2364_v22 = vadd.f32 %v10670_v28, %v2150_v20  ;;  %v2154_v11 = vadd.f32 %v10656_v45, %v10654_v7 }
 0x532   :  { %8991 = vpow2.f32 %v2627_v54  ;;  %v2607_v9 = vsub.f32 0.0, %v10687_v49  ;;  %v10718_v13 = vadd.f32 %v8414_v24, %v2362_v46  ;;  %v2366_v36 = vadd.f32 %v8388_v3, %v2152_v42 }
 0x533   :  { %v8986_v23 = vpop.eup %8985  ;;  %v2554_v21 = vpop.f32.mrf.mxu1  ;;  %v2621_v0 = vmul.f32 1.442695, %v2602_v27  ;;  %v2606_v24 = vsub.f32 0.0, %v10714_v34  ;;  %v10727_v8 = vadd.f32 %v8417_v40, %v2364_v22  ;;  %v2833_v40 = vld [vmem:[#allocation12 + $0xc0] sm:$0xff] }
 0x534   :  { %v2647_v55 = vadd.f32 1.0, %v8986_v23  ;;  %v2631_v6 = vmul.f32 1.442695, %v2607_v9  ;;  %v10699_v30 = vadd.f32 %v2554_v21, %v2363_v48  ;;  %v2608_v20 = vsub.f32 0.0, %v10718_v13  ;;  %8430 = vmatprep.subr.mxu0 %v2833_v40 }
 0x535   :  { %v8420_v10 = vpop.f32.mrf.mxu1  ;;  %v2629_v42 = vmul.f32 1.442695, %v2606_v24  ;;  %v2610_v46 = vsub.f32 0.0, %v10727_v8  ;;  %8431 = vmatpush3.msra.mxu0 %v2833_v40 }
 0x536   :  { %8993 = vrcp.f32 %v2647_v55  ;;  %v2609_v14 = vsub.f32 0.0, %v10699_v30  ;;  %v10730_v7 = vadd.f32 %v8420_v10, %v2366_v36  ;;  %v10741_v36 = vld [vmem:[#allocation12 + $0x118] sm:$0xff] }
 0x537   :  { %v8988_v43 = vpop.eup %8987  ;;  %8995 = vpow2.f32 %v2631_v6  ;;  %v2564_v15 = vpop.f32.mrf.mxu1  ;;  %v2625_v6 = vmul.f32 1.442695, %v2604_v32  ;;  %8488 = vmatprep.subr.mxu0 %v10741_v36 }
 0x538   :  { %v2649_v54 = vadd.f32 1.0, %v8988_v43  ;;  %v2635_v41 = vmul.f32 1.442695, %v2609_v14  ;;  %v10716_v9 = vadd.f32 %v2564_v15, %v2365_v39  ;;  %v2368_v14 = vadd.f32 %v8391_v16, %v2154_v11  ;;  %v2816_v16 = vld [vmem:[#allocation2 + $0x17] sm:$0xff] }
 0x539   :  { %v8423_v48 = vpop.f32.mrf.mxu1  ;;  %v2633_v39 = vmul.f32 1.442695, %v2608_v20  ;;  %v2612_v15 = vsub.f32 0.0, %v10730_v7  ;;  %8432 = vmatprep.mubr.msk.f32.mxu0 %vm641_vm0, %v2816_v16  ;;  %v3049_v20 = vld [vmem:[#allocation12 + $0xf0] sm:$0xff] }
 0x53a   :  { %8997 = vrcp.f32 %v2649_v54  ;;  %v2611_v37 = vsub.f32 0.0, %v10716_v9  ;;  %8458 = vmatprep.subr.mxu1 %v3049_v20 }
 0x53b   :  { %v8990_v23 = vpop.eup %8989  ;;  %8999 = vpow2.f32 %v2635_v41  ;;  %v2574_v56 = vpop.f32.mrf.mxu1  ;;  %v2637_v41 = vmul.f32 1.442695, %v2610_v46  ;;  %v2641_v32 = vmul.f32 1.442695, %v2612_v15  ;;  %8459 = vmatpush3.msra.mxu1 %v3049_v20 }
 0x53c   :  { %9001 = vpow2.f32 %v2617_v12  ;;  %v2651_v21 = vadd.f32 1.0, %v8990_v23  ;;  %v10724_v55 = vadd.f32 %v2574_v56, %v2367_v19  ;;  %v2639_v28 = vmul.f32 1.442695, %v2611_v37 }
 0x53d   :  { %v10735_v12 = vadd.f32 %v8423_v48, %v2368_v14 }
 0x53e   :  { %9003 = vrcp.f32 %v2651_v21  ;;  %v2613_v45 = vsub.f32 0.0, %v10724_v55 }
 0x53f   :  { %v8992_v3 = vpop.eup %8991  ;;  %9005 = vpow2.f32 %v2639_v28  ;;  %v2614_v22 = vsub.f32 0.0, %v10735_v12 }
 0x540   :  { %9007 = vpow2.f32 %v2621_v0  ;;  %v2653_v26 = vadd.f32 1.0, %v8992_v3  ;;  %v2643_v43 = vmul.f32 1.442695, %v2613_v45 }
 0x541   :  { %9009 = vpow2.f32 %v2625_v6  ;;  %v2645_v37 = vmul.f32 1.442695, %v2614_v22 }
 0x542   :  { %9011 = vrcp.f32 %v2653_v26 }
 0x543   :  { %v8994_v10 = vpop.eup %8993  ;;  %9013 = vpow2.f32 %v2643_v43 }
 0x544   :  { %v8996_v27 = vpop.eup %8995  ;;  %2695 = vrot.lane.b32.xlu0 %v8994_v10, %s9702_s14  ;;  %9015 = vpow2.f32 %v2629_v42 }
 0x545   :  { %v2655_v54 = vadd.f32 1.0, %v8996_v27  ;;  %9017 = vpow2.f32 %v2633_v39  ;;  %v3048_v39 = vld [vmem:[#allocation12 + $0xe8] sm:$0xff] }
 0x546   :  { %8460 = vmatprep.subr.mxu1 %v3048_v39 }
 0x547   :  { %v8998_v48 = vpop.eup %8997  ;;  %9019 = vrcp.f32 %v2655_v54  ;;  %8461 = vmatpush3.msra.mxu1 %v3048_v39  ;;  %v3047_v54 = vld [vmem:[#allocation12 + $0xe0] sm:$0xff] }
 0x548   :  { %v9000_v19 = vpop.eup %8999  ;;  %2699 = vrot.lane.b32.xlu1 %v8998_v48, %s9702_s14  ;;  %9021 = vpow2.f32 %v2637_v41  ;;  %8462 = vmatprep.subr.mxu1 %v3047_v54 }
 0x549   :  { %v9002_v23 = vpop.eup %9001  ;;  %v2657_v11 = vadd.f32 1.0, %v9000_v19  ;;  %9023 = vpow2.f32 %v2641_v32  ;;  %8463 = vmatpush3.msra.mxu1 %v3047_v54 }
 0x54a   :  { %v2648_v28 = vadd.f32 1.0, %v9002_v23 }
 0x54b   :  { %v9004_v56 = vpop.eup %9003  ;;  %9025 = vrcp.f32 %v2657_v11 }
 0x54c   :  { %v9006_v0 = vpop.eup %9005  ;;  %2703 = vrot.lane.b32.xlu0 %v9004_v56, %s9702_s14  ;;  %9027 = vpow2.f32 %v2645_v37 }
 0x54d   :  { %v9008_v21 = vpop.eup %9007  ;;  %v2659_v6 = vadd.f32 1.0, %v9006_v0 }
 0x54e   :  { %v9010_v24 = vpop.eup %9009  ;;  %v2650_v43 = vadd.f32 1.0, %v9008_v21 }
 0x54f   :  { %v9012_v45 = vpop.eup %9011  ;;  %9029 = vrcp.f32 %v2659_v6  ;;  %v2652_v46 = vadd.f32 1.0, %v9010_v24 }
 0x550   :  { %v9014_v3 = vpop.eup %9013  ;;  %2707 = vrot.lane.b32.xlu1 %v9012_v45, %s9702_s14  ;;  %9031 = vrcp.f32 %v2648_v28 }
 0x551   :  { %v2661_v26 = vadd.f32 1.0, %v9014_v3  ;;  %v9016_v14 = vpop.eup %9015 }
 0x552   :  { %v9018_v42 = vpop.eup %9017  ;;  %v2654_v10 = vadd.f32 1.0, %v9016_v14 }
 0x553   :  { %9033 = vrcp.f32 %v2661_v26  ;;  %v2656_v16 = vadd.f32 1.0, %v9018_v42 }
 0x554   :  { %v9020_v40 = vpop.eup %9019  ;;  %9035 = vrcp.f32 %v2650_v43 }
 0x555   :  { %2711 = vrot.lane.b32.xlu0 %v9020_v40, %s9702_s14  ;;  %v9022_v15 = vpop.eup %9021  ;;  %9037 = vrcp.f32 %v2652_v46 }
 0x556   :  { %v9024_v27 = vpop.eup %9023  ;;  %9039 = vrcp.f32 %v2654_v10  ;;  %v2658_v35 = vadd.f32 1.0, %v9022_v15  ;;  %v2818_v10 = vld [vmem:[#allocation2 + $0x67] sm:$0xff] }
 0x557   :  { %9041 = vrcp.f32 %v2656_v16  ;;  %v2660_v22 = vadd.f32 1.0, %v9024_v27  ;;  %v3279_v27 = vld [vmem:[#allocation12 + $0x110] sm:$0xff] }
 0x558   :  { %v9026_v41 = vpop.eup %9025  ;;  %9043 = vrcp.f32 %v2658_v35 }
 0x559   :  { %2715 = vrot.lane.b32.xlu1 %v9026_v41, %s9702_s14  ;;  %v9028_v32 = vpop.eup %9027  ;;  %9045 = vrcp.f32 %v2660_v22  ;;  %v2820_v41 = vld [vmem:[#allocation2 + $0xb7] sm:$0xff]  ;;  %v2822_v22 = vld [vmem:[#allocation2 + $0x107] sm:$0xff] }
 0x55a   :  { %v2662_v23 = vadd.f32 1.0, %v9028_v32  ;;  %v3277_v32 = vld [vmem:[#allocation12 + $0x100] sm:$0xff] }
 0x55c   :  { %v9030_v48 = vpop.eup %9029  ;;  %9047 = vrcp.f32 %v2662_v23 }
 0x55d   :  { %2719 = vrot.lane.b32.xlu0 %v9030_v48, %s9702_s14  ;;  %v9032_v19 = vpop.eup %9031 }
 0x560   :  { %v9034_v11 = vpop.eup %9033 }
 0x561   :  { %2697 = vrot.lane.b32.xlu0 %v9032_v19, %s9702_s14  ;;  %2723 = vrot.lane.b32.xlu1 %v9034_v11, %s9702_s14  ;;  %v9036_v37 = vpop.eup %9035  ;;  %v2824_v11 = vld [vmem:[#allocation2 + $0x157] sm:$0xff] }
 0x562   :  { %v9038_v56 = vpop.eup %9037 }
 0x563   :  { %v9040_v0 = vpop.eup %9039 }
 0x564   :  { %v9042_v21 = vpop.eup %9041 }
 0x565   :  { %2705 = vrot.lane.b32.xlu0 %v9038_v56, %s9702_s14  ;;  %2701 = vrot.lane.b32.xlu1 %v9036_v37, %s9702_s14  ;;  %v9044_v6 = vpop.eup %9043 }
 0x566   :  { %v9046_v24 = vpop.eup %9045 }
 0x569   :  { %2713 = vrot.lane.b32.xlu0 %v9042_v21, %s9702_s14  ;;  %2709 = vrot.lane.b32.xlu1 %v9040_v0, %s9702_s14  ;;  %v9048_v28 = vpop.eup %9047 }
 0x56d   :  { %2721 = vrot.lane.b32.xlu0 %v9046_v24, %s9702_s14  ;;  %2717 = vrot.lane.b32.xlu1 %v9044_v6, %s9702_s14 }
 0x571   :  { %2725 = vrot.lane.b32.xlu1 %v9048_v28, %s9702_s14 }
 0x5b6   :  { %v2696_v20 = vpop.permute.xlu0 %2695 }
 0x5b7   :  { %v2743_v45 = vmul.f32 %v2696_v20, %v10664_v33  ;;  %v2826_v20 = vld [vmem:[#allocation2 + $0x1a7] sm:$0xff] }
 0x5b9   :  { %v2759_v3 = vadd.f32 %v2743_v45, %v10483_v62 }
 0x5ba   :  { %v2700_v26 = vpop.permute.xlu1 %2699 }
 0x5bb   :  { %v10760_v14 = vmul.f32 0.70710677, %v2759_v3  ;;  %v2745_v43 = vmul.f32 %v2700_v26, %v10668_v2 }
 0x5bd   :  { %2791 = vst.msk [vmem:[#allocation2 + $0x20] sm:$0xff] %vm641_vm0, %v10760_v14  ;;  %v2761_v42 = vadd.f32 %v2745_v43, %v10495_v59  ;;  %8464 = vmatprep.mubr.msk.f32.mxu1 %vm641_vm0, %v10760_v14 }
 0x5be   :  { %v2704_v46 = vpop.permute.xlu0 %2703 }
 0x5bf   :  { %v10768_v40 = vmul.f32 0.70710677, %v2761_v42  ;;  %v2747_v33 = vmul.f32 %v2704_v46, %v10674_v61  ;;  %v2828_v46 = vld [vmem:[#allocation2 + $0x1f7] sm:$0xff] }
 0x5c1   :  { %2793 = vst.msk [vmem:[#allocation2 + $0x70] sm:$0xff] %vm641_vm0, %v10768_v40  ;;  %v2763_v62 = vadd.f32 %v2747_v33, %v10511_v38  ;;  %v3278_v38 = vld [vmem:[#allocation12 + $0x108] sm:$0xff] }
 0x5c2   :  { %v2708_v39 = vpop.permute.xlu1 %2707 }
 0x5c3   :  { %v10774_v2 = vmul.f32 0.70710677, %v2763_v62  ;;  %v2749_v15 = vmul.f32 %v2708_v39, %v10679_v4 }
 0x5c4   :  { %v2817_v59 = vld [vmem:[#allocation2 + $0x1f] sm:$0xff] }
 0x5c5   :  { %2795 = vst.msk [vmem:[#allocation2 + $0xc0] sm:$0xff] %vm641_vm0, %v10774_v2  ;;  %v2765_v16 = vadd.f32 %v2749_v15, %v10528_v63  ;;  %8433 = vmatmul.mubr.msk.f32.vlgmr.msra.gmra.mxu0 %vm641_vm0, %v2817_v59  ;;  %v2830_v15 = vld [vmem:[#allocation2 + $0x247] sm:$0xff] }
 0x5c6   :  { %8489 = vmatpush3.msra.mxu0 %v10741_v36  ;;  %8435 = vmatprep.mubr.msk.f32.mxu0 %vm641_vm0, %v2818_v10 }
 0x5c7   :  { %v10783_v61 = vmul.f32 0.70710677, %v2765_v16  ;;  %v2712_v54 = vpop.permute.xlu0 %2711  ;;  %8490 = vmatprep.subr.mxu0 %v3279_v27 }
 0x5c8   :  { %v2751_v4 = vmul.f32 %v2712_v54, %v10687_v49  ;;  %v2819_v35 = vld [vmem:[#allocation2 + $0x6f] sm:$0xff]  ;;  %8491 = vmatpush3.msra.mxu0 %v3279_v27 }
 0x5c9   :  { %2797 = vst.msk [vmem:[#allocation2 + $0x110] sm:$0xff] %vm641_vm0, %v10783_v61  ;;  %8436 = vmatmul.mubr.msk.f32.gmra.mxu0 %vm641_vm0, %v2819_v35  ;;  %8492 = vmatprep.subr.mxu0 %v3278_v38 }
 0x5ca   :  { %v2767_v63 = vadd.f32 %v2751_v4, %v10548_v51  ;;  %8438 = vmatprep.mubr.msk.f32.mxu0 %vm641_vm0, %v2820_v41  ;;  %8493 = vmatpush3.msra.mxu0 %v3278_v38 }
 0x5cb   :  { %v2716_v36 = vpop.permute.xlu1 %2715  ;;  %8494 = vmatprep.subr.mxu0 %v3277_v32 }
 0x5cc   :  { %v10791_v48 = vmul.f32 0.70710677, %v2767_v63  ;;  %v2753_v49 = vmul.f32 %v2716_v36, %v10699_v30  ;;  %v2821_v19 = vld [vmem:[#allocation2 + $0xbf] sm:$0xff]  ;;  %8495 = vmatpush3.msra.mxu0 %v3277_v32 }
 0x5cd   :  { %8439 = vmatmul.mubr.msk.f32.gmra.mxu0 %vm641_vm0, %v2821_v19 }
 0x5ce   :  { %2799 = vst.msk [vmem:[#allocation2 + $0x160] sm:$0xff] %vm641_vm0, %v10791_v48  ;;  %v2769_v23 = vadd.f32 %v2753_v49, %v10566_v53  ;;  %8441 = vmatprep.mubr.msk.f32.mxu0 %vm641_vm0, %v2822_v22  ;;  %v3265_v49 = vld [vmem:[#allocation2 + $0xd1] sm:$0xff] }
 0x5cf   :  { %v2720_v51 = vpop.permute.xlu0 %2719 }
 0x5d0   :  { %v10799_v37 = vmul.f32 0.70710677, %v2769_v23  ;;  %v2755_v56 = vmul.f32 %v2720_v51, %v10716_v9  ;;  %v2823_v0 = vld [vmem:[#allocation2 + $0x10f] sm:$0xff]  ;;  %v3267_v23 = vld [vmem:[#allocation2 + $0x121] sm:$0xff] }
 0x5d1   :  { %8442 = vmatmul.mubr.msk.f32.gmra.mxu0 %vm641_vm0, %v2823_v0  ;;  %v3271_v0 = vld [vmem:[#allocation2 + $0x1c1] sm:$0xff] }
 0x5d2   :  { %2801 = vst.msk [vmem:[#allocation2 + $0x1b0] sm:$0xff] %vm641_vm0, %v10799_v37  ;;  %v2771_v30 = vadd.f32 %v2755_v56, %v10584_v29  ;;  %8444 = vmatprep.mubr.msk.f32.mxu0 %vm641_vm0, %v2824_v11  ;;  %v3269_v11 = vld [vmem:[#allocation2 + $0x171] sm:$0xff] }
 0x5d3   :  { %v2698_v21 = vpop.permute.xlu0 %2697  ;;  %v2724_v53 = vpop.permute.xlu1 %2723 }
 0x5d4   :  { %v10807_v6 = vmul.f32 0.70710677, %v2771_v30  ;;  %v2744_v24 = vmul.f32 %v2698_v21, %v10685_v25  ;;  %v2757_v28 = vmul.f32 %v2724_v53, %v10724_v55  ;;  %v3273_v21 = vld [vmem:[#allocation2 + $0x211] sm:$0xff] }
 0x5d5   :  { %v2825_v9 = vld [vmem:[#allocation2 + $0x15f] sm:$0xff] }
 0x5d6   :  { %2803 = vst.msk [vmem:[#allocation2 + $0x200] sm:$0xff] %vm641_vm0, %v10807_v6  ;;  %v2760_v45 = vadd.f32 %v2744_v24, %v10493_v18  ;;  %v2773_v3 = vadd.f32 %v2757_v28, %v10602_v5  ;;  %8445 = vmatmul.mubr.msk.f32.gmra.mxu0 %vm641_vm0, %v2825_v9  ;;  %v3275_v24 = vld [vmem:[#allocation2 + $0x261] sm:$0xff]  ;;  %v3695_v28 = vld [vmem:[#allocation12 + $0x158] sm:$0xff] }
 0x5d7   :  { %v2706_v29 = vpop.permute.xlu0 %2705  ;;  %v2702_v26 = vpop.permute.xlu1 %2701  ;;  %8447 = vmatprep.mubr.msk.f32.mxu0 %vm641_vm0, %v2826_v20  ;;  %v3694_v20 = vld [vmem:[#allocation12 + $0x150] sm:$0xff]  ;;  %8520 = vmatprep.subr.mxu1 %v3695_v28  ;;  %v3693_v9 = vld [vmem:[#allocation12 + $0x148] sm:$0xff] }
 0x5d8   :  { %v10817_v43 = vmul.f32 0.70710677, %v2760_v45  ;;  %v10819_v25 = vmul.f32 0.70710677, %v2773_v3  ;;  %v2748_v55 = vmul.f32 %v2706_v29, %v10701_v58  ;;  %v2746_v42 = vmul.f32 %v2702_v26, %v10697_v47 }
 0x5d9   :  { %v2827_v33 = vld [vmem:[#allocation2 + $0x1af] sm:$0xff] }
 0x5da   :  { %2792 = vst.msk [vmem:[#allocation2 + $0x28] sm:$0xff] %vm641_vm0, %v10817_v43  ;;  %2805 = vst.msk [vmem:[#allocation2 + $0x250] sm:$0xff] %vm641_vm0, %v10819_v25  ;;  %v2764_v18 = vadd.f32 %v2748_v55, %v10526_v44  ;;  %v2762_v5 = vadd.f32 %v2746_v42, %v10509_v31  ;;  %8448 = vmatmul.mubr.msk.f32.gmra.mxu0 %vm641_vm0, %v2827_v33  ;;  %8465 = vmatmul.mubr.msk.f32.vlgmr.msra.gmra.mxu1 %vm641_vm0, %v10817_v43 }
 0x5db   :  { %8467 = vmatprep.mubr.msk.f32.mxu1 %vm641_vm0, %v10768_v40  ;;  %v2714_v47 = vpop.permute.xlu0 %2713  ;;  %v2710_v58 = vpop.permute.xlu1 %2709  ;;  %8450 = vmatprep.mubr.msk.f32.mxu0 %vm641_vm0, %v2828_v46 }
 0x5dc   :  { %v10835_v62 = vmul.f32 0.70710677, %v2764_v18  ;;  %v10837_v39 = vmul.f32 0.70710677, %v2762_v5  ;;  %v2752_v44 = vmul.f32 %v2714_v47, %v10718_v13  ;;  %v2750_v31 = vmul.f32 %v2710_v58, %v10714_v34  ;;  %8521 = vmatpush3.msra.mxu1 %v3695_v28 }
 0x5dd   :  { %v2829_v10 = vld [vmem:[#allocation2 + $0x1ff] sm:$0xff]  ;;  %8522 = vmatprep.subr.mxu1 %v3694_v20 }
 0x5de   :  { %2796 = vst.msk [vmem:[#allocation2 + $0xc8] sm:$0xff] %vm641_vm0, %v10835_v62  ;;  %2794 = vst.msk [vmem:[#allocation2 + $0x78] sm:$0xff] %vm641_vm0, %v10837_v39  ;;  %v2768_v59 = vadd.f32 %v2752_v44, %v10563_v57  ;;  %v2766_v27 = vadd.f32 %v2750_v31, %v10543_v17  ;;  %8451 = vmatmul.mubr.msk.f32.gmra.mxu0 %vm641_vm0, %v2829_v10  ;;  %8468 = vmatmul.mubr.msk.f32.gmra.mxu1 %vm641_vm0, %v10837_v39 }
 0x5df   :  { %v2722_v13 = vpop.permute.xlu0 %2721  ;;  %8470 = vmatprep.mubr.msk.f32.mxu1 %vm641_vm0, %v10774_v2  ;;  %v2718_v34 = vpop.permute.xlu1 %2717  ;;  %8453 = vmatprep.mubr.msk.f32.mxu0 %vm641_vm0, %v2830_v15 }
 0x5e0   :  { %v10853_v16 = vmul.f32 0.70710677, %v2768_v59  ;;  %v10855_v38 = vmul.f32 0.70710677, %v2766_v27  ;;  %v2756_v57 = vmul.f32 %v2722_v13, %v10730_v7  ;;  %v2754_v17 = vmul.f32 %v2718_v34, %v10727_v8  ;;  %v3261_v7 = vld [vmem:[#allocation2 + $0x31] sm:$0xff]  ;;  %8523 = vmatpush3.msra.mxu1 %v3694_v20 }
 0x5e1   :  { %v2831_v54 = vld [vmem:[#allocation2 + $0x24f] sm:$0xff]  ;;  %8524 = vmatprep.subr.mxu1 %v3693_v9 }
 0x5e2   :  { %v3260_v41 = vld [vmem:[#allocation2 + $0x29] sm:$0xff]  ;;  %2800 = vst.msk [vmem:[#allocation2 + $0x168] sm:$0xff] %vm641_vm0, %v10853_v16  ;;  %2798 = vst.msk [vmem:[#allocation2 + $0x118] sm:$0xff] %vm641_vm0, %v10855_v38  ;;  %v2772_v4 = vadd.f32 %v2756_v57, %v10599_v52  ;;  %v2770_v35 = vadd.f32 %v2754_v17, %v10581_v60  ;;  %8454 = vmatmul.mubr.msk.f32.gmra.mxu0 %vm641_vm0, %v2831_v54  ;;  %8471 = vmatmul.mubr.msk.f32.gmra.mxu1 %vm641_vm0, %v10835_v62  ;;  %v10926_v59 = vld [vmem:[#allocation13 + $0x2] ss:$0 sm:$0xff] }
 0x5e3   :  { %8473 = vmatprep.mubr.msk.f32.mxu1 %vm641_vm0, %v10783_v61  ;;  %8496 = vmatprep.mubr.msk.f32.mxu0 %vm641_vm0, %v3260_v41  ;;  %v2726_v8 = vpop.permute.xlu1 %2725 }
 0x5e4   :  { %v10871_v32 = vmul.f32 0.70710677, %v2772_v4  ;;  %v10873_v63 = vmul.f32 0.70710677, %v2770_v35  ;;  %v2758_v52 = vmul.f32 %v2726_v8, %v10735_v12  ;;  %v3263_v12 = vld [vmem:[#allocation2 + $0x81] sm:$0xff]  ;;  %8525 = vmatpush3.msra.mxu1 %v3693_v9 }
 0x5e5   :  { %v3262_v36 = vld [vmem:[#allocation2 + $0x79] sm:$0xff] }
 0x5e6   :  { %2804 = vst.msk [vmem:[#allocation2 + $0x208] sm:$0xff] %vm641_vm0, %v10871_v32  ;;  %2802 = vst.msk [vmem:[#allocation2 + $0x1b8] sm:$0xff] %vm641_vm0, %v10873_v63  ;;  %v2774_v60 = vadd.f32 %v2758_v52, %v10615_v50  ;;  %8474 = vmatmul.mubr.msk.f32.gmra.mxu1 %vm641_vm0, %v10855_v38  ;;  %8497 = vmatmul.mubr.msk.f32.vlgmr.msra.gmra.mxu0 %vm641_vm0, %v3261_v7  ;;  %v3264_v50 = vld [vmem:[#allocation2 + $0xc9] sm:$0xff] }
 0x5e7   :  { %8476 = vmatprep.mubr.msk.f32.mxu1 %vm641_vm0, %v10791_v48  ;;  %8499 = vmatprep.mubr.msk.f32.mxu0 %vm641_vm0, %v3262_v36 }
 0x5e8   :  { %v10887_v22 = vmul.f32 0.70710677, %v2774_v60 }
 0x5e9   :  { %v3266_v19 = vld [vmem:[#allocation2 + $0x119] sm:$0xff]  ;;  %v3268_v51 = vld [vmem:[#allocation2 + $0x169] sm:$0xff] }
 0x5ea   :  { %2806 = vst.msk [vmem:[#allocation2 + $0x258] sm:$0xff] %vm641_vm0, %v10887_v22  ;;  %8477 = vmatmul.mubr.msk.f32.gmra.mxu1 %vm641_vm0, %v10853_v16  ;;  %8500 = vmatmul.mubr.msk.f32.gmra.mxu0 %vm641_vm0, %v3263_v12 }
 0x5eb   :  { %8479 = vmatprep.mubr.msk.f32.mxu1 %vm641_vm0, %v10799_v37  ;;  %8502 = vmatprep.mubr.msk.f32.mxu0 %vm641_vm0, %v3264_v50 }
 0x5ed   :  { %v3270_v56 = vld [vmem:[#allocation2 + $0x1b9] sm:$0xff]  ;;  %v3272_v30 = vld [vmem:[#allocation2 + $0x209] sm:$0xff] }
 0x5ee   :  { %8480 = vmatmul.mubr.msk.f32.gmra.mxu1 %vm641_vm0, %v10873_v63  ;;  %8503 = vmatmul.mubr.msk.f32.gmra.mxu0 %vm641_vm0, %v3265_v49 }
 0x5ef   :  { %8482 = vmatprep.mubr.msk.f32.mxu1 %vm641_vm0, %v10807_v6  ;;  %8505 = vmatprep.mubr.msk.f32.mxu0 %vm641_vm0, %v3266_v19 }
 0x5f1   :  { %v3274_v53 = vld [vmem:[#allocation2 + $0x259] sm:$0xff] }
 0x5f2   :  { %8483 = vmatmul.mubr.msk.f32.gmra.mxu1 %vm641_vm0, %v10871_v32  ;;  %8506 = vmatmul.mubr.msk.f32.gmra.mxu0 %vm641_vm0, %v3267_v23 }
 0x5f3   :  { %8485 = vmatprep.mubr.msk.f32.mxu1 %vm641_vm0, %v10819_v25  ;;  %8508 = vmatprep.mubr.msk.f32.mxu0 %vm641_vm0, %v3268_v51 }
 0x5f6   :  { %8486 = vmatmul.mubr.msk.f32.gmra.mxu1 %vm641_vm0, %v10887_v22  ;;  %8509 = vmatmul.mubr.msk.f32.gmra.mxu0 %vm641_vm0, %v3269_v11 }
 0x5f7   :  { %8511 = vmatprep.mubr.msk.f32.mxu0 %vm641_vm0, %v3270_v56 }
 0x5fa   :  { %8512 = vmatmul.mubr.msk.f32.gmra.mxu0 %vm641_vm0, %v3271_v0 }
 0x5fb   :  { %8514 = vmatprep.mubr.msk.f32.mxu0 %vm641_vm0, %v3272_v30 }
 0x5fe   :  { %8515 = vmatmul.mubr.msk.f32.gmra.mxu0 %vm641_vm0, %v3273_v21 }
 0x5ff   :  { %8517 = vmatprep.mubr.msk.f32.mxu0 %vm641_vm0, %v3274_v53 }
 0x602   :  { %8518 = vmatmul.mubr.msk.f32.gmra.mxu0 %vm641_vm0, %v3275_v24 }
 0x685   :  { %v8434_v45 = vpop.f32.mrf.mxu0 }
 0x686   :  { %v3031_v17 = vadd.f32 %v8434_v45, %v10926_v59 }
 0x687   :  { %v2951_v3 = vpop.f32.mrf.mxu0 }
 0x688   :  { %v3030_v4 = vadd.f32 %v10926_v59, %v2951_v3 }
 0x689   :  { %v8437_v29 = vpop.f32.mrf.mxu0 }
 0x68a   :  { %v3033_v52 = vadd.f32 %v8437_v29, %v10926_v59 }
 0x68b   :  { %v2961_v26 = vpop.f32.mrf.mxu0 }
 0x68c   :  { %v3032_v51 = vadd.f32 %v10926_v59, %v2961_v26 }
 0x68d   :  { %v8440_v55 = vpop.f32.mrf.mxu0 }
 0x68e   :  { %v3035_v0 = vadd.f32 %v8440_v55, %v10926_v59 }
 0x68f   :  { %v2971_v42 = vpop.f32.mrf.mxu0 }
 0x690   :  { %v3034_v24 = vadd.f32 %v10926_v59, %v2971_v42 }
 0x691   :  { %v8443_v46 = vpop.f32.mrf.mxu0 }
 0x692   :  { %v3037_v26 = vadd.f32 %v8443_v46, %v10926_v59 }
 0x693   :  { %v2981_v33 = vpop.f32.mrf.mxu0 }
 0x694   :  { %v3036_v46 = vadd.f32 %v10926_v59, %v2981_v33 }
 0x696   :  { %v8446_v18 = vpop.f32.mrf.mxu0 }
 0x698   :  { %v10918_v5 = vpop.f32.mrf.mxu0 }
 0x69a   :  { %v10920_v47 = vpop.f32.mrf.mxu0  ;;  %v8466_v58 = vpop.f32.mrf.mxu1 }
 0x69b   :  { %v3245_v35 = vadd.f32 %v8466_v58, %v3031_v17 }
 0x69c   :  { %v10922_v44 = vpop.f32.mrf.mxu0  ;;  %v3165_v31 = vpop.f32.mrf.mxu1 }
 0x69d   :  { %v3244_v36 = vadd.f32 %v3165_v31, %v3030_v4 }
 0x69e   :  { %v10924_v15 = vpop.f32.mrf.mxu0  ;;  %v8469_v10 = vpop.f32.mrf.mxu1 }
 0x69f   :  { %v3247_v49 = vadd.f32 %v8469_v10, %v3033_v52 }
 0x6a0   :  { %v10928_v27 = vpop.f32.mrf.mxu0  ;;  %v3175_v13 = vpop.f32.mrf.mxu1 }
 0x6a1   :  { %v3246_v28 = vadd.f32 %v3175_v13, %v3032_v51 }
 0x6a2   :  { %v10930_v34 = vpop.f32.mrf.mxu0  ;;  %v8472_v57 = vpop.f32.mrf.mxu1 }
 0x6a3   :  { %v3249_v45 = vadd.f32 %v8472_v57, %v3035_v0 }
 0x6a4   :  { %v10933_v54 = vpop.f32.mrf.mxu0  ;;  %v3185_v41 = vpop.f32.mrf.mxu1 }
 0x6a5   :  { %v3248_v10 = vadd.f32 %v3185_v41, %v3034_v24  ;;  %v3039_v41 = vadd.f32 %v8446_v18, %v10926_v59  ;;  %v3041_v18 = vadd.f32 %v10920_v47, %v10926_v59  ;;  %v3040_v47 = vadd.f32 %v10926_v59, %v10922_v44 }
 0x6a6   :  { %v8475_v8 = vpop.f32.mrf.mxu1  ;;  %v8498_v7 = vpop.f32.mrf.mxu0 }
 0x6a7   :  { %v10937_v60 = vadd.f32 %v8498_v7, %v3245_v35  ;;  %v3251_v35 = vadd.f32 %v8475_v8, %v3037_v26  ;;  %v3038_v8 = vadd.f32 %v10926_v59, %v10918_v5 }
 0x6a8   :  { %v3195_v12 = vpop.f32.mrf.mxu1  ;;  %v3395_v50 = vpop.f32.mrf.mxu0 }
 0x6a9   :  { %v3491_v19 = vsub.f32 0.0, %v10937_v60  ;;  %v10940_v23 = vadd.f32 %v3395_v50, %v3244_v36 }
 0x6aa   :  { %v8478_v11 = vpop.f32.mrf.mxu1  ;;  %v8501_v56 = vpop.f32.mrf.mxu0 }
 0x6ab   :  { %v3508_v30 = vmul.f32 1.442695, %v3491_v19  ;;  %v3490_v21 = vsub.f32 0.0, %v10940_v23  ;;  %v10945_v53 = vadd.f32 %v8501_v56, %v3247_v49  ;;  %v3250_v56 = vadd.f32 %v3195_v12, %v3036_v46 }
 0x6ac   :  { %v3205_v20 = vpop.f32.mrf.mxu1  ;;  %v3405_v9 = vpop.f32.mrf.mxu0 }
 0x6ad   :  { %9049 = vpow2.f32 %v3508_v30  ;;  %v3506_v3 = vmul.f32 1.442695, %v3490_v21  ;;  %v3493_v29 = vsub.f32 0.0, %v10945_v53  ;;  %v10950_v58 = vadd.f32 %v3405_v9, %v3246_v28 }
 0x6ae   :  { %v8481_v55 = vpop.f32.mrf.mxu1  ;;  %v8504_v31 = vpop.f32.mrf.mxu0  ;;  %v3253_v30 = vadd.f32 %v8478_v11, %v3039_v41 }
 0x6af   :  { %9051 = vpow2.f32 %v3506_v3  ;;  %v3512_v17 = vmul.f32 1.442695, %v3493_v29  ;;  %v10952_v4 = vadd.f32 %v8504_v31, %v3249_v45  ;;  %v3492_v42 = vsub.f32 0.0, %v10950_v58 }
 0x6b0   :  { %v3415_v13 = vpop.f32.mrf.mxu0  ;;  %v3215_v7 = vpop.f32.mrf.mxu1  ;;  %v3252_v45 = vadd.f32 %v3205_v20, %v3038_v8  ;;  %v3255_v11 = vadd.f32 %v8481_v55, %v3041_v18  ;;  %v3043_v20 = vadd.f32 %v10924_v15, %v10926_v59 }
 0x6b1   :  { %9053 = vpow2.f32 %v3512_v17  ;;  %v3495_v57 = vsub.f32 0.0, %v10952_v4  ;;  %v10956_v52 = vadd.f32 %v3415_v13, %v3248_v10  ;;  %v3510_v36 = vmul.f32 1.442695, %v3492_v42 }
 0x6b2   :  { %v8507_v50 = vpop.f32.mrf.mxu0  ;;  %v8484_v24 = vpop.f32.mrf.mxu1  ;;  %v3254_v41 = vadd.f32 %v3215_v7, %v3040_v47 }
 0x6b3   :  { %v3516_v49 = vmul.f32 1.442695, %v3495_v57  ;;  %v3494_v19 = vsub.f32 0.0, %v10956_v52  ;;  %v10961_v51 = vadd.f32 %v8507_v50, %v3251_v35  ;;  %9055 = vpow2.f32 %v3510_v36 }
 0x6b4   :  { %v3425_v0 = vpop.f32.mrf.mxu0  ;;  %v3225_v26 = vpop.f32.mrf.mxu1  ;;  %v3042_v50 = vadd.f32 %v10926_v59, %v10928_v27 }
 0x6b5   :  { %9057 = vpow2.f32 %v3516_v49  ;;  %v3514_v21 = vmul.f32 1.442695, %v3494_v19  ;;  %v3497_v33 = vsub.f32 0.0, %v10961_v51  ;;  %v10968_v28 = vadd.f32 %v3425_v0, %v3250_v56 }
 0x6b6   :  { %v8510_v9 = vpop.f32.mrf.mxu0  ;;  %v3257_v49 = vadd.f32 %v8484_v24, %v3043_v20  ;;  %v8487_v8 = vpop.f32.mrf.mxu1 }
 0x6b7   :  { %9059 = vpow2.f32 %v3514_v21  ;;  %v3520_v3 = vmul.f32 1.442695, %v3497_v33  ;;  %v10970_v29 = vadd.f32 %v8510_v9, %v3253_v30  ;;  %v3496_v5 = vsub.f32 0.0, %v10968_v28 }
 0x6b8   :  { %v3435_v12 = vpop.f32.mrf.mxu0  ;;  %v3045_v30 = vadd.f32 %v10930_v34, %v10926_v59  ;;  %v3256_v21 = vadd.f32 %v3225_v26, %v3042_v50 }
 0x6b9   :  { %9061 = vpow2.f32 %v3520_v3  ;;  %v3499_v31 = vsub.f32 0.0, %v10970_v29  ;;  %v10974_v10 = vadd.f32 %v3435_v12, %v3252_v45  ;;  %v3518_v42 = vmul.f32 1.442695, %v3496_v5  ;;  %v3235_v12 = vpop.f32.mrf.mxu1 }
 0x6ba   :  { %v9050_v17 = vpop.eup %9049  ;;  %v8513_v13 = vpop.f32.mrf.mxu0  ;;  %v3259_v5 = vadd.f32 %v8487_v8, %v3045_v30 }
 0x6bb   :  { %v3539_v35 = vadd.f32 1.0, %v9050_v17  ;;  %v3524_v57 = vmul.f32 1.442695, %v3499_v31  ;;  %v3498_v46 = vsub.f32 0.0, %v10974_v10  ;;  %v10981_v55 = vadd.f32 %v8513_v13, %v3255_v11 }
 0x6bc   :  { %v9052_v36 = vpop.eup %9051  ;;  %9063 = vpow2.f32 %v3518_v42  ;;  %v3445_v19 = vpop.f32.mrf.mxu0  ;;  %v3044_v31 = vadd.f32 %v10926_v59, %v10933_v54  ;;  %v3692_v42 = vld [vmem:[#allocation12 + $0x140] sm:$0xff] }
 0x6bd   :  { %9065 = vrcp.f32 %v3539_v35  ;;  %v3538_v44 = vadd.f32 1.0, %v9052_v36  ;;  %v3522_v15 = vmul.f32 1.442695, %v3498_v46  ;;  %v3501_v56 = vsub.f32 0.0, %v10981_v55  ;;  %8526 = vmatprep.subr.mxu1 %v3692_v42 }
 0x6be   :  { %v9054_v0 = vpop.eup %9053  ;;  %9067 = vpow2.f32 %v3524_v57  ;;  %v10988_v33 = vadd.f32 %v3445_v19, %v3254_v41  ;;  %v8516_v18 = vpop.f32.mrf.mxu0  ;;  %v3258_v36 = vadd.f32 %v3235_v12, %v3044_v31  ;;  %8527 = vmatpush3.msra.mxu1 %v3692_v42 }
 0x6bf   :  { %9069 = vrcp.f32 %v3538_v44  ;;  %v3541_v27 = vadd.f32 1.0, %v9054_v0  ;;  %v3528_v7 = vmul.f32 1.442695, %v3501_v56  ;;  %v10990_v24 = vadd.f32 %v8516_v18, %v3257_v49 }
 0x6c0   :  { %9071 = vpow2.f32 %v3522_v15  ;;  %v3500_v9 = vsub.f32 0.0, %v10988_v33  ;;  %v3455_v45 = vpop.f32.mrf.mxu0  ;;  %v9056_v3 = vpop.eup %9055 }
 0x6c1   :  { %9073 = vrcp.f32 %v3541_v27  ;;  %v3503_v34 = vsub.f32 0.0, %v10990_v24  ;;  %v10994_v11 = vadd.f32 %v3455_v45, %v3256_v21  ;;  %v3540_v17 = vadd.f32 1.0, %v9056_v3 }
 0x6c2   :  { %v9058_v26 = vpop.eup %9057  ;;  %9075 = vpow2.f32 %v3528_v7  ;;  %v3526_v47 = vmul.f32 1.442695, %v3500_v9  ;;  %v8519_v20 = vpop.f32.mrf.mxu0 }
 0x6c3   :  { %v3543_v13 = vadd.f32 1.0, %v9058_v26  ;;  %v3502_v35 = vsub.f32 0.0, %v10994_v11  ;;  %v10999_v57 = vadd.f32 %v8519_v20, %v3259_v5  ;;  %9077 = vrcp.f32 %v3540_v17 }
 0x6c4   :  { %v9060_v46 = vpop.eup %9059  ;;  %v3532_v50 = vmul.f32 1.442695, %v3503_v34  ;;  %v3465_v41 = vpop.f32.mrf.mxu0 }
 0x6c5   :  { %9079 = vrcp.f32 %v3543_v13  ;;  %v3542_v49 = vadd.f32 1.0, %v9060_v46  ;;  %v3505_v59 = vsub.f32 0.0, %v10999_v57  ;;  %v3530_v19 = vmul.f32 1.442695, %v3502_v35 }
 0x6c6   :  { %v9062_v54 = vpop.eup %9061  ;;  %9081 = vpow2.f32 %v3526_v47  ;;  %v11002_v44 = vadd.f32 %v3465_v41, %v3258_v36 }
 0x6c7   :  { %9083 = vrcp.f32 %v3542_v49  ;;  %v3545_v8 = vadd.f32 1.0, %v9062_v54  ;;  %v3536_v15 = vmul.f32 1.442695, %v3505_v59 }
 0x6c8   :  { %9085 = vpow2.f32 %v3532_v50  ;;  %v3504_v56 = vsub.f32 0.0, %v11002_v44 }
 0x6c9   :  { %v9064_v0 = vpop.eup %9063  ;;  %9087 = vrcp.f32 %v3545_v8 }
 0x6ca   :  { %v9066_v30 = vpop.eup %9065  ;;  %v3544_v21 = vadd.f32 1.0, %v9064_v0  ;;  %9089 = vpow2.f32 %v3530_v19  ;;  %v3534_v18 = vmul.f32 1.442695, %v3504_v56 }
 0x6cb   :  { %v9068_v27 = vpop.eup %9067  ;;  %9091 = vpow2.f32 %v3536_v15  ;;  %3588 = vrot.lane.b32.xlu1 %v9066_v30, %s9702_s14 }
 0x6cc   :  { %v9070_v7 = vpop.eup %9069  ;;  %9093 = vrcp.f32 %v3544_v21  ;;  %v3547_v9 = vadd.f32 1.0, %v9068_v27 }
 0x6cd   :  { %v9072_v45 = vpop.eup %9071  ;;  %9095 = vpow2.f32 %v3534_v18  ;;  %3586 = vrot.lane.b32.xlu0 %v9070_v7, %s9702_s14 }
 0x6ce   :  { %v9074_v3 = vpop.eup %9073  ;;  %9097 = vrcp.f32 %v3547_v9  ;;  %v3546_v5 = vadd.f32 1.0, %v9072_v45 }
 0x6cf   :  { %v9076_v12 = vpop.eup %9075  ;;  %3592 = vrot.lane.b32.xlu1 %v9074_v3, %s9702_s14 }
 0x6d0   :  { %9099 = vrcp.f32 %v3546_v5  ;;  %v3549_v34 = vadd.f32 1.0, %v9076_v12  ;;  %v9078_v26 = vpop.eup %9077 }
 0x6d1   :  { %3590 = vrot.lane.b32.xlu0 %v9078_v26, %s9702_s14 }
 0x6d2   :  { %v9080_v31 = vpop.eup %9079  ;;  %9101 = vrcp.f32 %v3549_v34 }
 0x6d3   :  { %v9082_v17 = vpop.eup %9081  ;;  %3596 = vrot.lane.b32.xlu1 %v9080_v31, %s9702_s14 }
 0x6d4   :  { %v9084_v47 = vpop.eup %9083  ;;  %v3548_v20 = vadd.f32 1.0, %v9082_v17 }
 0x6d5   :  { %v9086_v42 = vpop.eup %9085  ;;  %3594 = vrot.lane.b32.xlu0 %v9084_v47, %s9702_s14 }
 0x6d6   :  { %v9088_v13 = vpop.eup %9087  ;;  %9103 = vrcp.f32 %v3548_v20  ;;  %v3551_v35 = vadd.f32 1.0, %v9086_v42 }
 0x6d7   :  { %v9090_v46 = vpop.eup %9089  ;;  %3600 = vrot.lane.b32.xlu1 %v9088_v13, %s9702_s14 }
 0x6d8   :  { %v9092_v36 = vpop.eup %9091  ;;  %9105 = vrcp.f32 %v3551_v35  ;;  %v3550_v50 = vadd.f32 1.0, %v9090_v46 }
 0x6d9   :  { %v9094_v41 = vpop.eup %9093  ;;  %v3553_v49 = vadd.f32 1.0, %v9092_v36 }
 0x6da   :  { %v9096_v59 = vpop.eup %9095  ;;  %9107 = vrcp.f32 %v3550_v50  ;;  %3598 = vrot.lane.b32.xlu0 %v9094_v41, %s9702_s14 }
 0x6db   :  { %v9098_v54 = vpop.eup %9097  ;;  %9109 = vrcp.f32 %v3553_v49  ;;  %v3552_v19 = vadd.f32 1.0, %v9096_v59 }
 0x6dc   :  { %3604 = vrot.lane.b32.xlu1 %v9098_v54, %s9702_s14 }
 0x6dd   :  { %v9100_v8 = vpop.eup %9099  ;;  %9111 = vrcp.f32 %v3552_v19 }
 0x6de   :  { %3602 = vrot.lane.b32.xlu0 %v9100_v8, %s9702_s14 }
 0x6df   :  { %v9102_v15 = vpop.eup %9101 }
 0x6e0   :  { %3608 = vrot.lane.b32.xlu1 %v9102_v15, %s9702_s14 }
 0x6e3   :  { %v9104_v56 = vpop.eup %9103 }
 0x6e4   :  { %3606 = vrot.lane.b32.xlu0 %v9104_v56, %s9702_s14 }
 0x6e5   :  { %v9106_v0 = vpop.eup %9105 }
 0x6e6   :  { %3612 = vrot.lane.b32.xlu1 %v9106_v0, %s9702_s14 }
 0x6e7   :  { %v9108_v30 = vpop.eup %9107 }
 0x6e8   :  { %v9110_v21 = vpop.eup %9109  ;;  %3610 = vrot.lane.b32.xlu0 %v9108_v30, %s9702_s14 }
 0x6ea   :  { %v9112_v18 = vpop.eup %9111  ;;  %3616 = vrot.lane.b32.xlu1 %v9110_v21, %s9702_s14 }
 0x6ec   :  { %3614 = vrot.lane.b32.xlu0 %v9112_v18, %s9702_s14 }
 0x73d   :  { %v3589_v27 = vpop.permute.xlu1 %3588 }
 0x73e   :  { %v3635_v7 = vmul.f32 %v3589_v27, %v10937_v60 }
 0x73f   :  { %v3587_v9 = vpop.permute.xlu0 %3586 }
 0x740   :  { %v3634_v45 = vmul.f32 %v3587_v9, %v10940_v23  ;;  %v3651_v3 = vadd.f32 %v3635_v7, %v10817_v43 }
 0x741   :  { %v3593_v5 = vpop.permute.xlu1 %3592 }
 0x742   :  { %v3650_v12 = vadd.f32 %v3634_v45, %v10760_v14  ;;  %v3637_v34 = vmul.f32 %v3593_v5, %v10945_v53  ;;  %v11028_v17 = vmul.f32 0.70710677, %v3651_v3 }
 0x743   :  { %v3591_v31 = vpop.permute.xlu0 %3590 }
 0x744   :  { %v11026_v26 = vmul.f32 0.70710677, %v3650_v12  ;;  %v3636_v47 = vmul.f32 %v3591_v31, %v10950_v58  ;;  %v3653_v60 = vadd.f32 %v3637_v34, %v10837_v39 }
 0x745   :  { %v3597_v20 = vpop.permute.xlu1 %3596 }
 0x746   :  { %v3639_v42 = vmul.f32 %v3597_v20, %v10952_v4  ;;  %8528 = vmatprep.mubr.msk.f32.mxu1 %vm641_vm0, %v11026_v26  ;;  %v3652_v43 = vadd.f32 %v3636_v47, %v10768_v40  ;;  %v11041_v58 = vmul.f32 0.70710677, %v3653_v60 }
 0x747   :  { %8529 = vmatmul.mubr.msk.f32.vlgmr.msra.gmra.mxu1 %vm641_vm0, %v11028_v17  ;;  %v3595_v14 = vpop.permute.xlu0 %3594 }
 0x748   :  { %v11038_v23 = vmul.f32 0.70710677, %v3652_v43  ;;  %v3638_v53 = vmul.f32 %v3595_v14, %v10956_v52  ;;  %v3655_v39 = vadd.f32 %v3639_v42, %v10835_v62 }
 0x749   :  { %v3601_v13 = vpop.permute.xlu1 %3600 }
 0x74a   :  { %v3641_v4 = vmul.f32 %v3601_v13, %v10961_v51  ;;  %v3654_v35 = vadd.f32 %v3638_v53, %v10774_v2  ;;  %8531 = vmatprep.mubr.msk.f32.mxu1 %vm641_vm0, %v11038_v23  ;;  %v11053_v36 = vmul.f32 0.70710677, %v3655_v39 }
 0x74b   :  { %8532 = vmatmul.mubr.msk.f32.gmra.mxu1 %vm641_vm0, %v11041_v58 }
 0x74c   :  { %v3599_v40 = vpop.permute.xlu0 %3598  ;;  %v11050_v46 = vmul.f32 0.70710677, %v3654_v35  ;;  %v3657_v50 = vadd.f32 %v3641_v4, %v10855_v38 }
 0x74d   :  { %v3640_v52 = vmul.f32 %v3599_v40, %v10968_v28 }
 0x74e   :  { %v3605_v62 = vpop.permute.xlu1 %3604  ;;  %8534 = vmatprep.mubr.msk.f32.mxu1 %vm641_vm0, %v11050_v46  ;;  %v11065_v59 = vmul.f32 0.70710677, %v3657_v50 }
 0x74f   :  { %v3656_v51 = vadd.f32 %v3640_v52, %v10783_v61  ;;  %v3643_v2 = vmul.f32 %v3605_v62, %v10970_v29  ;;  %8535 = vmatmul.mubr.msk.f32.gmra.mxu1 %vm641_vm0, %v11053_v36 }
 0x750   :  { %v3603_v41 = vpop.permute.xlu0 %3602 }
 0x751   :  { %v11062_v49 = vmul.f32 0.70710677, %v3656_v51  ;;  %v3642_v28 = vmul.f32 %v3603_v41, %v10974_v10  ;;  %v3659_v38 = vadd.f32 %v3643_v2, %v10853_v16 }
 0x752   :  { %v3609_v54 = vpop.permute.xlu1 %3608 }
 0x753   :  { %v3658_v61 = vadd.f32 %v3642_v28, %v10791_v48  ;;  %8537 = vmatprep.mubr.msk.f32.mxu1 %vm641_vm0, %v11062_v49  ;;  %v3645_v29 = vmul.f32 %v3609_v54, %v10981_v55  ;;  %v11076_v8 = vmul.f32 0.70710677, %v3659_v38 }
 0x754   :  { %8538 = vmatmul.mubr.msk.f32.gmra.mxu1 %vm641_vm0, %v11065_v59 }
 0x755   :  { %v11074_v19 = vmul.f32 0.70710677, %v3658_v61  ;;  %v3661_v48 = vadd.f32 %v3645_v29, %v10873_v63 }
 0x756   :  { %v3607_v10 = vpop.permute.xlu0 %3606 }
 0x757   :  { %v3644_v15 = vmul.f32 %v3607_v10, %v10988_v33  ;;  %8540 = vmatprep.mubr.msk.f32.mxu1 %vm641_vm0, %v11074_v19  ;;  %v11089_v18 = vmul.f32 0.70710677, %v3661_v48 }
 0x758   :  { %v3613_v16 = vpop.permute.xlu1 %3612  ;;  %8541 = vmatmul.mubr.msk.f32.gmra.mxu1 %vm641_vm0, %v11076_v8 }
 0x759   :  { %v3660_v55 = vadd.f32 %v3644_v15, %v10799_v37  ;;  %v3647_v56 = vmul.f32 %v3613_v16, %v10990_v24 }
 0x75a   :  { %v3611_v0 = vpop.permute.xlu0 %3610 }
 0x75b   :  { %v11086_v30 = vmul.f32 0.70710677, %v3660_v55  ;;  %v3646_v21 = vmul.f32 %v3611_v0, %v10994_v11  ;;  %v3663_v33 = vadd.f32 %v3647_v56, %v10871_v32 }
 0x75c   :  { %v3617_v27 = vpop.permute.xlu1 %3616 }
 0x75d   :  { %v3662_v63 = vadd.f32 %v3646_v21, %v10807_v6  ;;  %v3649_v7 = vmul.f32 %v3617_v27, %v10999_v57  ;;  %8543 = vmatprep.mubr.msk.f32.mxu1 %vm641_vm0, %v11086_v30  ;;  %v11101_v9 = vmul.f32 0.70710677, %v3663_v33 }
 0x75e   :  { %v3615_v37 = vpop.permute.xlu0 %3614  ;;  %8544 = vmatmul.mubr.msk.f32.gmra.mxu1 %vm641_vm0, %v11089_v18 }
 0x75f   :  { %v11098_v24 = vmul.f32 0.70710677, %v3662_v63  ;;  %v3648_v11 = vmul.f32 %v3615_v37, %v11002_v44  ;;  %v3665_v32 = vadd.f32 %v3649_v7, %v10887_v22  ;;  %v4142_v44 = vld [vmem:[#allocation12 + $0x198] sm:$0xff]  ;;  %v4141_v22 = vld [vmem:[#allocation12 + $0x190] sm:$0xff] }
 0x760   :  { %8552 = vmatprep.subr.mxu0 %v4142_v44 }
 0x761   :  { %v3664_v45 = vadd.f32 %v3648_v11, %v10819_v25  ;;  %8546 = vmatprep.mubr.msk.f32.mxu1 %vm641_vm0, %v11098_v24  ;;  %v11111_v57 = vmul.f32 0.70710677, %v3665_v32  ;;  %8553 = vmatpush3.msra.mxu0 %v4142_v44  ;;  %v11117_v25 = vld [vmem:[#allocation13 + $0x3] ss:$0 sm:$0xff] }
 0x762   :  { %8547 = vmatmul.mubr.msk.f32.gmra.mxu1 %vm641_vm0, %v11101_v9  ;;  %8554 = vmatprep.subr.mxu0 %v4141_v22 }
 0x763   :  { %v11109_v6 = vmul.f32 0.70710677, %v3664_v45  ;;  %8555 = vmatpush3.msra.mxu0 %v4141_v22 }
 0x765   :  { %8549 = vmatprep.mubr.msk.f32.mxu1 %vm641_vm0, %v11109_v6 }
 0x766   :  { %8550 = vmatmul.mubr.msk.f32.gmra.mxu1 %vm641_vm0, %v11111_v57 }
 0x807   :  { %v8530_v3 = vpop.f32.mrf.mxu1 }
 0x808   :  { %v11120_v5 = vadd.f32 %v8530_v3, %v11117_v25 }
 0x809   :  { %v3810_v12 = vpop.f32.mrf.mxu1 }
 0x80a   :  { %v3906_v34 = vsub.f32 0.0, %v11120_v5  ;;  %v11124_v31 = vadd.f32 %v11117_v25, %v3810_v12 }
 0x80b   :  { %v8533_v60 = vpop.f32.mrf.mxu1 }
 0x80c   :  { %v3923_v47 = vmul.f32 1.442695, %v3906_v34  ;;  %v3905_v20 = vsub.f32 0.0, %v11124_v31  ;;  %v11128_v42 = vadd.f32 %v8533_v60, %v11117_v25 }
 0x80d   :  { %v3820_v14 = vpop.f32.mrf.mxu1 }
 0x80e   :  { %9113 = vpow2.f32 %v3923_v47  ;;  %v3921_v43 = vmul.f32 1.442695, %v3905_v20  ;;  %v3908_v53 = vsub.f32 0.0, %v11128_v42  ;;  %v11132_v13 = vadd.f32 %v11117_v25, %v3820_v14 }
 0x80f   :  { %v8536_v39 = vpop.f32.mrf.mxu1 }
 0x810   :  { %9115 = vpow2.f32 %v3921_v43  ;;  %v3927_v4 = vmul.f32 1.442695, %v3908_v53  ;;  %v3907_v35 = vsub.f32 0.0, %v11132_v13  ;;  %v11136_v40 = vadd.f32 %v8536_v39, %v11117_v25 }
 0x811   :  { %v3830_v52 = vpop.f32.mrf.mxu1 }
 0x812   :  { %9117 = vpow2.f32 %v3927_v4  ;;  %v3925_v50 = vmul.f32 1.442695, %v3907_v35  ;;  %v3910_v62 = vsub.f32 0.0, %v11136_v40  ;;  %v11140_v51 = vadd.f32 %v11117_v25, %v3830_v52  ;;  %v4356_v4 = vld [vmem:[#allocation12 + $0x1b8] sm:$0xff] }
 0x813   :  { %8584 = vmatprep.subr.mxu1 %v4356_v4 }
 0x814   :  { %v8539_v2 = vpop.f32.mrf.mxu1  ;;  %9119 = vpow2.f32 %v3925_v50  ;;  %v3931_v41 = vmul.f32 1.442695, %v3910_v62  ;;  %v3909_v28 = vsub.f32 0.0, %v11140_v51  ;;  %8585 = vmatpush3.msra.mxu1 %v4356_v4 }
 0x815   :  { %v11144_v38 = vadd.f32 %v8539_v2, %v11117_v25 }
 0x816   :  { %v3840_v54 = vpop.f32.mrf.mxu1  ;;  %9121 = vpow2.f32 %v3931_v41  ;;  %v3929_v61 = vmul.f32 1.442695, %v3909_v28  ;;  %v4140_v28 = vld [vmem:[#allocation12 + $0x188] sm:$0xff] }
 0x817   :  { %v3912_v29 = vsub.f32 0.0, %v11144_v38  ;;  %v11148_v10 = vadd.f32 %v11117_v25, %v3840_v54  ;;  %v4355_v54 = vld [vmem:[#allocation12 + $0x1b0] sm:$0xff]  ;;  %8556 = vmatprep.subr.mxu0 %v4140_v28 }
 0x818   :  { %v8542_v15 = vpop.f32.mrf.mxu1  ;;  %9123 = vpow2.f32 %v3929_v61  ;;  %8586 = vmatprep.subr.mxu1 %v4355_v54  ;;  %8557 = vmatpush3.msra.mxu0 %v4140_v28 }
 0x819   :  { %v3935_v48 = vmul.f32 1.442695, %v3912_v29  ;;  %v3911_v16 = vsub.f32 0.0, %v11148_v10  ;;  %v11152_v55 = vadd.f32 %v8542_v15, %v11117_v25  ;;  %8587 = vmatpush3.msra.mxu1 %v4355_v54 }
 0x81a   :  { %v3850_v56 = vpop.f32.mrf.mxu1 }
 0x81b   :  { %v9114_v0 = vpop.eup %9113  ;;  %9125 = vpow2.f32 %v3935_v48  ;;  %v3933_v21 = vmul.f32 1.442695, %v3911_v16  ;;  %v3914_v33 = vsub.f32 0.0, %v11152_v55  ;;  %v11156_v27 = vadd.f32 %v11117_v25, %v3850_v56 }
 0x81c   :  { %v3954_v63 = vadd.f32 1.0, %v9114_v0  ;;  %v4354_v0 = vld [vmem:[#allocation12 + $0x1a8] sm:$0xff] }
 0x81d   :  { %v9116_v7 = vpop.eup %9115  ;;  %9127 = vpow2.f32 %v3933_v21  ;;  %v3939_v37 = vmul.f32 1.442695, %v3914_v33  ;;  %v3913_v11 = vsub.f32 0.0, %v11156_v27  ;;  %8588 = vmatprep.subr.mxu1 %v4354_v0 }
 0x81e   :  { %9129 = vrcp.f32 %v3954_v63  ;;  %v3953_v32 = vadd.f32 1.0, %v9116_v7  ;;  %v8545_v45 = vpop.f32.mrf.mxu1  ;;  %8589 = vmatpush3.msra.mxu1 %v4354_v0 }
 0x81f   :  { %9131 = vpow2.f32 %v3939_v37  ;;  %v3937_v44 = vmul.f32 1.442695, %v3913_v11  ;;  %v11160_v22 = vadd.f32 %v8545_v45, %v11117_v25  ;;  %v9118_v3 = vpop.eup %9117 }
 0x820   :  { %9133 = vrcp.f32 %v3953_v32  ;;  %v3860_v12 = vpop.f32.mrf.mxu1  ;;  %v3956_v34 = vadd.f32 1.0, %v9118_v3  ;;  %v4353_v32 = vld [vmem:[#allocation12 + $0x1a0] sm:$0xff] }
 0x821   :  { %9135 = vpow2.f32 %v3937_v44  ;;  %v3916_v47 = vsub.f32 0.0, %v11160_v22  ;;  %v11164_v20 = vadd.f32 %v11117_v25, %v3860_v12  ;;  %v9120_v60 = vpop.eup %9119  ;;  %8590 = vmatprep.subr.mxu1 %v4353_v32 }
 0x822   :  { %v8548_v43 = vpop.f32.mrf.mxu1  ;;  %9137 = vrcp.f32 %v3956_v34  ;;  %v3955_v14 = vadd.f32 1.0, %v9120_v60  ;;  %8591 = vmatpush3.msra.mxu1 %v4353_v32 }
 0x823   :  { %v3943_v53 = vmul.f32 1.442695, %v3916_v47  ;;  %v3915_v39 = vsub.f32 0.0, %v11164_v20  ;;  %v9122_v35 = vpop.eup %9121  ;;  %v11168_v52 = vadd.f32 %v8548_v43, %v11117_v25  ;;  %8648 = vmatprep.subr.mxu1 %v9701_v1 }
 0x824   :  { %v3870_v50 = vpop.f32.mrf.mxu1  ;;  %9139 = vrcp.f32 %v3955_v14  ;;  %v3958_v62 = vadd.f32 1.0, %v9122_v35 }
 0x825   :  { %v3941_v2 = vmul.f32 1.442695, %v3915_v39  ;;  %v11171_v41 = vadd.f32 %v11117_v25, %v3870_v50  ;;  %v9124_v61 = vpop.eup %9123  ;;  %9141 = vpow2.f32 %v3943_v53  ;;  %v3918_v29 = vsub.f32 0.0, %v11168_v52  ;;  %v4139_v39 = vld [vmem:[#allocation12 + $0x180] sm:$0xff] }
 0x826   :  { %v8551_v15 = vpop.f32.mrf.mxu1  ;;  %9143 = vrcp.f32 %v3958_v62  ;;  %v3957_v48 = vadd.f32 1.0, %v9124_v61  ;;  %8558 = vmatprep.subr.mxu0 %v4139_v39 }
 0x827   :  { %v3917_v16 = vsub.f32 0.0, %v11171_v41  ;;  %v11176_v56 = vadd.f32 %v8551_v15, %v11117_v25  ;;  %9145 = vpow2.f32 %v3941_v2  ;;  %v3947_v33 = vmul.f32 1.442695, %v3918_v29  ;;  %8559 = vmatpush3.msra.mxu0 %v4139_v39  ;;  %v11189_v15 = vld [vmem:[#allocation12 + $0x1d8] sm:$0xff] }
 0x828   :  { %v9126_v21 = vpop.eup %9125  ;;  %v3880_v63 = vpop.f32.mrf.mxu1  ;;  %9147 = vrcp.f32 %v3957_v48  ;;  %8616 = vmatprep.subr.mxu0 %v11189_v15 }
 0x829   :  { %v3960_v7 = vadd.f32 1.0, %v9126_v21  ;;  %v3945_v37 = vmul.f32 1.442695, %v3917_v16  ;;  %v3920_v11 = vsub.f32 0.0, %v11176_v56  ;;  %9149 = vpow2.f32 %v3947_v33 }
 0x82a   :  { %v9128_v45 = vpop.eup %9127  ;;  %v11180_v44 = vadd.f32 %v11117_v25, %v3880_v63 }
 0x82b   :  { %v9130_v3 = vpop.eup %9129  ;;  %9151 = vrcp.f32 %v3960_v7  ;;  %v3959_v12 = vadd.f32 1.0, %v9128_v45  ;;  %v3951_v34 = vmul.f32 1.442695, %v3920_v11 }
 0x82c   :  { %v9132_v47 = vpop.eup %9131  ;;  %9153 = vpow2.f32 %v3945_v37  ;;  %v3919_v60 = vsub.f32 0.0, %v11180_v44  ;;  %4003 = vrot.lane.b32.xlu1 %v9130_v3, %s9702_s14 }
 0x82d   :  { %v9134_v43 = vpop.eup %9133  ;;  %9155 = vrcp.f32 %v3959_v12  ;;  %v3962_v14 = vadd.f32 1.0, %v9132_v47 }
 0x82e   :  { %v9136_v53 = vpop.eup %9135  ;;  %9157 = vpow2.f32 %v3951_v34  ;;  %v3949_v25 = vmul.f32 1.442695, %v3919_v60  ;;  %4001 = vrot.lane.b32.xlu0 %v9134_v43, %s9702_s14 }
 0x82f   :  { %9159 = vrcp.f32 %v3962_v14  ;;  %v3961_v4 = vadd.f32 1.0, %v9136_v53  ;;  %v9138_v35 = vpop.eup %9137 }
 0x830   :  { %9161 = vpow2.f32 %v3949_v25  ;;  %4007 = vrot.lane.b32.xlu1 %v9138_v35, %s9702_s14 }
 0x831   :  { %9163 = vrcp.f32 %v3961_v4  ;;  %v9140_v50 = vpop.eup %9139 }
 0x832   :  { %v9142_v62 = vpop.eup %9141  ;;  %4005 = vrot.lane.b32.xlu0 %v9140_v50, %s9702_s14 }
 0x833   :  { %v9144_v2 = vpop.eup %9143  ;;  %v3964_v28 = vadd.f32 1.0, %v9142_v62 }
 0x834   :  { %v9146_v54 = vpop.eup %9145  ;;  %4011 = vrot.lane.b32.xlu1 %v9144_v2, %s9702_s14 }
 0x835   :  { %v9148_v61 = vpop.eup %9147  ;;  %9165 = vrcp.f32 %v3964_v28  ;;  %v3963_v29 = vadd.f32 1.0, %v9146_v54 }
 0x836   :  { %v9150_v48 = vpop.eup %9149  ;;  %4009 = vrot.lane.b32.xlu0 %v9148_v61, %s9702_s14 }
 0x837   :  { %9167 = vrcp.f32 %v3963_v29  ;;  %v3966_v0 = vadd.f32 1.0, %v9150_v48 }
 0x838   :  { %v9152_v16 = vpop.eup %9151 }
 0x839   :  { %v9154_v21 = vpop.eup %9153  ;;  %4015 = vrot.lane.b32.xlu1 %v9152_v16, %s9702_s14  ;;  %9169 = vrcp.f32 %v3966_v0 }
 0x83a   :  { %v9156_v33 = vpop.eup %9155  ;;  %v3965_v63 = vadd.f32 1.0, %v9154_v21 }
 0x83b   :  { %v9158_v7 = vpop.eup %9157  ;;  %4013 = vrot.lane.b32.xlu0 %v9156_v33, %s9702_s14 }
 0x83c   :  { %v9160_v37 = vpop.eup %9159  ;;  %9171 = vrcp.f32 %v3965_v63  ;;  %v3968_v11 = vadd.f32 1.0, %v9158_v7 }
 0x83d   :  { %v9162_v32 = vpop.eup %9161  ;;  %4019 = vrot.lane.b32.xlu1 %v9160_v37, %s9702_s14 }
 0x83e   :  { %v9164_v45 = vpop.eup %9163  ;;  %9173 = vrcp.f32 %v3968_v11  ;;  %v3967_v3 = vadd.f32 1.0, %v9162_v32 }
 0x83f   :  { %4017 = vrot.lane.b32.xlu0 %v9164_v45, %s9702_s14 }
 0x840   :  { %9175 = vrcp.f32 %v3967_v3 }
 0x842   :  { %v9166_v12 = vpop.eup %9165 }
 0x843   :  { %4023 = vrot.lane.b32.xlu1 %v9166_v12, %s9702_s14 }
 0x844   :  { %v9168_v34 = vpop.eup %9167 }
 0x845   :  { %4021 = vrot.lane.b32.xlu0 %v9168_v34, %s9702_s14  ;;  %v4584_v34 = vld [vmem:[#allocation12 + $0x1c8] sm:$0xff] }
 0x846   :  { %v9170_v47 = vpop.eup %9169 }
 0x847   :  { %4027 = vrot.lane.b32.xlu1 %v9170_v47, %s9702_s14 }
 0x849   :  { %v9172_v60 = vpop.eup %9171 }
 0x84a   :  { %4025 = vrot.lane.b32.xlu0 %v9172_v60, %s9702_s14 }
 0x84b   :  { %v9174_v43 = vpop.eup %9173 }
 0x84c   :  { %4031 = vrot.lane.b32.xlu1 %v9174_v43, %s9702_s14 }
 0x84d   :  { %v9176_v14 = vpop.eup %9175 }
 0x84e   :  { %4029 = vrot.lane.b32.xlu0 %v9176_v14, %s9702_s14  ;;  %v4583_v14 = vld [vmem:[#allocation12 + $0x1c0] sm:$0xff] }
 0x89e   :  { %v4004_v53 = vpop.permute.xlu1 %4003 }
 0x89f   :  { %v4050_v25 = vmul.f32 %v4004_v53, %v11120_v5 }
 0x8a0   :  { %v4002_v39 = vpop.permute.xlu0 %4001 }
 0x8a1   :  { %v4066_v4 = vadd.f32 %v4050_v25, %v11028_v17  ;;  %v4049_v35 = vmul.f32 %v4002_v39, %v11124_v31 }
 0x8a2   :  { %v4008_v2 = vpop.permute.xlu1 %4007 }
 0x8a3   :  { %v11206_v50 = vmul.f32 0.70710677, %v4066_v4  ;;  %v4065_v62 = vadd.f32 %v4049_v35, %v11026_v26  ;;  %v4052_v28 = vmul.f32 %v4008_v2, %v11128_v42 }
 0x8a4   :  { %v4006_v61 = vpop.permute.xlu0 %4005 }
 0x8a5   :  { %4098 = vst.msk [vmem:[#allocation2 + $0x28] sm:$0xff] %vm641_vm0, %v11206_v50  ;;  %v11212_v54 = vmul.f32 0.70710677, %v4065_v62  ;;  %v4068_v5 = vadd.f32 %v4052_v28, %v11041_v58  ;;  %v4051_v29 = vmul.f32 %v4006_v61, %v11132_v13 }
 0x8a6   :  { %v4012_v17 = vpop.permute.xlu1 %4011 }
 0x8a7   :  { %4097 = vst.msk [vmem:[#allocation2 + $0x20] sm:$0xff] %vm641_vm0, %v11212_v54  ;;  %8592 = vmatprep.mubr.msk.f32.mxu1 %vm641_vm0, %v11212_v54  ;;  %v11220_v26 = vmul.f32 0.70710677, %v4068_v5  ;;  %v4067_v31 = vadd.f32 %v4051_v29, %v11038_v23  ;;  %v4054_v42 = vmul.f32 %v4012_v17, %v11136_v40 }
 0x8a8   :  { %8593 = vmatmul.mubr.msk.f32.vlgmr.msra.gmra.mxu1 %vm641_vm0, %v11206_v50  ;;  %v4010_v48 = vpop.permute.xlu0 %4009 }
 0x8a9   :  { %4100 = vst.msk [vmem:[#allocation2 + $0x78] sm:$0xff] %vm641_vm0, %v11220_v26  ;;  %v11228_v58 = vmul.f32 0.70710677, %v4067_v31  ;;  %v4070_v13 = vadd.f32 %v4054_v42, %v11053_v36  ;;  %v4053_v16 = vmul.f32 %v4010_v48, %v11140_v51 }
 0x8ab   :  { %v4016_v0 = vpop.permute.xlu1 %4015  ;;  %4099 = vst.msk [vmem:[#allocation2 + $0x70] sm:$0xff] %vm641_vm0, %v11228_v58  ;;  %v11234_v23 = vmul.f32 0.70710677, %v4070_v13  ;;  %v4069_v40 = vadd.f32 %v4053_v16, %v11050_v46  ;;  %8595 = vmatprep.mubr.msk.f32.mxu1 %vm641_vm0, %v11228_v58 }
 0x8ac   :  { %v4056_v21 = vmul.f32 %v4016_v0, %v11144_v38  ;;  %8596 = vmatmul.mubr.msk.f32.gmra.mxu1 %vm641_vm0, %v11220_v26  ;;  %v4585_v38 = vld [vmem:[#allocation12 + $0x1d0] sm:$0xff] }
 0x8ad   :  { %v4014_v33 = vpop.permute.xlu0 %4013  ;;  %4102 = vst.msk [vmem:[#allocation2 + $0xc8] sm:$0xff] %vm641_vm0, %v11234_v23  ;;  %v11244_v36 = vmul.f32 0.70710677, %v4069_v40 }
 0x8ae   :  { %v4072_v51 = vadd.f32 %v4056_v21, %v11065_v59  ;;  %v4055_v63 = vmul.f32 %v4014_v33, %v11148_v10  ;;  %v4122_v7 = vld [vmem:[#allocation2 + $0x1f] sm:$0xff]  ;;  %v4123_v46 = vld [vmem:[#allocation2 + $0x27] sm:$0xff] }
 0x8af   :  { %v4020_v37 = vpop.permute.xlu1 %4019  ;;  %8560 = vmatprep.mubr.msk.f32.mxu0 %vm641_vm0, %v4122_v7  ;;  %4101 = vst.msk [vmem:[#allocation2 + $0xc0] sm:$0xff] %vm641_vm0, %v11244_v36  ;;  %8598 = vmatprep.mubr.msk.f32.mxu1 %vm641_vm0, %v11244_v36  ;;  %v4566_v33 = vld [vmem:[#allocation2 + $0x21] sm:$0xff] }
 0x8b0   :  { %v11251_v11 = vmul.f32 0.70710677, %v4072_v51  ;;  %v4071_v32 = vadd.f32 %v4055_v63, %v11062_v49  ;;  %v4058_v45 = vmul.f32 %v4020_v37, %v11152_v55  ;;  %8561 = vmatmul.mubr.msk.f32.vlgmr.msra.gmra.mxu0 %vm641_vm0, %v4123_v46  ;;  %8599 = vmatmul.mubr.msk.f32.gmra.mxu1 %vm641_vm0, %v11234_v23  ;;  %v4567_v51 = vld [vmem:[#allocation2 + $0x29] sm:$0xff]  ;;  %v4569_v7 = vld [vmem:[#allocation2 + $0x79] sm:$0xff] }
 0x8b1   :  { %v4018_v59 = vpop.permute.xlu0 %4017  ;;  %8617 = vmatpush3.msra.mxu0 %v11189_v15 }
 0x8b2   :  { %4104 = vst.msk [vmem:[#allocation2 + $0x118] sm:$0xff] %vm641_vm0, %v11251_v11  ;;  %v11263_v10 = vmul.f32 0.70710677, %v4071_v32  ;;  %v4074_v49 = vadd.f32 %v4058_v45, %v11076_v8  ;;  %v4057_v55 = vmul.f32 %v4018_v59, %v11156_v27  ;;  %8618 = vmatprep.subr.mxu0 %v4585_v38  ;;  %v4124_v3 = vld [vmem:[#allocation2 + $0x6f] sm:$0xff]  ;;  %v4125_v12 = vld [vmem:[#allocation2 + $0x77] sm:$0xff] }
 0x8b3   :  { %8619 = vmatpush3.msra.mxu0 %v4585_v38  ;;  %8563 = vmatprep.mubr.msk.f32.mxu0 %vm641_vm0, %v4124_v3  ;;  %v4568_v63 = vld [vmem:[#allocation2 + $0x71] sm:$0xff] }
 0x8b4   :  { %4103 = vst.msk [vmem:[#allocation2 + $0x110] sm:$0xff] %vm641_vm0, %v11263_v10  ;;  %v11269_v47 = vmul.f32 0.70710677, %v4074_v49  ;;  %v4073_v15 = vadd.f32 %v4057_v55, %v11074_v19  ;;  %8601 = vmatprep.mubr.msk.f32.mxu1 %vm641_vm0, %v11263_v10  ;;  %8564 = vmatmul.mubr.msk.f32.gmra.mxu0 %vm641_vm0, %v4125_v12  ;;  %v4571_v37 = vld [vmem:[#allocation2 + $0xc9] sm:$0xff] }
 0x8b5   :  { %8602 = vmatmul.mubr.msk.f32.gmra.mxu1 %vm641_vm0, %v11251_v11  ;;  %v4024_v27 = vpop.permute.xlu1 %4023  ;;  %8620 = vmatprep.subr.mxu0 %v4584_v34 }
 0x8b6   :  { %4106 = vst.msk [vmem:[#allocation2 + $0x168] sm:$0xff] %vm641_vm0, %v11269_v47  ;;  %v11280_v8 = vmul.f32 0.70710677, %v4073_v15  ;;  %v4060_v60 = vmul.f32 %v4024_v27, %v11160_v22  ;;  %v4126_v19 = vld [vmem:[#allocation2 + $0xbf] sm:$0xff]  ;;  %v4127_v43 = vld [vmem:[#allocation2 + $0xc7] sm:$0xff]  ;;  %8621 = vmatpush3.msra.mxu0 %v4584_v34 }
 0x8b7   :  { %v4022_v53 = vpop.permute.xlu0 %4021  ;;  %8566 = vmatprep.mubr.msk.f32.mxu0 %vm641_vm0, %v4126_v19  ;;  %8622 = vmatprep.subr.mxu0 %v4583_v14  ;;  %v4570_v46 = vld [vmem:[#allocation2 + $0xc1] sm:$0xff] }
 0x8b8   :  { %4105 = vst.msk [vmem:[#allocation2 + $0x160] sm:$0xff] %vm641_vm0, %v11280_v8  ;;  %8604 = vmatprep.mubr.msk.f32.mxu1 %vm641_vm0, %v11280_v8  ;;  %v4076_v25 = vadd.f32 %v4060_v60, %v11089_v18  ;;  %v4059_v39 = vmul.f32 %v4022_v53, %v11164_v20  ;;  %8567 = vmatmul.mubr.msk.f32.gmra.mxu0 %vm641_vm0, %v4127_v43 }
 0x8b9   :  { %8605 = vmatmul.mubr.msk.f32.gmra.mxu1 %vm641_vm0, %v11269_v47  ;;  %v4028_v22 = vpop.permute.xlu1 %4027  ;;  %8623 = vmatpush3.msra.mxu0 %v4583_v14  ;;  %v4573_v32 = vld [vmem:[#allocation2 + $0x119] sm:$0xff] }
 0x8ba   :  { %v11293_v4 = vmul.f32 0.70710677, %v4076_v25  ;;  %v4075_v35 = vadd.f32 %v4059_v39, %v11086_v30  ;;  %v4062_v62 = vmul.f32 %v4028_v22, %v11168_v52  ;;  %8692 = vmatprep.subr.mxu0 %v9701_v1 }
 0x8bb   :  { %v4128_v2 = vld [vmem:[#allocation2 + $0x10f] sm:$0xff]  ;;  %v4129_v28 = vld [vmem:[#allocation2 + $0x117] sm:$0xff] }
 0x8bc   :  { %v4026_v61 = vpop.permute.xlu0 %4025  ;;  %8569 = vmatprep.mubr.msk.f32.mxu0 %vm641_vm0, %v4128_v2  ;;  %4108 = vst.msk [vmem:[#allocation2 + $0x1b8] sm:$0xff] %vm641_vm0, %v11293_v4  ;;  %v11301_v18 = vmul.f32 0.70710677, %v4075_v35  ;;  %v4078_v20 = vadd.f32 %v4062_v62, %v11101_v9  ;;  %v4572_v38 = vld [vmem:[#allocation2 + $0x111] sm:$0xff] }
 0x8bd   :  { %v4061_v5 = vmul.f32 %v4026_v61, %v11171_v41  ;;  %8570 = vmatmul.mubr.msk.f32.gmra.mxu0 %vm641_vm0, %v4129_v28  ;;  %v4575_v59 = vld [vmem:[#allocation2 + $0x169] sm:$0xff] }
 0x8be   :  { %v4032_v30 = vpop.permute.xlu1 %4031  ;;  %4107 = vst.msk [vmem:[#allocation2 + $0x1b0] sm:$0xff] %vm641_vm0, %v11301_v18  ;;  %v11308_v52 = vmul.f32 0.70710677, %v4078_v20  ;;  %8607 = vmatprep.mubr.msk.f32.mxu1 %vm641_vm0, %v11301_v18 }
 0x8bf   :  { %v4077_v29 = vadd.f32 %v4061_v5, %v11098_v24  ;;  %v4064_v17 = vmul.f32 %v4032_v30, %v11176_v56  ;;  %v4130_v31 = vld [vmem:[#allocation2 + $0x15f] sm:$0xff]  ;;  %v4131_v42 = vld [vmem:[#allocation2 + $0x167] sm:$0xff]  ;;  %8608 = vmatmul.mubr.msk.f32.gmra.mxu1 %vm641_vm0, %v11293_v4 }
 0x8c0   :  { %v4030_v9 = vpop.permute.xlu0 %4029  ;;  %8572 = vmatprep.mubr.msk.f32.mxu0 %vm641_vm0, %v4130_v31  ;;  %4110 = vst.msk [vmem:[#allocation2 + $0x208] sm:$0xff] %vm641_vm0, %v11308_v52  ;;  %v4574_v45 = vld [vmem:[#allocation2 + $0x161] sm:$0xff]  ;;  %v11369_v31 = vld [vmem:[#allocation13 + $0x4] ss:$0 sm:$0xff] }
 0x8c1   :  { %v11319_v41 = vmul.f32 0.70710677, %v4077_v29  ;;  %v4080_v24 = vadd.f32 %v4064_v17, %v11111_v57  ;;  %v4063_v56 = vmul.f32 %v4030_v9, %v11180_v44  ;;  %8573 = vmatmul.mubr.msk.f32.gmra.mxu0 %vm641_vm0, %v4131_v42 }
 0x8c3   :  { %4109 = vst.msk [vmem:[#allocation2 + $0x200] sm:$0xff] %vm641_vm0, %v11319_v41  ;;  %v11326_v48 = vmul.f32 0.70710677, %v4080_v24  ;;  %v4079_v13 = vadd.f32 %v4063_v56, %v11109_v6  ;;  %8610 = vmatprep.mubr.msk.f32.mxu1 %vm641_vm0, %v11319_v41  ;;  %v4577_v55 = vld [vmem:[#allocation2 + $0x1b9] sm:$0xff] }
 0x8c4   :  { %8611 = vmatmul.mubr.msk.f32.gmra.mxu1 %vm641_vm0, %v11308_v52 }
 0x8c5   :  { %4112 = vst.msk [vmem:[#allocation2 + $0x258] sm:$0xff] %vm641_vm0, %v11326_v48  ;;  %v11335_v57 = vmul.f32 0.70710677, %v4079_v13  ;;  %v4132_v44 = vld [vmem:[#allocation2 + $0x1af] sm:$0xff]  ;;  %v4133_v16 = vld [vmem:[#allocation2 + $0x1b7] sm:$0xff] }
 0x8c6   :  { %8575 = vmatprep.mubr.msk.f32.mxu0 %vm641_vm0, %v4132_v44  ;;  %v4576_v49 = vld [vmem:[#allocation2 + $0x1b1] sm:$0xff] }
 0x8c7   :  { %4111 = vst.msk [vmem:[#allocation2 + $0x250] sm:$0xff] %vm641_vm0, %v11335_v57  ;;  %8613 = vmatprep.mubr.msk.f32.mxu1 %vm641_vm0, %v11335_v57  ;;  %8576 = vmatmul.mubr.msk.f32.gmra.mxu0 %vm641_vm0, %v4133_v16  ;;  %v4579_v12 = vld [vmem:[#allocation2 + $0x209] sm:$0xff] }
 0x8c8   :  { %8614 = vmatmul.mubr.msk.f32.gmra.mxu1 %vm641_vm0, %v11326_v48 }
 0x8c9   :  { %8656 = vmatprep.mubr.msk.f32.mxu1 %vm9703_vm4, %v9701_v1 }
 0x8ca   :  { %v4134_v6 = vld [vmem:[#allocation2 + $0x1ff] sm:$0xff]  ;;  %v4135_v0 = vld [vmem:[#allocation2 + $0x207] sm:$0xff] }
 0x8cb   :  { %8578 = vmatprep.mubr.msk.f32.mxu0 %vm641_vm0, %v4134_v6  ;;  %v4578_v3 = vld [vmem:[#allocation2 + $0x201] sm:$0xff] }
 0x8cc   :  { %8579 = vmatmul.mubr.msk.f32.gmra.mxu0 %vm641_vm0, %v4135_v0  ;;  %v4581_v15 = vld [vmem:[#allocation2 + $0x259] sm:$0xff] }
 0x8ce   :  { %v4136_v40 = vld [vmem:[#allocation2 + $0x24f] sm:$0xff]  ;;  %v4137_v21 = vld [vmem:[#allocation2 + $0x257] sm:$0xff] }
 0x8cf   :  { %8581 = vmatprep.mubr.msk.f32.mxu0 %vm641_vm0, %v4136_v40  ;;  %v4580_v34 = vld [vmem:[#allocation2 + $0x251] sm:$0xff] }
 0x8d0   :  { %8582 = vmatmul.mubr.msk.f32.gmra.mxu0 %vm641_vm0, %v4137_v21 }
 0x8d1   :  { %8624 = vmatprep.mubr.msk.f32.mxu0 %vm641_vm0, %v4566_v33 }
 0x8d4   :  { %8625 = vmatmul.mubr.msk.f32.vlgmr.msra.gmra.mxu0 %vm641_vm0, %v4567_v51 }
 0x8d5   :  { %8627 = vmatprep.mubr.msk.f32.mxu0 %vm641_vm0, %v4568_v63 }
 0x8d8   :  { %8628 = vmatmul.mubr.msk.f32.gmra.mxu0 %vm641_vm0, %v4569_v7 }
 0x8d9   :  { %8630 = vmatprep.mubr.msk.f32.mxu0 %vm641_vm0, %v4570_v46 }
 0x8dc   :  { %8631 = vmatmul.mubr.msk.f32.gmra.mxu0 %vm641_vm0, %v4571_v37 }
 0x8dd   :  { %8633 = vmatprep.mubr.msk.f32.mxu0 %vm641_vm0, %v4572_v38 }
 0x8e0   :  { %8634 = vmatmul.mubr.msk.f32.gmra.mxu0 %vm641_vm0, %v4573_v32 }
 0x8e1   :  { %8636 = vmatprep.mubr.msk.f32.mxu0 %vm641_vm0, %v4574_v45 }
 0x8e4   :  { %8637 = vmatmul.mubr.msk.f32.gmra.mxu0 %vm641_vm0, %v4575_v59 }
 0x8e5   :  { %8639 = vmatprep.mubr.msk.f32.mxu0 %vm641_vm0, %v4576_v49 }
 0x8e8   :  { %8640 = vmatmul.mubr.msk.f32.gmra.mxu0 %vm641_vm0, %v4577_v55 }
 0x8e9   :  { %8642 = vmatprep.mubr.msk.f32.mxu0 %vm641_vm0, %v4578_v3 }
 0x8ec   :  { %8643 = vmatmul.mubr.msk.f32.gmra.mxu0 %vm641_vm0, %v4579_v12 }
 0x8ed   :  { %8645 = vmatprep.mubr.msk.f32.mxu0 %vm641_vm0, %v4580_v34 }
 0x8f0   :  { %8646 = vmatmul.mubr.msk.f32.gmra.mxu0 %vm641_vm0, %v4581_v15 }
 0x8f1   :  { %8700 = vmatprep.mubr.msk.f32.mxu0 %vm9703_vm4, %v9701_v1 }
 0x968   :  { %v8594_v19 = vpop.f32.mrf.mxu1 }
 0x96a   :  { %v4471_v14 = vpop.f32.mrf.mxu1 }
 0x96c   :  { %v8597_v39 = vpop.f32.mrf.mxu1 }
 0x96e   :  { %v4481_v62 = vpop.f32.mrf.mxu1 }
 0x970   :  { %v8562_v27 = vpop.f32.mrf.mxu0  ;;  %v8600_v61 = vpop.f32.mrf.mxu1 }
 0x971   :  { %v4337_v24 = vadd.f32 %v8562_v27, %v11369_v31 }
 0x972   :  { %v4257_v60 = vpop.f32.mrf.mxu0  ;;  %v4491_v5 = vpop.f32.mrf.mxu1 }
 0x973   :  { %v4336_v44 = vadd.f32 %v11369_v31, %v4257_v60  ;;  %v4551_v40 = vadd.f32 %v8594_v19, %v4337_v24 }
 0x974   :  { %v8565_v43 = vpop.f32.mrf.mxu0 }
 0x975   :  { %v8603_v17 = vpop.f32.mrf.mxu1  ;;  %v4339_v6 = vadd.f32 %v8565_v43, %v11369_v31  ;;  %v4550_v63 = vadd.f32 %v4471_v14, %v4336_v44 }
 0x976   :  { %v4267_v53 = vpop.f32.mrf.mxu0 }
 0x977   :  { %v4501_v56 = vpop.f32.mrf.mxu1  ;;  %v4338_v33 = vadd.f32 %v11369_v31, %v4267_v53  ;;  %v4553_v45 = vadd.f32 %v8597_v39, %v4339_v6 }
 0x978   :  { %v8568_v25 = vpop.f32.mrf.mxu0 }
 0x979   :  { %v8606_v0 = vpop.f32.mrf.mxu1  ;;  %v4341_v7 = vadd.f32 %v8568_v25, %v11369_v31  ;;  %v4552_v34 = vadd.f32 %v4481_v62, %v4338_v33 }
 0x97a   :  { %v4277_v22 = vpop.f32.mrf.mxu0 }
 0x97b   :  { %v4511_v37 = vpop.f32.mrf.mxu1  ;;  %v4340_v59 = vadd.f32 %v11369_v31, %v4277_v22  ;;  %v4555_v60 = vadd.f32 %v8600_v61, %v4341_v7 }
 0x97d   :  { %v8571_v35 = vpop.f32.mrf.mxu0  ;;  %v4554_v22 = vadd.f32 %v4491_v5, %v4340_v59 }
 0x97e   :  { %v4343_v15 = vadd.f32 %v8571_v35, %v11369_v31 }
 0x97f   :  { %v4287_v2 = vpop.f32.mrf.mxu0  ;;  %v8609_v19 = vpop.f32.mrf.mxu1 }
 0x980   :  { %v4342_v25 = vadd.f32 %v11369_v31, %v4287_v2  ;;  %v4557_v6 = vadd.f32 %v8603_v17, %v4343_v15 }
 0x981   :  { %v8574_v28 = vpop.f32.mrf.mxu0 }
 0x982   :  { %v4345_v35 = vadd.f32 %v8574_v28, %v11369_v31  ;;  %v4556_v7 = vadd.f32 %v4501_v56, %v4342_v25 }
 0x983   :  { %v4297_v20 = vpop.f32.mrf.mxu0 }
 0x984   :  { %v4344_v2 = vadd.f32 %v11369_v31, %v4297_v20  ;;  %v4559_v59 = vadd.f32 %v8606_v0, %v4345_v35 }
 0x986   :  { %v4558_v15 = vadd.f32 %v4511_v37, %v4344_v2 }
 0x987   :  { %v11365_v30 = vpop.f32.mrf.mxu0 }
 0x988   :  { %v4347_v20 = vadd.f32 %v11365_v30, %v11369_v31 }
 0x989   :  { %v11367_v29 = vpop.f32.mrf.mxu0 }
 0x98a   :  { %v4346_v56 = vadd.f32 %v11369_v31, %v11367_v29 }
 0x98c   :  { %v11371_v42 = vpop.f32.mrf.mxu0 }
 0x98e   :  { %v11373_v9 = vpop.f32.mrf.mxu0 }
 0x990   :  { %v11376_v13 = vpop.f32.mrf.mxu0 }
 0x992   :  { %v11379_v16 = vpop.f32.mrf.mxu0 }
 0x994   :  { %v8626_v21 = vpop.f32.mrf.mxu0 }
 0x995   :  { %v11383_v51 = vadd.f32 %v8626_v21, %v4551_v40  ;;  %v4521_v40 = vpop.f32.mrf.mxu1 }
 0x996   :  { %v4701_v46 = vpop.f32.mrf.mxu0 }
 0x997   :  { %v4797_v38 = vsub.f32 0.0, %v11383_v51  ;;  %v11387_v32 = vadd.f32 %v4701_v46, %v4550_v63  ;;  %v8612_v17 = vpop.f32.mrf.mxu1 }
 0x998   :  { %v8629_v49 = vpop.f32.mrf.mxu0 }
 0x999   :  { %v4814_v55 = vmul.f32 1.442695, %v4797_v38  ;;  %v4796_v3 = vsub.f32 0.0, %v11387_v32  ;;  %v11391_v12 = vadd.f32 %v8629_v49, %v4553_v45  ;;  %v4531_v25 = vpop.f32.mrf.mxu1 }
 0x99a   :  { %v4711_v27 = vpop.f32.mrf.mxu0 }
 0x99b   :  { %9177 = vpow2.f32 %v4814_v55  ;;  %v4812_v43 = vmul.f32 1.442695, %v4796_v3  ;;  %v4799_v14 = vsub.f32 0.0, %v11391_v12  ;;  %v11395_v53 = vadd.f32 %v4711_v27, %v4552_v34 }
 0x99c   :  { %v8632_v39 = vpop.f32.mrf.mxu0 }
 0x99d   :  { %9179 = vpow2.f32 %v4812_v43  ;;  %v4818_v24 = vmul.f32 1.442695, %v4799_v14  ;;  %v4798_v44 = vsub.f32 0.0, %v11395_v53  ;;  %v11399_v62 = vadd.f32 %v8632_v39, %v4555_v60 }
 0x99e   :  { %v4721_v61 = vpop.f32.mrf.mxu0  ;;  %v4349_v43 = vadd.f32 %v11371_v42, %v11369_v31  ;;  %v4348_v42 = vadd.f32 %v11369_v31, %v11373_v9 }
 0x99f   :  { %9181 = vpow2.f32 %v4818_v24  ;;  %v4816_v21 = vmul.f32 1.442695, %v4798_v44  ;;  %v4801_v33 = vsub.f32 0.0, %v11399_v62  ;;  %v11403_v63 = vadd.f32 %v4721_v61, %v4554_v22 }
 0x9a0   :  { %v8635_v5 = vpop.f32.mrf.mxu0  ;;  %v4561_v24 = vadd.f32 %v8609_v19, %v4347_v20  ;;  %v4560_v44 = vadd.f32 %v4521_v40, %v4346_v56 }
 0x9a1   :  { %9183 = vpow2.f32 %v4816_v21  ;;  %v4822_v46 = vmul.f32 1.442695, %v4801_v33  ;;  %v4800_v38 = vsub.f32 0.0, %v11403_v63  ;;  %v11407_v45 = vadd.f32 %v8635_v5, %v4557_v6 }
 0x9a2   :  { %v4731_v28 = vpop.f32.mrf.mxu0  ;;  %v4351_v33 = vadd.f32 %v11376_v13, %v11369_v31 }
 0x9a3   :  { %9185 = vpow2.f32 %v4822_v46  ;;  %v4820_v49 = vmul.f32 1.442695, %v4800_v38  ;;  %v4803_v55 = vsub.f32 0.0, %v11407_v45  ;;  %v11410_v3 = vadd.f32 %v4731_v28, %v4556_v7  ;;  %v8615_v46 = vpop.f32.mrf.mxu1 }
 0x9a4   :  { %v8638_v34 = vpop.f32.mrf.mxu0  ;;  %v4563_v7 = vadd.f32 %v8612_v17, %v4349_v43 }
 0x9a5   :  { %9187 = vpow2.f32 %v4820_v49  ;;  %v4826_v27 = vmul.f32 1.442695, %v4803_v55  ;;  %v4802_v60 = vsub.f32 0.0, %v11410_v3  ;;  %v11417_v0 = vadd.f32 %v8638_v34, %v4559_v59 }
 0x9a6   :  { %v4741_v14 = vpop.f32.mrf.mxu0  ;;  %v4350_v59 = vadd.f32 %v11369_v31, %v11379_v16  ;;  %v4562_v34 = vadd.f32 %v4531_v25, %v4348_v42 }
 0x9a7   :  { %9189 = vpow2.f32 %v4826_v27  ;;  %v4824_v39 = vmul.f32 1.442695, %v4802_v60  ;;  %v4805_v30 = vsub.f32 0.0, %v11417_v0  ;;  %v11422_v22 = vadd.f32 %v4741_v14, %v4558_v15  ;;  %v4541_v60 = vpop.f32.mrf.mxu1 }
 0x9a8   :  { %v9178_v29 = vpop.eup %9177  ;;  %v8641_v37 = vpop.f32.mrf.mxu0  ;;  %v4565_v27 = vadd.f32 %v8615_v46, %v4351_v33 }
 0x9a9   :  { %v4845_v35 = vadd.f32 1.0, %v9178_v29  ;;  %9191 = vpow2.f32 %v4824_v39  ;;  %v4830_v61 = vmul.f32 1.442695, %v4805_v30  ;;  %v4804_v6 = vsub.f32 0.0, %v11422_v22 }
 0x9aa   :  { %v9180_v21 = vpop.eup %9179  ;;  %v11429_v2 = vadd.f32 %v8641_v37, %v4561_v24  ;;  %v4751_v5 = vpop.f32.mrf.mxu0  ;;  %v4564_v29 = vadd.f32 %v4541_v60, %v4350_v59 }
 0x9ab   :  { %9193 = vrcp.f32 %v4845_v35  ;;  %v4844_v19 = vadd.f32 1.0, %v9180_v21  ;;  %v4828_v40 = vmul.f32 1.442695, %v4804_v6  ;;  %v11431_v38 = vadd.f32 %v4751_v5, %v4560_v44 }
 0x9ac   :  { %v9182_v28 = vpop.eup %9181  ;;  %9195 = vpow2.f32 %v4830_v61  ;;  %v4807_v9 = vsub.f32 0.0, %v11429_v2  ;;  %v8644_v49 = vpop.f32.mrf.mxu0 }
 0x9ad   :  { %9197 = vrcp.f32 %v4844_v19  ;;  %v4847_v13 = vadd.f32 1.0, %v9182_v28  ;;  %v4806_v55 = vsub.f32 0.0, %v11431_v38  ;;  %v11437_v20 = vadd.f32 %v8644_v49, %v4563_v7 }
 0x9ae   :  { %v9184_v17 = vpop.eup %9183  ;;  %9199 = vpow2.f32 %v4828_v40  ;;  %v4834_v56 = vmul.f32 1.442695, %v4807_v9  ;;  %v4761_v15 = vpop.f32.mrf.mxu0 }
 0x9af   :  { %9201 = vrcp.f32 %v4847_v13  ;;  %v4846_v43 = vadd.f32 1.0, %v9184_v17  ;;  %v4832_v31 = vmul.f32 1.442695, %v4806_v55  ;;  %v4809_v16 = vsub.f32 0.0, %v11437_v20 }
 0x9b0   :  { %v9186_v14 = vpop.eup %9185  ;;  %9203 = vpow2.f32 %v4834_v56  ;;  %v11440_v39 = vadd.f32 %v4761_v15, %v4562_v34  ;;  %v8647_v30 = vpop.f32.mrf.mxu0 }
 0x9b1   :  { %9205 = vrcp.f32 %v4846_v43  ;;  %v4849_v24 = vadd.f32 1.0, %v9186_v14  ;;  %v4838_v37 = vmul.f32 1.442695, %v4809_v16  ;;  %v11442_v44 = vadd.f32 %v8647_v30, %v4565_v27 }
 0x9b2   :  { %v9188_v25 = vpop.eup %9187  ;;  %9207 = vpow2.f32 %v4832_v31  ;;  %v4808_v35 = vsub.f32 0.0, %v11440_v39  ;;  %v4771_v61 = vpop.f32.mrf.mxu0 }
 0x9b3   :  { %9209 = vrcp.f32 %v4849_v24  ;;  %v4848_v6 = vadd.f32 1.0, %v9188_v25  ;;  %v4811_v21 = vsub.f32 0.0, %v11442_v44  ;;  %v11446_v42 = vadd.f32 %v4771_v61, %v4564_v29 }
 0x9b4   :  { %v9190_v33 = vpop.eup %9189  ;;  %9211 = vpow2.f32 %v4838_v37  ;;  %v4836_v5 = vmul.f32 1.442695, %v4808_v35 }
 0x9b5   :  { %9213 = vrcp.f32 %v4848_v6  ;;  %v4851_v7 = vadd.f32 1.0, %v9190_v33  ;;  %v4842_v46 = vmul.f32 1.442695, %v4811_v21  ;;  %v4810_v19 = vsub.f32 0.0, %v11446_v42 }
 0x9b6   :  { %v9192_v40 = vpop.eup %9191  ;;  %9215 = vpow2.f32 %v4836_v5 }
 0x9b7   :  { %9217 = vrcp.f32 %v4851_v7  ;;  %v4850_v28 = vadd.f32 1.0, %v9192_v40  ;;  %v4840_v59 = vmul.f32 1.442695, %v4810_v19 }
 0x9b8   :  { %v9194_v9 = vpop.eup %9193  ;;  %9219 = vpow2.f32 %v4842_v46 }
 0x9b9   :  { %v9196_v49 = vpop.eup %9195  ;;  %9221 = vrcp.f32 %v4850_v28  ;;  %4894 = vrot.lane.b32.xlu1 %v9194_v9, %s9702_s14 }
 0x9ba   :  { %v9198_v13 = vpop.eup %9197  ;;  %v4853_v55 = vadd.f32 1.0, %v9196_v49  ;;  %9223 = vpow2.f32 %v4840_v59  ;;  %v5072_v49 = vld [vmem:[#allocation15 + $0x18] sm:$0xff] }
 0x9bb   :  { %v9200_v17 = vpop.eup %9199  ;;  %4892 = vrot.lane.b32.xlu0 %v9198_v13, %s9702_s14  ;;  %8649 = vmatpush3.msra.mxu1 %v5072_v49  ;;  %v5071_v13 = vld [vmem:[#allocation15 + $0x10] sm:$0xff] }
 0x9bc   :  { %v9202_v56 = vpop.eup %9201  ;;  %9225 = vrcp.f32 %v4853_v55  ;;  %v4852_v34 = vadd.f32 1.0, %v9200_v17  ;;  %8650 = vmatprep.subr.mxu1 %v9701_v1  ;;  %v5070_v55 = vld [vmem:[#allocation15 + $0x8] sm:$0xff]  ;;  %v5069_v17 = vld [vmem:[#allocation15] sm:$0xff] }
 0x9bd   :  { %v9204_v15 = vpop.eup %9203  ;;  %4898 = vrot.lane.b32.xlu1 %v9202_v56, %s9702_s14  ;;  %8651 = vmatpush3.msra.mxu1 %v5071_v13  ;;  %v5443_v56 = vld [vmem:[#allocation27 + $0x18] sm:$0xff] }
 0x9be   :  { %v9206_v27 = vpop.eup %9205  ;;  %9227 = vrcp.f32 %v4852_v34  ;;  %v4855_v60 = vadd.f32 1.0, %v9204_v15  ;;  %8652 = vmatprep.subr.mxu1 %v9701_v1  ;;  %8693 = vmatpush3.msra.mxu0 %v5443_v56 }
 0x9bf   :  { %v9208_v43 = vpop.eup %9207  ;;  %4896 = vrot.lane.b32.xlu0 %v9206_v27, %s9702_s14  ;;  %8653 = vmatpush3.msra.mxu1 %v5070_v55 }
 0x9c0   :  { %v9210_v31 = vpop.eup %9209  ;;  %9229 = vrcp.f32 %v4855_v60  ;;  %v4854_v16 = vadd.f32 1.0, %v9208_v43  ;;  %8654 = vmatprep.subr.mxu1 %v9701_v1  ;;  %8694 = vmatprep.subr.mxu0 %v9701_v1 }
 0x9c1   :  { %v9212_v14 = vpop.eup %9211  ;;  %4902 = vrot.lane.b32.xlu1 %v9210_v31, %s9702_s14  ;;  %8655 = vmatpush3.msra.mxu1 %v5069_v17 }
 0x9c2   :  { %v9214_v30 = vpop.eup %9213  ;;  %9231 = vrcp.f32 %v4854_v16  ;;  %v4857_v29 = vadd.f32 1.0, %v9212_v14  ;;  %8659 = vmatprep.subr.mxu1 %v9701_v1 }
 0x9c3   :  { %v9216_v24 = vpop.eup %9215  ;;  %4900 = vrot.lane.b32.xlu0 %v9214_v30, %s9702_s14 }
 0x9c4   :  { %v9218_v37 = vpop.eup %9217  ;;  %9233 = vrcp.f32 %v4857_v29  ;;  %v4856_v25 = vadd.f32 1.0, %v9216_v24 }
 0x9c5   :  { %v9220_v35 = vpop.eup %9219  ;;  %4906 = vrot.lane.b32.xlu1 %v9218_v37, %s9702_s14 }
 0x9c6   :  { %v9222_v61 = vpop.eup %9221  ;;  %9235 = vrcp.f32 %v4856_v25  ;;  %v4859_v6 = vadd.f32 1.0, %v9220_v35 }
 0x9c7   :  { %v9224_v21 = vpop.eup %9223  ;;  %4904 = vrot.lane.b32.xlu0 %v9222_v61, %s9702_s14 }
 0x9c8   :  { %9237 = vrcp.f32 %v4859_v6  ;;  %v4858_v33 = vadd.f32 1.0, %v9224_v21 }
 0x9c9   :  { %v9226_v5 = vpop.eup %9225 }
 0x9ca   :  { %9239 = vrcp.f32 %v4858_v33  ;;  %4910 = vrot.lane.b32.xlu1 %v9226_v5, %s9702_s14 }
 0x9cb   :  { %v9228_v7 = vpop.eup %9227 }
 0x9cc   :  { %4908 = vrot.lane.b32.xlu0 %v9228_v7, %s9702_s14 }
 0x9cd   :  { %v9230_v46 = vpop.eup %9229 }
 0x9ce   :  { %4914 = vrot.lane.b32.xlu1 %v9230_v46, %s9702_s14 }
 0x9cf   :  { %v9232_v19 = vpop.eup %9231 }
 0x9d0   :  { %4912 = vrot.lane.b32.xlu0 %v9232_v19, %s9702_s14 }
 0x9d1   :  { %v9234_v40 = vpop.eup %9233 }
 0x9d2   :  { %4918 = vrot.lane.b32.xlu1 %v9234_v40, %s9702_s14 }
 0x9d3   :  { %v9236_v28 = vpop.eup %9235 }
 0x9d4   :  { %4916 = vrot.lane.b32.xlu0 %v9236_v28, %s9702_s14 }
 0x9d5   :  { %v9238_v59 = vpop.eup %9237 }
 0x9d6   :  { %4922 = vrot.lane.b32.xlu1 %v9238_v59, %s9702_s14 }
 0x9d7   :  { %v9240_v9 = vpop.eup %9239 }
 0x9d8   :  { %4920 = vrot.lane.b32.xlu0 %v9240_v9, %s9702_s14 }
 0xa2b   :  { %v4895_v34 = vpop.permute.xlu1 %4894 }
 0xa2c   :  { %v4941_v15 = vmul.f32 %v4895_v34, %v11383_v51 }
 0xa2d   :  { %v4893_v27 = vpop.permute.xlu0 %4892 }
 0xa2e   :  { %v4940_v60 = vmul.f32 %v4893_v27, %v11387_v32  ;;  %v4957_v14 = vadd.f32 %v4941_v15, %v11206_v50 }
 0xa2f   :  { %v4899_v43 = vpop.permute.xlu1 %4898 }
 0xa30   :  { %v4956_v31 = vadd.f32 %v4940_v60, %v11212_v54  ;;  %v4943_v16 = vmul.f32 %v4899_v43, %v11391_v12  ;;  %v4973_v61 = vmul.f32 0.70710677, %v4957_v14 }
 0xa31   :  { %v4897_v30 = vpop.permute.xlu0 %4896 }
 0xa32   :  { %v4942_v29 = vmul.f32 %v4897_v30, %v11395_v53  ;;  %v4959_v24 = vadd.f32 %v4943_v16, %v11220_v26  ;;  %v4972_v25 = vmul.f32 0.70710677, %v4956_v31 }
 0xa33   :  { %v4903_v37 = vpop.permute.xlu1 %4902 }
 0xa34   :  { %v4958_v35 = vadd.f32 %v4942_v29, %v11228_v58  ;;  %v4945_v51 = vmul.f32 %v4903_v37, %v11399_v62  ;;  %v4975_v21 = vmul.f32 0.70710677, %v4959_v24  ;;  %v4988_v33 = vsel %vm641_vm0, %v4972_v25, 0.0 }
 0xa35   :  { %v4901_v32 = vpop.permute.xlu0 %4900  ;;  %v4989_v58 = vsel %vm641_vm0, %v4973_v61, 0.0 }
 0xa36   :  { %v4974_v6 = vmul.f32 0.70710677, %v4958_v35  ;;  %v4961_v54 = vadd.f32 %v4945_v51, %v11234_v23  ;;  %v4944_v12 = vmul.f32 %v4901_v32, %v11403_v63  ;;  %v4990_v63 = vadd.f32 %v4989_v58, %v4988_v33 }
 0xa37   :  { %v4907_v50 = vpop.permute.xlu1 %4906  ;;  %v4998_v40 = vsel %vm641_vm0, %v4975_v21, 0.0 }
 0xa38   :  { %v4977_v53 = vmul.f32 0.70710677, %v4961_v54  ;;  %v4960_v26 = vadd.f32 %v4944_v12, %v11244_v36  ;;  %v4947_v5 = vmul.f32 %v4907_v50, %v11407_v45  ;;  %v4997_v62 = vsel %vm641_vm0, %v4974_v6, 0.0 }
 0xa39   :  { %v4905_v7 = vpop.permute.xlu0 %4904  ;;  %v4999_v49 = vadd.f32 %v4998_v40, %v4997_v62 }
 0xa3a   :  { %v4976_v46 = vmul.f32 0.70710677, %v4960_v26  ;;  %v4963_v19 = vadd.f32 %v4947_v5, %v11251_v11  ;;  %v4946_v23 = vmul.f32 %v4905_v7, %v11410_v3  ;;  %v5007_v28 = vsel %vm641_vm0, %v4977_v53, 0.0 }
 0xa3b   :  { %v4991_v3 = vrot.slane %v4990_v63, 4  ;;  %v5000_v43 = vrot.slane %v4999_v49, 4 }
 0xa3c   :  { %v5006_v59 = vsel %vm641_vm0, %v4976_v46, 0.0  ;;  %v4979_v36 = vmul.f32 0.70710677, %v4963_v19  ;;  %v4962_v45 = vadd.f32 %v4946_v23, %v11263_v10  ;;  %v4911_v9 = vpop.permute.xlu1 %4910 }
 0xa3d   :  { %v5008_v13 = vadd.f32 %v5007_v28, %v5006_v59  ;;  %v4949_v55 = vmul.f32 %v4911_v9, %v11417_v0  ;;  %v4992_v24 = vadd.f32 %v4991_v3, %v4990_v63  ;;  %v5001_v51 = vadd.f32 %v5000_v43, %v4999_v49 }
 0xa3e   :  { %v4978_v17 = vmul.f32 0.70710677, %v4962_v45  ;;  %v4909_v56 = vpop.permute.xlu0 %4908  ;;  %v5016_v34 = vsel %vm641_vm0, %v4979_v36, 0.0 }
 0xa3f   :  { %v4965_v11 = vadd.f32 %v4949_v55, %v11269_v47  ;;  %v4948_v27 = vmul.f32 %v4909_v56, %v11422_v22  ;;  %v5009_v31 = vrot.slane %v5008_v13, 4  ;;  %v4993_v50 = vrot.slane %v4992_v24, 2 }
 0xa40   :  { %v5015_v15 = vsel %vm641_vm0, %v4978_v17, 0.0  ;;  %v4915_v60 = vpop.permute.xlu1 %4914  ;;  %v5002_v26 = vrot.slane %v5001_v51, 2 }
 0xa41   :  { %v5017_v10 = vadd.f32 %v5016_v34, %v5015_v15  ;;  %v4981_v16 = vmul.f32 0.70710677, %v4965_v11  ;;  %v4964_v14 = vadd.f32 %v4948_v27, %v11280_v8  ;;  %v4951_v0 = vmul.f32 %v4915_v60, %v11429_v2 }
 0xa42   :  { %v4913_v30 = vpop.permute.xlu0 %4912  ;;  %v5010_v22 = vadd.f32 %v5009_v31, %v5008_v13  ;;  %v5003_v36 = vadd.f32 %v5002_v26, %v5001_v51 }
 0xa43   :  { %v5018_v29 = vrot.slane %v5017_v10, 4  ;;  %v4980_v47 = vmul.f32 0.70710677, %v4964_v14  ;;  %v4967_v37 = vadd.f32 %v4951_v0, %v11293_v4  ;;  %v4950_v25 = vmul.f32 %v4913_v30, %v11431_v38 }
 0xa44   :  { %v4919_v35 = vpop.permute.xlu1 %4918  ;;  %v5025_v32 = vsel %vm641_vm0, %v4981_v16, 0.0  ;;  %v5011_v5 = vrot.slane %v5010_v22, 2  ;;  %v5004_v15 = vrot.slane %v5003_v36, 1 }
 0xa45   :  { %v4953_v61 = vmul.f32 %v4919_v35, %v11437_v20  ;;  %v5024_v6 = vsel %vm641_vm0, %v4980_v47, 0.0  ;;  %v4983_v8 = vmul.f32 0.70710677, %v4967_v37  ;;  %v4966_v2 = vadd.f32 %v4950_v25, %v11301_v18 }
 0xa46   :  { %v4917_v54 = vpop.permute.xlu0 %4916  ;;  %v5019_v12 = vadd.f32 %v5018_v29, %v5017_v10  ;;  %v5026_v21 = vadd.f32 %v5025_v32, %v5024_v6  ;;  %v5012_v45 = vadd.f32 %v5011_v5, %v5010_v22 }
 0xa47   :  { %v4982_v33 = vmul.f32 0.70710677, %v4966_v2  ;;  %v4969_v4 = vadd.f32 %v4953_v61, %v11308_v52  ;;  %v4952_v38 = vmul.f32 %v4917_v54, %v11440_v39  ;;  %v5034_v58 = vsel %vm641_vm0, %v4983_v8, 0.0 }
 0xa48   :  { %v4923_v53 = vpop.permute.xlu1 %4922  ;;  %v5027_v20 = vrot.slane %v5026_v21, 4  ;;  %v5020_v23 = vrot.slane %v5019_v12, 2  ;;  %v4994_v52 = vadd.f32 %v4993_v50, %v4992_v24  ;;  %v5013_v60 = vrot.slane %v5012_v45, 1 }
 0xa49   :  { %v5033_v7 = vsel %vm641_vm0, %v4982_v33, 0.0  ;;  %v4985_v62 = vmul.f32 0.70710677, %v4969_v4  ;;  %v4968_v18 = vadd.f32 %v4952_v38, %v11319_v41  ;;  %v4955_v46 = vmul.f32 %v4923_v53, %v11442_v44 }
 0xa4a   :  { %v4921_v19 = vpop.permute.xlu0 %4920  ;;  %v5028_v63 = vadd.f32 %v5027_v20, %v5026_v21  ;;  %v5035_v40 = vadd.f32 %v5034_v58, %v5033_v7  ;;  %v5021_v17 = vadd.f32 %v5020_v23, %v5019_v12  ;;  %v5014_v37 = vadd.f32 %v5013_v60, %v5012_v45  ;;  %v5183_v23 = vld [vmem:[#allocation18 + $0x18] sm:$0xff]  ;;  %v5267_v45 = vld [vmem:[#allocation21] sm:$0xff] }
 0xa4b   :  { %v4984_v28 = vmul.f32 0.70710677, %v4968_v18  ;;  %v4971_v39 = vadd.f32 %v4955_v46, %v11326_v48  ;;  %v4954_v59 = vmul.f32 %v4921_v19, %v11446_v42  ;;  %v5043_v13 = vsel %vm641_vm0, %v4985_v62, 0.0 }
 0xa4c   :  { %v5029_v9 = vrot.slane %v5028_v63, 2  ;;  %v5036_v49 = vrot.slane %v5035_v40, 4  ;;  %v4995_v42 = vrot.slane %v4994_v52, 1  ;;  %v5022_v10 = vrot.slane %v5021_v17, 1 }
 0xa4d   :  { %v5042_v41 = vsel %vm641_vm0, %v4984_v28, 0.0  ;;  %v4987_v55 = vmul.f32 0.70710677, %v4971_v39  ;;  %v4970_v44 = vadd.f32 %v4954_v59, %v11335_v57  ;;  %v5005_v57 = vadd.f32 %v5004_v15, %v5003_v36  ;;  %v5180_v28 = vld [vmem:[#allocation18] sm:$0xff]  ;;  %v5269_v59 = vld [vmem:[#allocation21 + $0x10] sm:$0xff]  ;;  %v5268_v36 = vld [vmem:[#allocation21 + $0x8] sm:$0xff] }
 0xa4e   :  { %v5037_v56 = vadd.f32 %v5036_v49, %v5035_v40  ;;  %v5044_v11 = vadd.f32 %v5043_v13, %v5042_v41  ;;  %v5030_v3 = vadd.f32 %v5029_v9, %v5028_v63  ;;  %v4996_v25 = vadd.f32 %v4995_v42, %v4994_v52  ;;  %v5182_v40 = vld [vmem:[#allocation18 + $0x10] sm:$0xff]  ;;  %v5181_v52 = vld [vmem:[#allocation18 + $0x8] sm:$0xff]  ;;  %v5270_v39 = vld [vmem:[#allocation21 + $0x18] sm:$0xff] }
 0xa4f   :  { %v4986_v34 = vmul.f32 0.70710677, %v4970_v44  ;;  %v5052_v43 = vsel %vm641_vm0, %v4987_v55, 0.0  ;;  %v5023_v35 = vadd.f32 %v5022_v10, %v5021_v17  ;;  %v5062_v32 = vmul.f32 0.0625, %v5005_v57  ;;  %v5357_v9 = vld [vmem:[#allocation24 + $0x18] sm:$0xff]  ;;  %v5356_v49 = vld [vmem:[#allocation24 + $0x10] sm:$0xff] }
 0xa50   :  { %v5038_v48 = vrot.slane %v5037_v56, 2  ;;  %v5045_v27 = vrot.slane %v5044_v11, 4  ;;  %v5031_v30 = vrot.slane %v5030_v3, 1  ;;  %v5063_v54 = vmul.f32 0.0625, %v5014_v37  ;;  %v5355_v13 = vld [vmem:[#allocation24 + $0x8] sm:$0xff]  ;;  %v5354_v41 = vld [vmem:[#allocation24] sm:$0xff] }
 0xa51   :  { %v5051_v31 = vsel %vm641_vm0, %v4986_v34, 0.0  ;;  %v5061_v12 = vmul.f32 0.0625, %v4996_v25  ;;  %v5064_v21 = vmul.f32 0.0625, %v5023_v35  ;;  %v5442_v55 = vld [vmem:[#allocation27 + $0x10] sm:$0xff]  ;;  %v5441_v44 = vld [vmem:[#allocation27 + $0x8] sm:$0xff]  ;;  %v5440_v17 = vld [vmem:[#allocation27] sm:$0xff] }
 0xa52   :  { %v5039_v16 = vadd.f32 %v5038_v48, %v5037_v56  ;;  %v5046_v14 = vadd.f32 %v5045_v27, %v5044_v11  ;;  %v5053_v0 = vadd.f32 %v5052_v43, %v5051_v31  ;;  %v5032_v61 = vadd.f32 %v5031_v30, %v5030_v3  ;;  %8695 = vmatpush3.msra.mxu0 %v5442_v55  ;;  %v7743_v56 = vld [vmem:[#allocation16] ss:$0 sm:$0xff]  ;;  %v7746_v27 = vld [vmem:[#allocation19] ss:$0 sm:$0xff]  ;;  %v5528_v35 = vld [vmem:[%s11735_s17 + $0x10] sm:$0xff] }
 0xa53   :  { %v5089_v38 = vsel %vm5088_vm5, %v5062_v32, %v5061_v12  ;;  %8696 = vmatprep.subr.mxu0 %v9701_v1  ;;  %v5529_v37 = vld [vmem:[%s11735_s17 + $0x18] sm:$0xff] }
 0xa54   :  { %v5040_v29 = vrot.slane %v5039_v16, 1  ;;  %v5047_v24 = vrot.slane %v5046_v14, 2  ;;  %v5054_v47 = vrot.slane %v5053_v0, 4  ;;  %v5065_v4 = vmul.f32 0.0625, %v5032_v61  ;;  %8697 = vmatpush3.msra.mxu0 %v5441_v44  ;;  %v5526_v61 = vld [vmem:[%s11735_s17] sm:$0xff] }
 0xa55   :  { %v5091_v5 = vsel %vm5090_vm6, %v5063_v54, %v5089_v38  ;;  %8698 = vmatprep.subr.mxu0 %v9701_v1  ;;  %v7752_v12 = vld [vmem:[#allocation25] ss:$0 sm:$0xff]  ;;  %v7754_v38 = vld [vmem:[#allocation28] ss:$0 sm:$0xff]  ;;  %vm7438_vm6 = vcmask 254976  }
 0xa56   :  { %v5048_v51 = vadd.f32 %v5047_v24, %v5046_v14  ;;  %v5055_v22 = vadd.f32 %v5054_v47, %v5053_v0  ;;  %v5041_v6 = vadd.f32 %v5040_v29, %v5039_v16  ;;  %v5093_v58 = vsel %vm5092_vm7, %v5064_v21, %v5091_v5  ;;  %8699 = vmatpush3.msra.mxu0 %v5440_v17  ;;  %v7749_v16 = vld [vmem:[#allocation22] ss:$0 sm:$0xff] }
 0xa57   :  { %v5095_v62 = vsel %vm5094_vm8, %v5065_v4, %v5093_v58  ;;  %8714 = vmatprep.subr.mxu0 %v9701_v1  ;;  %v7756_v58 = vld [vmem:[%s11736_s18] ss:$0 sm:$0xff]  ;;  %s9705_s18 = smov 112  }
 0xa58   :  { %v5049_v8 = vrot.slane %v5048_v51, 1  ;;  %v5056_v2 = vrot.slane %v5055_v22, 2  ;;  %v5066_v53 = vmul.f32 0.0625, %v5041_v6 }
 0xa5a   :  { %v5050_v50 = vadd.f32 %v5049_v8, %v5048_v51  ;;  %v5057_v33 = vadd.f32 %v5056_v2, %v5055_v22  ;;  %v5097_v46 = vsel %vm5096_vm9, %v5066_v53, %v5095_v62  ;;  %v5527_v51 = vld [vmem:[%s11735_s17 + $0x8] sm:$0xff]  ;;  %s9704_s17 = smov 120  }
 0xa5c   :  { %v5058_v26 = vrot.slane %v5057_v33, 1  ;;  %v5067_v20 = vmul.f32 0.0625, %v5050_v50 }
 0xa5e   :  { %v5059_v7 = vadd.f32 %v5058_v26, %v5057_v33  ;;  %v5099_v19 = vsel %vm5098_vm10, %v5067_v20, %v5097_v46 }
 0xa60   :  { %v5068_v18 = vmul.f32 0.0625, %v5059_v7 }
 0xa62   :  { %v11523_v63 = vsel %vm5100_vm11, %v5068_v18, %v5099_v19 }
 0xa63   :  { %8657 = vmatmul.mubr.msk.f32.vlgmr.msra.gmra.mxu1 %vm641_vm0, %v11523_v63 }
 0xa64   :  { %8660 = vmatpush3.msra.mxu1 %v5183_v23  ;;  %8667 = vmatprep.mubr.msk.f32.mxu1 %vm9703_vm4, %v9701_v1 }
 0xa65   :  { %8661 = vmatprep.subr.mxu1 %v9701_v1 }
 0xa66   :  { %8662 = vmatpush3.msra.mxu1 %v5182_v40 }
 0xa67   :  { %8663 = vmatprep.subr.mxu1 %v9701_v1 }
 0xa68   :  { %8664 = vmatpush3.msra.mxu1 %v5181_v52 }
 0xa69   :  { %8665 = vmatprep.subr.mxu1 %v9701_v1 }
 0xa6a   :  { %8666 = vmatpush3.msra.mxu1 %v5180_v28 }
 0xa6b   :  { %8668 = vmatmul.mubr.msk.f32.vlgmr.msra.gmra.mxu1 %vm641_vm0, %v11523_v63  ;;  %8670 = vmatprep.subr.mxu1 %v9701_v1 }
 0xa6c   :  { %8671 = vmatpush3.msra.mxu1 %v5270_v39  ;;  %8678 = vmatprep.mubr.msk.f32.mxu1 %vm9703_vm4, %v9701_v1 }
 0xa6d   :  { %8672 = vmatprep.subr.mxu1 %v9701_v1 }
 0xa6e   :  { %8673 = vmatpush3.msra.mxu1 %v5269_v59 }
 0xa6f   :  { %8674 = vmatprep.subr.mxu1 %v9701_v1 }
 0xa70   :  { %8675 = vmatpush3.msra.mxu1 %v5268_v36 }
 0xa71   :  { %8676 = vmatprep.subr.mxu1 %v9701_v1 }
 0xa72   :  { %8677 = vmatpush3.msra.mxu1 %v5267_v45 }
 0xa73   :  { %8679 = vmatmul.mubr.msk.f32.vlgmr.msra.gmra.mxu1 %vm641_vm0, %v11523_v63  ;;  %8681 = vmatprep.subr.mxu1 %v9701_v1 }
 0xa74   :  { %8689 = vmatprep.mubr.msk.f32.mxu1 %vm9703_vm4, %v9701_v1  ;;  %8682 = vmatpush3.msra.mxu1 %v5357_v9 }
 0xa75   :  { %8683 = vmatprep.subr.mxu1 %v9701_v1 }
 0xa76   :  { %8684 = vmatpush3.msra.mxu1 %v5356_v49 }
 0xa77   :  { %8685 = vmatprep.subr.mxu1 %v9701_v1 }
 0xa78   :  { %8686 = vmatpush3.msra.mxu1 %v5355_v13 }
 0xa79   :  { %8687 = vmatprep.subr.mxu1 %v9701_v1 }
 0xa7a   :  { %8688 = vmatpush3.msra.mxu1 %v5354_v41 }
 0xa7b   :  { %8703 = vmatprep.subr.mxu1 %v9701_v1 }
 0xb23   :  { %v5170_v11 = vpop.f32.mrf.mxu1 }
 0xb24   :  { %v5171_v3 = vadd.f32 %v7743_v56, %v5170_v11 }
 0xb25   :  { %v8658_v34 = vpop.f32.mrf.mxu1 }
 0xb26   :  { %v5175_v15 = vmin.f32 %v5171_v3, 0.0  ;;  %vm5174_vm12 = vcmp.gt.f32.partialorder %v5171_v3, 0.0 }
 0xb28   :  { %v5176_v48 = vmul.f32 1.442695, %v5175_v15  ;;  %v5937_v15 = vld [vmem:[#allocation30] sm:$0xff] }
 0xb2a   :  { %9241 = vpow2.f32 %v5176_v48 }
 0xb2b   :  { %v5257_v42 = vpop.f32.mrf.mxu1 }
 0xb2c   :  { %v5258_v60 = vadd.f32 %v7746_v27, %v5257_v42 }
 0xb2d   :  { %v8669_v43 = vpop.f32.mrf.mxu1 }
 0xb2e   :  { %v5262_v31 = vmin.f32 %v5258_v60, 0.0  ;;  %vm5261_vm13 = vcmp.gt.f32.partialorder %v5258_v60, 0.0 }
 0xb30   :  { %v5263_v10 = vmul.f32 1.442695, %v5262_v31 }
 0xb32   :  { %9243 = vpow2.f32 %v5263_v10 }
 0xb33   :  { %v5344_v14 = vpop.f32.mrf.mxu1 }
 0xb34   :  { %v5345_v0 = vadd.f32 %v7749_v16, %v5344_v14 }
 0xb35   :  { %v8680_v30 = vpop.f32.mrf.mxu1 }
 0xb36   :  { %v5349_v57 = vmin.f32 %v5345_v0, 0.0  ;;  %vm5348_vm14 = vcmp.gt.f32.partialorder %v5345_v0, 0.0 }
 0xb37   :  { %v9242_v29 = vpop.eup %9241 }
 0xb38   :  { %v7745_v24 = vadd.f32 -1.0, %v9242_v29  ;;  %v5350_v47 = vmul.f32 1.442695, %v5349_v57 }
 0xb3a   :  { %v5179_v25 = vsel %vm5174_vm12, %v5171_v3, %v7745_v24  ;;  %9245 = vpow2.f32 %v5350_v47 }
 0xb3b   :  { %8690 = vmatmul.mubr.msk.f32.vlgmr.msra.gmra.mxu1 %vm641_vm0, %v5179_v25 }
 0xb3c   :  { %8704 = vmatpush3.msra.mxu1 %v5529_v37  ;;  %8711 = vmatprep.mubr.msk.f32.mxu1 %vm9703_vm4, %v9701_v1 }
 0xb3d   :  { %8705 = vmatprep.subr.mxu1 %v9701_v1 }
 0xb3e   :  { %8706 = vmatpush3.msra.mxu1 %v5528_v35 }
 0xb3f   :  { %v9244_v22 = vpop.eup %9243  ;;  %8707 = vmatprep.subr.mxu1 %v9701_v1 }
 0xb40   :  { %v7748_v32 = vadd.f32 -1.0, %v9244_v22  ;;  %8708 = vmatpush3.msra.mxu1 %v5527_v51 }
 0xb41   :  { %8709 = vmatprep.subr.mxu1 %v9701_v1 }
 0xb42   :  { %v5266_v6 = vsel %vm5261_vm13, %v5258_v60, %v7748_v32  ;;  %8710 = vmatpush3.msra.mxu1 %v5526_v61 }
 0xb43   :  { %8701 = vmatmul.mubr.msk.f32.vlgmr.msra.gmra.mxu0 %vm641_vm0, %v5266_v6  ;;  %8724 = vmatprep.subr.mxu1 %v9701_v1 }
 0xb44   :  { %8716 = vmatprep.mubr.msk.f32.mxu0 %vm9703_vm4, %v9701_v1 }
 0xb47   :  { %v9246_v8 = vpop.eup %9245 }
 0xb48   :  { %v7751_v2 = vadd.f32 -1.0, %v9246_v8 }
 0xb4a   :  { %v5353_v54 = vsel %vm5348_vm14, %v5345_v0, %v7751_v2 }
 0xb4b   :  { %8712 = vmatmul.mubr.msk.f32.vlgmr.msra.gmra.mxu1 %vm641_vm0, %v5353_v54 }
 0xb4c   :  { %8726 = vmatprep.mubr.msk.f32.mxu1 %vm9703_vm4, %v9701_v1 }
 0xbfb   :  { %v5434_v21 = vpop.f32.mrf.mxu1 }
 0xbfc   :  { %v5435_v50 = vadd.f32 %v7752_v12, %v5434_v21 }
 0xbfd   :  { %v8691_v33 = vpop.f32.mrf.mxu1 }
 0xbfe   :  { %6016 = vrot.lane.b32.xlu0 %v5435_v50, %s9704_s17  ;;  %8715 = vmatpush3.xpose.msk.msra.mxu0 %vm5620_vm15, %v5435_v50  ;;  %v5439_v4 = vcombine.high %v5435_v50, %v5435_v50 }
 0xbff   :  { %8719 = vmatprep.subr.mxu0 %v9701_v1 }
 0xc00   :  { %6094 = vrot.lane.b32.xlu1 %v5439_v4, %s9704_s17 }
 0xc03   :  { %v5520_v53 = vpop.f32.mrf.mxu0 }
 0xc04   :  { %v5521_v26 = vadd.f32 %v7754_v38, %v5520_v53 }
 0xc05   :  { %v8702_v5 = vpop.f32.mrf.mxu0 }
 0xc06   :  { %6014 = vrot.lane.b32.xlu0 %v5521_v26, %s9704_s17  ;;  %8717 = vmatmul.mubr.msk.f32.vlgmr.msra.gmra.mxu0 %vm5620_vm15, %v5521_v26  ;;  %v5525_v20 = vcombine.high %v5521_v26, %v5521_v26 }
 0xc07   :  { %8720 = vmatpush3.xpose.msk.msra.mxu0 %vm5620_vm15, %v5439_v4  ;;  %8721 = vmatprep.mubr.msk.f32.mxu0 %vm9703_vm4, %v9701_v1 }
 0xc08   :  { %6092 = vrot.lane.b32.xlu1 %v5525_v20, %s9704_s17  ;;  %8729 = vmatprep.subr.mxu0 %v9701_v1 }
 0xc0a   :  { %8722 = vmatmul.mubr.msk.f32.vlgmr.msra.gmra.mxu0 %vm5620_vm15, %v5525_v20 }
 0xc0b   :  { %v5606_v7 = vpop.f32.mrf.mxu1  ;;  %8731 = vmatprep.mubr.msk.f32.mxu0 %vm9703_vm4, %v9701_v1 }
 0xc0c   :  { %v5607_v62 = vadd.f32 %v7756_v58, %v5606_v7 }
 0xc0d   :  { %v8713_v18 = vpop.f32.mrf.mxu1 }
 0xc0e   :  { %6185 = vrot.lane.b32.xlu0 %v5607_v62, %s9704_s17  ;;  %8725 = vmatpush3.msk.msra.mxu1 %vm5789_vm1, %v5607_v62  ;;  %v5611_v46 = vcombine.high %v5607_v62, %v5607_v62 }
 0xc0f   :  { %8734 = vmatprep.subr.mxu1 %v9701_v1 }
 0xc10   :  { %6262 = vrot.lane.b32.xlu1 %v5611_v46, %s9704_s17  ;;  %8730 = vmatpush3.msk.msra.mxu0 %vm5789_vm1, %v5611_v46 }
 0xc11   :  { %8739 = vmatprep.subr.mxu0 %v9701_v1 }
 0xc12   :  { %6419 = vrot.lane.b32.xlu0 %v5435_v50, %s9705_s18 }
 0xc14   :  { %6497 = vrot.lane.b32.xlu1 %v5439_v4, %s9705_s18 }
 0xc16   :  { %6417 = vrot.lane.b32.xlu0 %v5521_v26, %s9705_s18 }
 0xc18   :  { %6495 = vrot.lane.b32.xlu1 %v5525_v20, %s9705_s18 }
 0xc1a   :  { %6588 = vrot.lane.b32.xlu0 %v5607_v62, %s9705_s18 }
 0xc1c   :  { %6665 = vrot.lane.b32.xlu1 %v5611_v46, %s9705_s18 }
 0xc1e   :  { %6822 = vrot.lane.b32.xlu0 %v5435_v50, %s9706_s7 }
 0xc20   :  { %6900 = vrot.lane.b32.xlu1 %v5439_v4, %s9706_s7 }
 0xc22   :  { %6820 = vrot.lane.b32.xlu0 %v5521_v26, %s9706_s7  ;;  %v6340_v26 = vld [vmem:[#allocation30 + $0x8] sm:$0xff] }
 0xc24   :  { %6898 = vrot.lane.b32.xlu1 %v5525_v20, %s9706_s7 }
 0xc26   :  { %6991 = vrot.lane.b32.xlu0 %v5607_v62, %s9706_s7 }
 0xc28   :  { %7068 = vrot.lane.b32.xlu1 %v5611_v46, %s9706_s7 }
 0xc70   :  { %v6017_v56 = vpop.permute.xlu0 %6016 }
 0xc72   :  { %v6095_v42 = vpop.permute.xlu1 %6094 }
 0xc78   :  { %v6015_v48 = vpop.permute.xlu0 %6014 }
 0xc7a   :  { %v6093_v14 = vpop.permute.xlu1 %6092 }
 0xc80   :  { %v6186_v27 = vpop.permute.xlu0 %6185 }
 0xc82   :  { %v6263_v57 = vpop.permute.xlu1 %6262 }
 0xc84   :  { %v6420_v50 = vpop.permute.xlu0 %6419 }
 0xc86   :  { %v6498_v20 = vpop.permute.xlu1 %6497 }
 0xc88   :  { %v6418_v4 = vpop.permute.xlu0 %6417 }
 0xc8a   :  { %v6496_v62 = vpop.permute.xlu1 %6495 }
 0xc8c   :  { %v6589_v5 = vpop.permute.xlu0 %6588 }
 0xcc6   :  { %v5691_v19 = vpop.f32.mrf.mxu0 }
 0xcc7   :  { %v5770_v52 = vsel %vm5769_vm2, %v5691_v19, -inf }
 0xcc8   :  { %v8718_v23 = vpop.f32.mrf.mxu0 }
 0xcca   :  { %v5765_v40 = vpop.f32.mrf.mxu0 }
 0xccb   :  { %v5771_v28 = vsel %vm5769_vm2, %v5765_v40, -inf }
 0xccc   :  { %v5772_v39 = vmax.f32 %v5770_v52, %v5771_v28  ;;  %v8723_v59 = vpop.f32.mrf.mxu0  ;;  %v6666_v52 = vpop.permute.xlu1 %6665  ;;  %v7758_v28 = vld [vmem:[%s11738_s20] ss:$0 sm:$0xff] }
 0xcce   :  { %v5773_v36 = vsub.f32 %v5691_v19, %v5772_v39  ;;  %v5774_v45 = vsub.f32 %v5765_v40, %v5772_v39 }
 0xcd0   :  { %v5775_v9 = vmul.f32 1.442695, %v5773_v36  ;;  %v5777_v49 = vmul.f32 1.442695, %v5774_v45 }
 0xcd2   :  { %9247 = vpow2.f32 %v5775_v9 }
 0xcd3   :  { %9249 = vpow2.f32 %v5777_v49 }
 0xcdf   :  { %v9248_v13 = vpop.eup %9247 }
 0xce0   :  { %v9250_v41 = vpop.eup %9249  ;;  %v5779_v55 = vsel %vm5769_vm2, %v9248_v13, 0.0 }
 0xce1   :  { %v5780_v44 = vsel %vm5769_vm2, %v9250_v41, 0.0 }
 0xce2   :  { %v5781_v17 = vadd.f32 %v5780_v44, %v5779_v55 }
 0xce4   :  { %9251 = vrcp.f32 %v5781_v17 }
 0xcf1   :  { %v9252_v11 = vpop.eup %9251 }
 0xcf2   :  { %v5784_v3 = vmul.f32 %v9252_v11, %v9250_v41  ;;  %v5783_v34 = vmul.f32 %v9252_v11, %v9248_v13 }
 0xcf4   :  { %8727 = vmatmul.mubr.msk.f32.vlgmr.msra.gmra.mxu1 %vm5785_vm3, %v5783_v34  ;;  %8732 = vmatmul.mubr.msk.f32.vlgmr.msra.gmra.mxu0 %vm5785_vm3, %v5784_v3 }
 0xcf5   :  { %8740 = vmatpush3.xpose.msk.msra.mxu0 %vm5620_vm15, %v6017_v56  ;;  %8741 = vmatprep.mubr.msk.f32.mxu0 %vm9703_vm4, %v9701_v1 }
 0xcf6   :  { %8749 = vmatprep.subr.mxu0 %v9701_v1  ;;  %8735 = vmatpush3.msra.mxu1 %v5937_v15 }
 0xcf7   :  { %8736 = vmatprep.mubr.msk.f32.mxu1 %vm9703_vm4, %v9701_v1  ;;  %8744 = vmatprep.subr.mxu1 %v9701_v1 }
 0xcf8   :  { %8742 = vmatmul.mubr.msk.f32.vlgmr.msra.gmra.mxu0 %vm5620_vm15, %v6015_v48 }
 0xcf9   :  { %8750 = vmatpush3.msk.msra.mxu0 %vm5789_vm1, %v6186_v27  ;;  %8751 = vmatprep.mubr.msk.f32.mxu0 %vm9703_vm4, %v9701_v1 }
 0xcfa   :  { %8759 = vmatprep.subr.mxu0 %v9701_v1 }
 0xdb4   :  { %v5858_v60 = vpop.f32.mrf.mxu1  ;;  %v5933_v43 = vpop.f32.mrf.mxu0 }
 0xdb5   :  { %v5940_v31 = vcombine.low %v5858_v60, %v5933_v43 }
 0xdb6   :  { %v8728_v10 = vpop.f32.mrf.mxu1  ;;  %v8733_v16 = vpop.f32.mrf.mxu0 }
 0xdb7   :  { %8737 = vmatmul.mubr.msk.f32.vlgmr.msra.gmra.mxu1 %vm5620_vm15, %v5940_v31  ;;  %v6743_v16 = vld [vmem:[#allocation30 + $0x10] sm:$0xff] }
 0xdb8   :  { %8745 = vmatpush3.xpose.msk.msra.mxu1 %vm5620_vm15, %v6095_v42  ;;  %v6088_v0 = vpop.f32.mrf.mxu0  ;;  %8746 = vmatprep.mubr.msk.f32.mxu1 %vm9703_vm4, %v9701_v1  ;;  %v6823_v42 = vpop.permute.xlu0 %6822 }
 0xdb9   :  { %8754 = vmatprep.subr.mxu1 %v9701_v1  ;;  %v6170_v37 = vsel %vm5769_vm2, %v6088_v0, -inf }
 0xdba   :  { %v8743_v30 = vpop.f32.mrf.mxu0 }
 0xdbb   :  { %8747 = vmatmul.mubr.msk.f32.vlgmr.msra.gmra.mxu1 %vm5620_vm15, %v6093_v14 }
 0xdbc   :  { %8755 = vmatpush3.msk.msra.mxu1 %vm5789_vm1, %v6263_v57  ;;  %8756 = vmatprep.mubr.msk.f32.mxu1 %vm9703_vm4, %v9701_v1  ;;  %v6821_v43 = vpop.permute.xlu0 %6820 }
 0xdbd   :  { %8764 = vmatprep.subr.mxu1 %v9701_v1 }
 0xdc0   :  { %v6992_v14 = vpop.permute.xlu0 %6991 }
 0xe77   :  { %v6009_v29 = vpop.f32.mrf.mxu1 }
 0xe78   :  { %v6013_v39 = vadd.f32 %v7758_v28, %v6009_v29 }
 0xe79   :  { %v8738_v24 = vpop.f32.mrf.mxu1 }
 0xe7b   :  { %v6166_v47 = vpop.f32.mrf.mxu1 }
 0xe7c   :  { %v6171_v25 = vsel %vm5769_vm2, %v6166_v47, -inf }
 0xe7d   :  { %v6172_v35 = vmax.f32 %v6170_v37, %v6171_v25  ;;  %v8748_v51 = vpop.f32.mrf.mxu1 }
 0xe7f   :  { %v6173_v22 = vsub.f32 %v6088_v0, %v6172_v35  ;;  %v6174_v61 = vsub.f32 %v6166_v47, %v6172_v35  ;;  %v6901_v0 = vpop.permute.xlu1 %6900 }
 0xe81   :  { %v6175_v32 = vmul.f32 1.442695, %v6173_v22  ;;  %v6177_v6 = vmul.f32 1.442695, %v6174_v61 }
 0xe83   :  { %9253 = vpow2.f32 %v6175_v32  ;;  %v6899_v29 = vpop.permute.xlu1 %6898 }
 0xe84   :  { %9255 = vpow2.f32 %v6177_v6 }
 0xe87   :  { %v7069_v51 = vpop.permute.xlu1 %7068 }
 0xe90   :  { %v9254_v8 = vpop.eup %9253 }
 0xe91   :  { %v9256_v2 = vpop.eup %9255  ;;  %v6179_v54 = vsel %vm5769_vm2, %v9254_v8, 0.0 }
 0xe92   :  { %v6180_v12 = vsel %vm5769_vm2, %v9256_v2, 0.0 }
 0xe93   :  { %v6181_v21 = vadd.f32 %v6180_v12, %v6179_v54 }
 0xe95   :  { %9257 = vrcp.f32 %v6181_v21 }
 0xea2   :  { %v9258_v33 = vpop.eup %9257 }
 0xea3   :  { %v6184_v38 = vmul.f32 %v9258_v33, %v9256_v2  ;;  %v6183_v53 = vmul.f32 %v9258_v33, %v9254_v8 }
 0xea5   :  { %8752 = vmatmul.mubr.msk.f32.vlgmr.msra.gmra.mxu0 %vm5785_vm3, %v6183_v53  ;;  %8757 = vmatmul.mubr.msk.f32.vlgmr.msra.gmra.mxu1 %vm5785_vm3, %v6184_v38 }
 0xea6   :  { %8765 = vmatpush3.xpose.msk.msra.mxu1 %vm5620_vm15, %v6420_v50  ;;  %8766 = vmatprep.mubr.msk.f32.mxu1 %vm9703_vm4, %v9701_v1 }
 0xea7   :  { %8774 = vmatprep.subr.mxu1 %v9701_v1  ;;  %8760 = vmatpush3.msra.mxu0 %v6340_v26 }
 0xea8   :  { %8761 = vmatprep.mubr.msk.f32.mxu0 %vm9703_vm4, %v9701_v1  ;;  %8769 = vmatprep.subr.mxu0 %v9701_v1 }
 0xea9   :  { %8767 = vmatmul.mubr.msk.f32.vlgmr.msra.gmra.mxu1 %vm5620_vm15, %v6418_v4 }
 0xeaa   :  { %8775 = vmatpush3.msk.msra.mxu1 %vm5789_vm1, %v6589_v5  ;;  %8776 = vmatprep.mubr.msk.f32.mxu1 %vm9703_vm4, %v9701_v1 }
 0xeab   :  { %8784 = vmatprep.subr.mxu1 %v9701_v1 }
 0xf65   :  { %v6258_v58 = vpop.f32.mrf.mxu0  ;;  %v6335_v7 = vpop.f32.mrf.mxu1 }
 0xf66   :  { %v6343_v18 = vcombine.low %v6258_v58, %v6335_v7 }
 0xf67   :  { %v8753_v46 = vpop.f32.mrf.mxu0  ;;  %v8758_v19 = vpop.f32.mrf.mxu1 }
 0xf68   :  { %8762 = vmatmul.mubr.msk.f32.vlgmr.msra.gmra.mxu0 %vm5620_vm15, %v6343_v18  ;;  %v7327_v18 = vld [vmem:[#allocation31 + $0x18] sm:$0xff]  ;;  %v7326_v19 = vld [vmem:[#allocation31 + $0x10] sm:$0xff] }
 0xf69   :  { %8770 = vmatpush3.xpose.msk.msra.mxu0 %vm5620_vm15, %v6498_v20  ;;  %v6491_v23 = vpop.f32.mrf.mxu1  ;;  %8771 = vmatprep.mubr.msk.f32.mxu0 %vm9703_vm4, %v9701_v1  ;;  %v7146_v46 = vld [vmem:[#allocation30 + $0x18] sm:$0xff] }
 0xf6a   :  { %8779 = vmatprep.subr.mxu0 %v9701_v1  ;;  %v6573_v49 = vsel %vm5769_vm2, %v6491_v23, -inf }
 0xf6b   :  { %v8768_v40 = vpop.f32.mrf.mxu1 }
 0xf6c   :  { %8772 = vmatmul.mubr.msk.f32.vlgmr.msra.gmra.mxu0 %vm5620_vm15, %v6496_v62  ;;  %v7324_v40 = vld [vmem:[#allocation31] sm:$0xff] }
 0xf6d   :  { %8780 = vmatpush3.msk.msra.mxu0 %vm5789_vm1, %v6666_v52  ;;  %8781 = vmatprep.mubr.msk.f32.mxu0 %vm9703_vm4, %v9701_v1 }
 0xf6e   :  { %8789 = vmatprep.subr.mxu0 %v9701_v1 }
0x1028   :  { %v6412_v59 = vpop.f32.mrf.mxu0 }
0x1029   :  { %v6416_v36 = vadd.f32 %v6412_v59, %v6013_v39 }
0x102a   :  { %v8763_v45 = vpop.f32.mrf.mxu0 }
0x102c   :  { %v6569_v9 = vpop.f32.mrf.mxu0 }
0x102d   :  { %v6574_v13 = vsel %vm5769_vm2, %v6569_v9, -inf }
0x102e   :  { %v6575_v41 = vmax.f32 %v6573_v49, %v6574_v13  ;;  %v8773_v55 = vpop.f32.mrf.mxu0  ;;  %v9707_v49 = vmov 0  }
0x102f   :  { %8855 = vset.pattern.permute.xlu0 %v9707_v49  ;;  %8856 = vset.pattern.permute.xlu1 %v9707_v49 }
0x1030   :  { %v6576_v44 = vsub.f32 %v6491_v23, %v6575_v41  ;;  %v6577_v17 = vsub.f32 %v6569_v9, %v6575_v41  ;;  %v7325_v23 = vld [vmem:[#allocation31 + $0x8] sm:$0xff] }
0x1032   :  { %v6578_v56 = vmul.f32 1.442695, %v6576_v44  ;;  %v6580_v11 = vmul.f32 1.442695, %v6577_v17 }
0x1034   :  { %9259 = vpow2.f32 %v6578_v56 }
0x1035   :  { %9261 = vpow2.f32 %v6580_v11 }
0x1041   :  { %v9260_v3 = vpop.eup %9259 }
0x1042   :  { %v9262_v34 = vpop.eup %9261  ;;  %v6582_v15 = vsel %vm5769_vm2, %v9260_v3, 0.0 }
0x1043   :  { %v6583_v48 = vsel %vm5769_vm2, %v9262_v34, 0.0 }
0x1044   :  { %v6584_v27 = vadd.f32 %v6583_v48, %v6582_v15 }
0x1046   :  { %9263 = vrcp.f32 %v6584_v27 }
0x1053   :  { %v9264_v60 = vpop.eup %9263 }
0x1054   :  { %v6587_v31 = vmul.f32 %v9264_v60, %v9262_v34  ;;  %v6586_v10 = vmul.f32 %v9264_v60, %v9260_v3  ;;  %v7796_v3 = vld [vmem:[#allocation3] ss:$0 sm:$0xff]  ;;  %v7256_v34 = vlaneseq }
0x1056   :  { %8777 = vmatmul.mubr.msk.f32.vlgmr.msra.gmra.mxu1 %vm5785_vm3, %v6586_v10  ;;  %8782 = vmatmul.mubr.msk.f32.vlgmr.msra.gmra.mxu0 %vm5785_vm3, %v6587_v31  ;;  %v7257_v15 = vand.u32 127, %v7256_v34  ;;  %v7259_v48 = vshrl.u32 %v7256_v34, 7 }
0x1057   :  { %8790 = vmatpush3.xpose.msk.msra.mxu0 %vm5620_vm15, %v6823_v42  ;;  %8791 = vmatprep.mubr.msk.f32.mxu0 %vm9703_vm4, %v9701_v1 }
0x1058   :  { %8799 = vmatprep.subr.mxu0 %v9701_v1  ;;  %8785 = vmatpush3.msra.mxu1 %v6743_v16  ;;  %v7260_v42 = vsub.s32 %v7257_v15, %v7259_v48 }
0x1059   :  { %8786 = vmatprep.mubr.msk.f32.mxu1 %vm9703_vm4, %v9701_v1  ;;  %8794 = vmatprep.subr.mxu1 %v9701_v1 }
0x105a   :  { %8792 = vmatmul.mubr.msk.f32.vlgmr.msra.gmra.mxu0 %vm5620_vm15, %v6821_v43 }
0x105b   :  { %8800 = vmatpush3.msk.msra.mxu0 %vm5789_vm1, %v6992_v14  ;;  %8801 = vmatprep.mubr.msk.f32.mxu0 %vm9703_vm4, %v9701_v1 }
0x105c   :  { %8809 = vmatprep.subr.mxu0 %v9701_v1 }
0x1116   :  { %v6661_v30 = vpop.f32.mrf.mxu1  ;;  %v6738_v57 = vpop.f32.mrf.mxu0 }
0x1117   :  { %v6746_v24 = vcombine.low %v6661_v30, %v6738_v57  ;;  %v7275_v57 = vsub.s32 0, %v7259_v48 }
0x1118   :  { %v8778_v47 = vpop.f32.mrf.mxu1  ;;  %v8783_v37 = vpop.f32.mrf.mxu0 }
0x1119   :  { %8787 = vmatmul.mubr.msk.f32.vlgmr.msra.gmra.mxu1 %vm5620_vm15, %v6746_v24 }
0x111a   :  { %8795 = vmatpush3.xpose.msk.msra.mxu1 %vm5620_vm15, %v6901_v0  ;;  %v6894_v25 = vpop.f32.mrf.mxu0  ;;  %8796 = vmatprep.mubr.msk.f32.mxu1 %vm9703_vm4, %v9701_v1 }
0x111b   :  { %8804 = vmatprep.subr.mxu1 %v9701_v1  ;;  %v6976_v8 = vsel %vm5769_vm2, %v6894_v25, -inf }
0x111c   :  { %v8793_v35 = vpop.f32.mrf.mxu0 }
0x111d   :  { %8797 = vmatmul.mubr.msk.f32.vlgmr.msra.gmra.mxu1 %vm5620_vm15, %v6899_v29  ;;  %v7279_v29 = vsub.s32 1, %v7259_v48 }
0x111e   :  { %8805 = vmatpush3.msk.msra.mxu1 %vm5789_vm1, %v7069_v51  ;;  %8806 = vmatprep.mubr.msk.f32.mxu1 %vm9703_vm4, %v9701_v1 }
0x111f   :  { %8814 = vmatprep.subr.mxu1 %v9701_v1 }
0x11d9   :  { %v6815_v22 = vpop.f32.mrf.mxu1 }
0x11da   :  { %v6819_v61 = vadd.f32 %v6815_v22, %v6416_v36 }
0x11db   :  { %v8788_v32 = vpop.f32.mrf.mxu1 }
0x11dd   :  { %v6972_v6 = vpop.f32.mrf.mxu1 }
0x11de   :  { %v6977_v2 = vsel %vm5769_vm2, %v6972_v6, -inf }
0x11df   :  { %v6978_v54 = vmax.f32 %v6976_v8, %v6977_v2  ;;  %v8798_v12 = vpop.f32.mrf.mxu1 }
0x11e1   :  { %v6979_v21 = vsub.f32 %v6894_v25, %v6978_v54  ;;  %v6980_v50 = vsub.f32 %v6972_v6, %v6978_v54 }
0x11e3   :  { %v6981_v33 = vmul.f32 1.442695, %v6979_v21  ;;  %v6983_v4 = vmul.f32 1.442695, %v6980_v50 }
0x11e5   :  { %9265 = vpow2.f32 %v6981_v33 }
0x11e6   :  { %9267 = vpow2.f32 %v6983_v4 }
0x11f2   :  { %v9266_v38 = vpop.eup %9265 }
0x11f3   :  { %v9268_v53 = vpop.eup %9267  ;;  %v6985_v26 = vsel %vm5769_vm2, %v9266_v38, 0.0 }
0x11f4   :  { %v6986_v5 = vsel %vm5769_vm2, %v9268_v53, 0.0 }
0x11f5   :  { %v6987_v20 = vadd.f32 %v6986_v5, %v6985_v26  ;;  %v7797_v5 = vld [vmem:[%s11742_s24] ss:$0 sm:$0xff]  ;;  %s9708_s24 = smov [#allocation33]  }
0x11f6   :  { %s7446_s26 = sshll.u32 %s9708_s24, 4  ;;  %s7447_s26 = int_to_ptr.vmem [resolvable:$true] %s7446_s26 }
0x11f7   :  { %9269 = vrcp.f32 %v6987_v20  ;;  %s9637_s27 = scalar_lea.vmem %s7447_s26, 32  ;;  %p9642_p7 = scmp.lt.s32.totalorder %s7447_s26, %s7447_s26 }
0x11f8   :  { %p9638_p6 = scmp.ne.s32.totalorder %s7447_s26, %s9637_s27  ;;  %p9643_p8 = scmp.lt.s32.totalorder %s9637_s27, %s9637_s27 }
0x11fa   :  { %p9644_p9 = por %p9643_p8, %p9642_p7 }
0x11fc   :  { %p9645_p10 = pnand %p9644_p9, %p9638_p6 }
0x1204   :  { %v9270_v58 = vpop.eup %9269 }
0x1205   :  { %v6990_v7 = vmul.f32 %v9270_v58, %v9268_v53  ;;  %v6989_v62 = vmul.f32 %v9270_v58, %v9266_v38 }
0x1207   :  { %8802 = vmatmul.mubr.msk.f32.vlgmr.msra.gmra.mxu0 %vm5785_vm3, %v6989_v62  ;;  %8807 = vmatmul.mubr.msk.f32.vlgmr.msra.gmra.mxu1 %vm5785_vm3, %v6990_v7 }
0x1208   :  { %8815 = vmatpush3.msra.mxu1 %v7327_v18  ;;  %8822 = vmatprep.mubr.msk.f32.mxu1 %vm9703_vm4, %v9701_v1 }
0x1209   :  { %8816 = vmatprep.subr.mxu1 %v9701_v1  ;;  %8810 = vmatpush3.msra.mxu0 %v7146_v46 }
0x120a   :  { %8817 = vmatpush3.msra.mxu1 %v7326_v19  ;;  %8811 = vmatprep.mubr.msk.f32.mxu0 %vm9703_vm4, %v9701_v1  ;;  %vm7268_vm4 = vcmask 25600  }
0x120b   :  { %8818 = vmatprep.subr.mxu1 %v9701_v1 }
0x120c   :  { %8819 = vmatpush3.msra.mxu1 %v7325_v23 }
0x120d   :  { %8820 = vmatprep.subr.mxu1 %v9701_v1  ;;  %v7795_v1 = vld [vmem:[%s11739_s21] ss:$0 sm:$0xff] }
0x120e   :  { %8821 = vmatpush3.msra.mxu1 %v7324_v40 }
0x120f   :  { %8823 = vmatmul.mubr.msk.f32.vlgmr.msra.gmra.mxu1 %vm641_vm0, %v11523_v63  ;;  %vm7235_vm0 = vcmask 257024  }
0x12c7   :  { %v7064_v52 = vpop.f32.mrf.mxu0  ;;  %v7141_v28 = vpop.f32.mrf.mxu1 }
0x12c8   :  { %v7149_v39 = vcombine.low %v7064_v52, %v7141_v28 }
0x12c9   :  { %v8803_v59 = vpop.f32.mrf.mxu0  ;;  %v8808_v36 = vpop.f32.mrf.mxu1 }
0x12ca   :  { %8812 = vmatmul.mubr.msk.f32.vlgmr.msra.gmra.mxu0 %vm5620_vm15, %v7149_v39 }
0x12cf   :  { %v11697_v45 = vpop.f32.mrf.mxu1 }
0x12d0   :  { %v7402_v20 = vadd.f32 %v7797_v5, %v11697_v45 }
0x12d1   :  { %v8824_v9 = vpop.f32.mrf.mxu1 }
0x12d2   :  { %v7406_v18 = vcombine.high %v7402_v20, %v7402_v20 }
0x138a   :  { %v7218_v13 = vpop.f32.mrf.mxu0 }
0x138b   :  { %v7222_v41 = vadd.f32 %v7218_v13, %v6819_v61 }
0x138c   :  { %v8813_v63 = vpop.f32.mrf.mxu0 }
0x138d   :  { %v7224_v55 = vcombine.high %v7222_v41, %v7222_v41  ;;  %v7233_v44 = vmul.f32 %v7795_v1, %v7222_v41 }
0x138f   :  { %v7236_v17 = vsel %vm7235_vm0, %v7233_v44, 0.0  ;;  %v7234_v56 = vmul.f32 %v7795_v1, %v7224_v55 }
0x1390   :  { %7237 = vadd.xlane.f32.xlu0 %v7236_v17 }
0x1391   :  { %v7239_v11 = vsel %vm7235_vm0, %v7234_v56, 0.0 }
0x1392   :  { %7240 = vadd.xlane.f32.xlu1 %v7239_v11 }
0x13a6   :  { %7249 = vperm.xlu0 %8855, %v7796_v3  }
0x1419   :  { %v7238_v27 = vpop.xlane.xlu0 %7237 }
0x141b   :  { %v7241_v60 = vpop.xlane.xlu1 %7240 }
0x1421   :  { %v7250_v43 = vpop.permute.xlu0 %7249 }
0x1422   :  { %v7252_v31 = vadd.f32 %v7250_v43, %v7238_v27  ;;  %v7253_v10 = vadd.f32 %v7250_v43, %v7241_v60 }
0x1424   :  { %v7261_v16 = vrot.slane %v7252_v31, %v7260_v42  ;;  %v7265_v14 = vrot.slane %v7253_v10, %v7260_v42 }
0x1426   :  { %v7266_v0 = vsel %vm5088_vm5, %v7265_v14, %v7261_v16 }
0x1427   :  { %v7269_v30 = vsel %vm7268_vm4, %v7266_v0, -inf }
0x1428   :  { %7270 = vmax.xlane.f32.xlu1 %v7269_v30 }
0x14b1   :  { %v7271_v24 = vpop.xlane.xlu1 %7270 }
0x14b2   :  { %v7276_v47 = vrot.slane %v7271_v24, %v7275_v57  ;;  %v7280_v37 = vrot.slane %v7271_v24, %v7279_v29 }
0x14b4   :  { %v7283_v25 = vsub.f32 %v7252_v31, %v7276_v47  ;;  %v7284_v35 = vsub.f32 %v7253_v10, %v7280_v37 }
0x14b6   :  { %v7285_v51 = vmul.f32 1.442695, %v7283_v25  ;;  %v7287_v22 = vmul.f32 1.442695, %v7284_v35 }
0x14b8   :  { %9271 = vpow2.f32 %v7285_v51 }
0x14b9   :  { %9273 = vpow2.f32 %v7287_v22 }
0x14c5   :  { %v9272_v61 = vpop.eup %9271 }
0x14c6   :  { %7292 = vperm.xlu1 %8856, %v9272_v61   ;;  %v9274_v32 = vpop.eup %9273 }
0x14ca   :  { %7295 = vperm.xlu1 %8856, %v9274_v32  }
0x1541   :  { %v7293_v6 = vpop.permute.xlu1 %7292 }
0x1542   :  { %v7300_v2 = vrot.slane %v7293_v6, %v7260_v42 }
0x1545   :  { %v7296_v8 = vpop.permute.xlu1 %7295 }
0x1546   :  { %v7304_v54 = vrot.slane %v7296_v8, %v7260_v42 }
0x1548   :  { %v7305_v12 = vsel %vm5088_vm5, %v7304_v54, %v7300_v2 }
0x1549   :  { %v7307_v21 = vsel %vm7268_vm4, %v7305_v12, 0.0 }
0x154a   :  { %7308 = vadd.xlane.f32.xlu1 %v7307_v21 }
0x15d3   :  { %v7309_v50 = vpop.xlane.xlu1 %7308 }
0x15d4   :  { %9275 = vrcp.f32 %v7309_v50 }
0x15e1   :  { %v9276_v33 = vpop.eup %9275 }
0x15e2   :  { %v7315_v4 = vrot.slane %v9276_v33, %v7275_v57  ;;  %v7319_v53 = vrot.slane %v9276_v33, %v7279_v29 }
0x15e4   :  { %v7322_v38 = vmul.f32 %v9272_v61, %v7315_v4  ;;  %v7323_v26 = vmul.f32 %v9274_v32, %v7319_v53 }
0x15e6   :  { %7410 = vperm.xlu0 %8855, %v7322_v38  }
0x15ea   :  { %7415 = vperm.xlu0 %8855, %v7323_v26  }
0x1661   :  { %v7411_v58 = vpop.permute.xlu0 %7410 }
0x1662   :  { %v7418_v7 = vmul.f32 %v7411_v58, %v7402_v20 }
0x1664   :  { %v7420_v62 = vsel %vm7235_vm0, %v7418_v7, 0.0 }
0x1665   :  { %v7421_v46 = vrot.slane %v7420_v62, 4  ;;  %v7416_v19 = vpop.permute.xlu0 %7415 }
0x1666   :  { %v7419_v23 = vmul.f32 %v7416_v19, %v7406_v18 }
0x1667   :  { %v7422_v40 = vadd.f32 %v7421_v46, %v7420_v62 }
0x1668   :  { %v7427_v52 = vsel %vm7235_vm0, %v7419_v23, 0.0 }
0x1669   :  { %v7423_v28 = vrot.slane %v7422_v40, 2  ;;  %v7428_v39 = vrot.slane %v7427_v52, 4 }
0x166b   :  { %v7424_v59 = vadd.f32 %v7423_v28, %v7422_v40  ;;  %v7429_v36 = vadd.f32 %v7428_v39, %v7427_v52 }
0x166d   :  { %v7430_v9 = vrot.slane %v7429_v36, 2  ;;  %v7425_v49 = vrot.slane %v7424_v59, 1 }
0x166f   :  { %v7431_v13 = vadd.f32 %v7430_v9, %v7429_v36  ;;  %v7426_v45 = vadd.f32 %v7425_v49, %v7424_v59 }
0x1671   :  { %v7432_v1 = vrot.slane %v7431_v13, 1 }
0x1673   :  { %v7433_v41 = vadd.f32 %v7432_v1, %v7431_v13 }
0x1675   :  { %v7436_v63 = vsel %vm5088_vm5, %v7433_v41, %v7426_v45 }
0x1676   :  { %7439 = vst.msk [vmem:[#allocation33] sm:$0x3] %vm7438_vm6, %v7436_v63 }
0x1677   :  { %9648 = shalt.err (!%p9645_p10)
}
0x1678   :  { %7449 = dma.vmem_to_hbm [thread:$0]  %s7447_s26, 32, %s11743_s25, [#allocation6]  }
0x1679   :  { %9677 = dma.done.wait [#allocation6], 32  }
0x167a   :  { %9678 = vsyncadd [#allocation6], 4294967264 }
0x167b   :  { %7453 = vsyncpa [#allocation5], 1 }
0x167c   :  { %7454 = vsyncpa [#allocation8], 1 }
0x167d   :  { %7455 = vsyncpa [#allocation11], 1 }
0x167e   :  { %7456 = vsyncpa [#allocation14], 1 }
0x167f   :  { %7457 = vsyncpa [#allocation17], 1 }
0x1680   :  { %7458 = vsyncpa [#allocation20], 1 }
0x1681   :  { %7459 = vsyncpa [#allocation23], 1 }
0x1682   :  { %7460 = vsyncpa [#allocation26], 1 }
0x1683   :  { %7461 = vsyncpa [#allocation29], 1 }
0x1684   :  { %7462 = vsyncpa [#allocation32], 1 }
0x1685   :  { %7463 = vsyncpa [#allocation6], 1 }

</bundles_post_ra>
